<compile_context>
chip_gen: v5e
topology: v5e:2x2
jax: 0.10.0
libtpu: 0.0.40
codegen_flags: <defaults>
</compile_context>

<pallas_src>
import jax
import jax.numpy as jnp
from jax import lax
from jax.experimental import pallas as pl
from jax.experimental.pallas import tpu as pltpu


def _conv3x3_ky_folded(buf_ref, w_ref, H):
    """3x3 stride-1 convolution over a zero-haloed bf16 VMEM buffer.

    buf_ref : (H+2, Wp, Cin) bf16; valid data at [1:H+1, 0:W, :]; halo rows
              (0, H+1) and pad columns [W, Wp) are zero.
    w_ref   : (3, 3*Cin, Cout) bf16, laid out as [kx, ky*Cin + ci, co]
              (BN scale already folded into the weights).
    Returns : (H*Wp, Cout) f32; row h*Wp + w holds the conv output at (h, w)
              for w < W (pad columns hold garbage and are zeroed / dropped).
    """
    Hp, Wp, Cin = buf_ref.shape
    hw = H * Wp

    # (Hp, Wp, Cin) -> (Hp*Wp, Cin).  Wp % 16 == 0 keeps the packed-bf16
    # (sublane, lane) layout intact across the collapse.
    flat = buf_ref[...].reshape(Hp * Wp, Cin)

    # Fold the three ky taps into the contraction dim (K = 3*Cin).  All three
    # slices start at sublane-aligned offsets (0, Wp, 2*Wp).
    # TODO(synk): check lowered MLIR for lane relayouts in this concat when
    #             Cin is not a multiple of 128; if costly, build the
    #             (hw, 3*Cin) operand in a dedicated scratch instead.
    cat = jnp.concatenate(
        [flat[0:hw], flat[Wp:Wp + hw], flat[2 * Wp:2 * Wp + hw]], axis=1)

    # One bf16 matmul per kx tap, all sharing the same (already bf16) LHS.
    # The +-1 column shifts are applied to the f32 outputs with XLU rolls
    # (non-negative shifts only), which is equivalent to shifting the operand.
    y = [jnp.dot(cat, w_ref[kx], preferred_element_type=jnp.float32)
         for kx in range(3)]
    return (pltpu.roll(y[0], shift=1, axis=0)            # kernel col 0 <- input col w-1
            + y[1]                                       # kernel col 1 <- input col w
            + pltpu.roll(y[2], shift=hw - 1, axis=0))    # kernel col 2 <- input col w+1


def basic_block_kernel(x_ref, w1_ref, w2_ref, b_ref, out_ref,
                       xbuf_ref, mid_ref):
    """One batch element per grid step.

    x_ref   : (1, H, W, Cin)    bf16 un-padded input (NHWC)
    w1_ref  : (3, 3*Cin, Cout)  bf16 conv1 weight (ky folded into K, *bn1 scale)
    w2_ref  : (3, 3*Cout, Cout) bf16 conv2 weight (ky folded into K, *bn2 scale)
    b_ref   : (2, Cout)         f32 [bn1 bias, bn2 bias]
    out_ref : (1, H, Wp, Cout)  f32 padded output (wrapper strips cols >= W)
    xbuf_ref: (H+2, Wp, Cin)    bf16 scratch: zero-haloed input
    mid_ref : (H+2, Wp, Cout)   bf16 scratch: zero-haloed conv1 activation
    """
    _, H, W, Cin = x_ref.shape
    Cout = out_ref.shape[-1]
    Hp, Wp, _ = xbuf_ref.shape

    # ---- stage the input into the zero-haloed bf16 buffer -------------------
    # Only the thin halo is (re)zeroed every step (megacore-safe); the interior
    # is fully overwritten.  The roll-wrap correctness relies on the pad
    # columns / halo rows being zero at every grid step.
    zi = jnp.zeros((1, Wp, Cin), jnp.bfloat16)
    xbuf_ref[0:1, :, :] = zi
    xbuf_ref[Hp - 1:Hp, :, :] = zi
    xbuf_ref[1:Hp - 1, W:Wp, :] = jnp.zeros((H, Wp - W, Cin), jnp.bfloat16)
    xbuf_ref[1:Hp - 1, 0:W, :] = x_ref[0]

    # ---- conv1 (bn1 scale folded into w1) + bias + relu ----------------------
    acc1 = _conv3x3_ky_folded(xbuf_ref, w1_ref, H)
    y1 = jnp.maximum(acc1 + b_ref[0:1, :], 0.0).reshape(H, Wp, Cout)

    # ---- stage conv1 output for conv2: full-width store, thin re-zeroing ----
    zo = jnp.zeros((1, Wp, Cout), jnp.bfloat16)
    mid_ref[0:1, :, :] = zo
    mid_ref[Hp - 1:Hp, :, :] = zo
    mid_ref[1:Hp - 1, :, :] = y1.astype(jnp.bfloat16)
    mid_ref[1:Hp - 1, W:Wp, :] = jnp.zeros((H, Wp - W, Cout), jnp.bfloat16)

    # ---- conv2 (bn2 scale folded into w2) + bias + residual + relu ----------
    acc2 = _conv3x3_ky_folded(mid_ref, w2_ref, H)
    shortcut = xbuf_ref[1:Hp - 1, :, :]          # bf16; zeros in pad columns
    out = jnp.maximum(
        acc2.reshape(H, Wp, Cout) + b_ref[1:2, :] + shortcut.astype(jnp.float32),
        0.0)
    out_ref[...] = out.reshape(1, H, Wp, Cout)   # single unmasked full store


def fold_bn(gamma, beta, running_mean, running_var, eps=1e-5):
    scale = gamma / jnp.sqrt(running_var + eps)
    bias = beta - running_mean * scale
    return scale, bias


def _fold_weight(w_oihw, scale):
    """OIHW -> (kx, ky*Cin + ci, Cout) bf16 with the BN scale folded in."""
    w = w_oihw * scale[:, None, None, None]          # scale per out-channel
    w = jnp.transpose(w, (3, 2, 1, 0))               # (kw, kh, ci, co)
    kw, kh, ci, co = w.shape
    return w.reshape(kw, kh * ci, co).astype(jnp.bfloat16)


def basic_block_forward(x_nchw, params):
    """x_nchw: (N, C, H, W) float32. Returns (N, C, H, W) float32."""
    N, Cin, H, W = x_nchw.shape
    w1_oihw = params["w1"]          # (Cout, Cin, 3, 3)
    w2_oihw = params["w2"]          # (Cout, Cout, 3, 3)
    Cout = w1_oihw.shape[0]
    assert Cin == Cout, "downsample=None / stride=1 requires Cin == Cout"

    Hp = H + 2
    # Round the padded width to a multiple of 16 (bf16 sublane packing) so the
    # flattened view / ky slices stay aligned; also guarantees >= 2 zero pad
    # columns, which the roll-wrap correctness depends on.
    Wp = ((W + 2 + 15) // 16) * 16
    assert Wp >= W + 2

    # NCHW -> NHWC; bf16 halves the activation DMA (the MXU consumes bf16).
    x_nhwc = jnp.transpose(x_nchw, (0, 2, 3, 1)).astype(jnp.bfloat16)

    s1, b1 = fold_bn(params["g1"], params["be1"], params["m1"], params["v1"])
    s2, b2 = fold_bn(params["g2"], params["be2"], params["m2"], params["v2"])
    w1 = _fold_weight(w1_oihw, s1)                       # (3, 3*Cin, Cout)
    w2 = _fold_weight(w2_oihw, s2)                       # (3, 3*Cout, Cout)
    bias = jnp.stack([b1, b2], axis=0).astype(jnp.float32)   # (2, Cout)

    out_padded = pl.pallas_call(
        basic_block_kernel,
        out_shape=jax.ShapeDtypeStruct((N, H, Wp, Cout), jnp.float32),
        grid_spec=pltpu.PrefetchScalarGridSpec(
            num_scalar_prefetch=0,
            grid=(N,),
            in_specs=[
                pl.BlockSpec((1, H, W, Cin), lambda n: (n, 0, 0, 0)),
                pl.BlockSpec((3, 3 * Cin, Cout), lambda n: (0, 0, 0)),
                pl.BlockSpec((3, 3 * Cout, Cout), lambda n: (0, 0, 0)),
                pl.BlockSpec((2, Cout), lambda n: (0, 0)),
            ],
            out_specs=pl.BlockSpec((1, H, Wp, Cout), lambda n: (n, 0, 0, 0)),
            scratch_shapes=[
                pltpu.VMEM((Hp, Wp, Cin), jnp.bfloat16),
                pltpu.VMEM((Hp, Wp, Cout), jnp.bfloat16),
            ],
        ),
        compiler_params=pltpu.CompilerParams(
            dimension_semantics=("parallel",),       # feeds both v7x TCs at N>=2
            vmem_limit_bytes=48 * 1024 * 1024,       # headroom vs v7x's 64 MiB VMEM
        ),
    )(x_nhwc, w1, w2, bias)

    # Strip pad columns in the wrapper (keeps the kernel store unmasked/dense).
    return jnp.transpose(out_padded[:, :, :W, :], (0, 3, 1, 2))


def reference_forward(x_nchw, params, mxu_bf16=False):
    """Plain-JAX reference (NHWC convs, f32 accumulation).

    With mxu_bf16=True the conv operands (and the BN-scale-folded weights) are
    rounded to bf16 to mirror the kernel's MXU operand precision."""
    f32 = jnp.float32

    def q(a):
        a = a.astype(f32)
        return a.astype(jnp.bfloat16).astype(f32) if mxu_bf16 else a

    s1, b1 = fold_bn(params["g1"], params["be1"], params["m1"], params["v1"])
    s2, b2 = fold_bn(params["g2"], params["be2"], params["m2"], params["v2"])

    x = q(jnp.transpose(x_nchw, (0, 2, 3, 1)))
    w1 = jnp.transpose(params["w1"], (2, 3, 1, 0)).astype(f32)   # HWIO
    w2 = jnp.transpose(params["w2"], (2, 3, 1, 0)).astype(f32)
    dn = ("NHWC", "HWIO", "NHWC")

    if mxu_bf16:
        y = lax.conv_general_dilated(x, q(w1 * s1), (1, 1), "SAME",
                                     dimension_numbers=dn,
                                     precision=lax.Precision.HIGHEST) + b1
        y = jnp.maximum(y, 0.0)
        y = lax.conv_general_dilated(q(y), q(w2 * s2), (1, 1), "SAME",
                                     dimension_numbers=dn,
                                     precision=lax.Precision.HIGHEST) + b2
        y = jnp.maximum(y + x, 0.0)
    else:
        y = lax.conv_general_dilated(x, w1, (1, 1), "SAME",
                                     dimension_numbers=dn,
                                     precision=lax.Precision.HIGHEST)
        y = jnp.maximum(y * s1 + b1, 0.0)
        y = lax.conv_general_dilated(y, w2, (1, 1), "SAME",
                                     dimension_numbers=dn,
                                     precision=lax.Precision.HIGHEST)
        y = jnp.maximum(y * s2 + b2 + x, 0.0)
    return jnp.transpose(y, (0, 3, 1, 2))


def make_params(key, in_channels, out_channels):
    ks = jax.random.split(key, 6)
    # Deterministic synthetic weights; BN uses eval-mode running stats.
    return {
        "w1": 0.1 * jax.random.normal(ks[0], (out_channels, in_channels, 3, 3),
                                      jnp.float32),
        "w2": 0.1 * jax.random.normal(ks[1], (out_channels, out_channels, 3, 3),
                                      jnp.float32),
        "g1": 1.0 + 0.1 * jax.random.normal(ks[2], (out_channels,), jnp.float32),
        "be1": 0.1 * jax.random.normal(ks[3], (out_channels,), jnp.float32),
        "m1": jnp.zeros((out_channels,), jnp.float32),
        "v1": jnp.ones((out_channels,), jnp.float32),
        "g2": 1.0 + 0.1 * jax.random.normal(ks[4], (out_channels,), jnp.float32),
        "be2": 0.1 * jax.random.normal(ks[5], (out_channels,), jnp.float32),
        "m2": jnp.zeros((out_channels,), jnp.float32),
        "v2": jnp.ones((out_channels,), jnp.float32),
    }


if __name__ == "__main__":
    key = jax.random.PRNGKey(0)
    k_x, k_p = jax.random.split(key)

    N, C, H, W = 2, 4, 16, 16
    x = jax.random.normal(k_x, (N, C, H, W), jnp.float32)
    params = make_params(k_p, in_channels=C, out_channels=C)

    out = jax.block_until_ready(basic_block_forward(x, params))
    assert out.shape == (N, C, H, W)

    # Tight check vs a reference that mirrors the kernel's bf16 MXU operands
    # (with BN scale folded into the weights), plus a loose check vs pure f32.
    ref_bf16 = jax.block_until_ready(reference_forward(x, params, mxu_bf16=True))
    ref_f32 = jax.block_until_ready(reference_forward(x, params, mxu_bf16=False))

    err_bf16 = float(jnp.max(jnp.abs(out - ref_bf16)))
    err_f32 = float(jnp.max(jnp.abs(out - ref_f32)))
    assert err_bf16 < 2e-2, f"Pallas kernel mismatch vs bf16-matched ref: {err_bf16}"
    assert err_f32 < 1e-1, f"Pallas kernel mismatch vs f32 ref: {err_f32}"

    print("KERNEL_OK")
</pallas_src>

<mosaic_0001>
module attributes {stable_mosaic.version = 11 : i64} {
  func.func @basic_block_kernel(%arg0: i32, %arg1: memref<1x16x16x4xbf16, #tpu.memory_space<vmem>>, %arg2: memref<3x12x4xbf16, #tpu.memory_space<vmem>>, %arg3: memref<3x12x4xbf16, #tpu.memory_space<vmem>>, %arg4: memref<2x4xf32, #tpu.memory_space<vmem>>, %arg5: memref<1x16x32x4xf32, #tpu.memory_space<vmem>>, %arg6: memref<18x32x4xbf16, #tpu.memory_space<vmem>>, %arg7: memref<18x32x4xbf16, #tpu.memory_space<vmem>>) attributes {dimension_semantics = [#tpu.dimension_semantics<parallel>], iteration_bounds = array<i64: 2>, scalar_prefetch = 0 : i64, scratch_operands = 2 : i64, tpu.core_type = #tpu.core_type<tc>, window_params = [{transform_indices = @transform_0, window_bounds = array<i64: 1, 16, 16, 4>}, {pipeline_mode = #tpu.pipeline_mode<synchronous>, transform_indices = @transform_1, window_bounds = array<i64: 3, 12, 4>}, {pipeline_mode = #tpu.pipeline_mode<synchronous>, transform_indices = @transform_2, window_bounds = array<i64: 3, 12, 4>}, {pipeline_mode = #tpu.pipeline_mode<synchronous>, transform_indices = @transform_3, window_bounds = array<i64: 2, 4>}, {transform_indices = @transform_4, window_bounds = array<i64: 1, 16, 32, 4>}]} {
    %cst = arith.constant 0.000000e+00 : bf16
    %0 = vector.broadcast %cst : bf16 to vector<1x32x4xbf16>
    %c0 = arith.constant 0 : index
    %c0_0 = arith.constant 0 : index
    %c0_1 = arith.constant 0 : index
    %1 = vector.load %arg6[%c0, %c0_0, %c0_1] : memref<18x32x4xbf16, #tpu.memory_space<vmem>>, vector<1x32x4xbf16>
    tpu.vector_store %arg6[%c0, %c0_0, %c0_1], %0 {strides = array<i32>} : memref<18x32x4xbf16, #tpu.memory_space<vmem>>, vector<1x32x4xbf16>,
    %c17 = arith.constant 17 : index
    %c0_2 = arith.constant 0 : index
    %c0_3 = arith.constant 0 : index
    %2 = vector.load %arg6[%c17, %c0_2, %c0_3] : memref<18x32x4xbf16, #tpu.memory_space<vmem>>, vector<1x32x4xbf16>
    tpu.vector_store %arg6[%c17, %c0_2, %c0_3], %0 {strides = array<i32>} : memref<18x32x4xbf16, #tpu.memory_space<vmem>>, vector<1x32x4xbf16>,
    %cst_4 = arith.constant 0.000000e+00 : bf16
    %3 = vector.broadcast %cst_4 : bf16 to vector<16x16x4xbf16>
    %c1 = arith.constant 1 : index
    %c16 = arith.constant 16 : index
    %c0_5 = arith.constant 0 : index
    %4 = vector.load %arg6[%c1, %c16, %c0_5] : memref<18x32x4xbf16, #tpu.memory_space<vmem>>, vector<16x16x4xbf16>
    tpu.vector_store %arg6[%c1, %c16, %c0_5], %3 {strides = array<i32>} : memref<18x32x4xbf16, #tpu.memory_space<vmem>>, vector<16x16x4xbf16>,
    %c0_6 = arith.constant 0 : index
    %c0_7 = arith.constant 0 : index
    %c0_8 = arith.constant 0 : index
    %c0_9 = arith.constant 0 : index
    %5 = vector.load %arg1[%c0_6, %c0_7, %c0_8, %c0_9] : memref<1x16x16x4xbf16, #tpu.memory_space<vmem>>, vector<1x16x16x4xbf16>
    %6 = vector.shape_cast %5 : vector<1x16x16x4xbf16> to vector<16x16x4xbf16>
    %c1_10 = arith.constant 1 : index
    %c0_11 = arith.constant 0 : index
    %c0_12 = arith.constant 0 : index
    %7 = vector.load %arg6[%c1_10, %c0_11, %c0_12] : memref<18x32x4xbf16, #tpu.memory_space<vmem>>, vector<16x16x4xbf16>
    tpu.vector_store %arg6[%c1_10, %c0_11, %c0_12], %6 {strides = array<i32>} : memref<18x32x4xbf16, #tpu.memory_space<vmem>>, vector<16x16x4xbf16>,
    %c0_13 = arith.constant 0 : index
    %c0_14 = arith.constant 0 : index
    %c0_15 = arith.constant 0 : index
    %8 = vector.load %arg6[%c0_13, %c0_14, %c0_15] : memref<18x32x4xbf16, #tpu.memory_space<vmem>>, vector<18x32x4xbf16>
    %9 = vector.shape_cast %8 : vector<18x32x4xbf16> to vector<576x4xbf16>
    %10 = vector.extract_strided_slice %9 {offsets = [0, 0], sizes = [512, 4], strides = [1, 1]} : vector<576x4xbf16> to vector<512x4xbf16>
    %11 = vector.extract_strided_slice %9 {offsets = [32, 0], sizes = [512, 4], strides = [1, 1]} : vector<576x4xbf16> to vector<512x4xbf16>
    %12 = vector.extract_strided_slice %9 {offsets = [64, 0], sizes = [512, 4], strides = [1, 1]} : vector<576x4xbf16> to vector<512x4xbf16>
    %13 = tpu.concatenate %10, %11, %12 in 1 : vector<512x4xbf16>, vector<512x4xbf16>, vector<512x4xbf16> -> vector<512x12xbf16>
    %c0_16 = arith.constant 0 : index
    %c0_17 = arith.constant 0 : index
    %c0_18 = arith.constant 0 : index
    %14 = vector.load %arg2[%c0_16, %c0_17, %c0_18] : memref<3x12x4xbf16, #tpu.memory_space<vmem>>, vector<1x12x4xbf16>
    %15 = vector.shape_cast %14 : vector<1x12x4xbf16> to vector<12x4xbf16>
    %cst_19 = arith.constant dense<0.000000e+00> : vector<512x4xf32>
    %16 = tpu.matmul %13, %15, %cst_19 {dimension_numbers = #tpu.dot_dimension_numbers<[1], [0], [0], [1], [0, 0, 1, 1], [], []>} : vector<512x12xbf16>, vector<12x4xbf16>, vector<512x4xf32> -> vector<512x4xf32>
    %c1_20 = arith.constant 1 : index
    %c0_21 = arith.constant 0 : index
    %c0_22 = arith.constant 0 : index
    %17 = vector.load %arg2[%c1_20, %c0_21, %c0_22] : memref<3x12x4xbf16, #tpu.memory_space<vmem>>, vector<1x12x4xbf16>
    %18 = vector.shape_cast %17 : vector<1x12x4xbf16> to vector<12x4xbf16>
    %cst_23 = arith.constant dense<0.000000e+00> : vector<512x4xf32>
    %19 = tpu.matmul %13, %18, %cst_23 {dimension_numbers = #tpu.dot_dimension_numbers<[1], [0], [0], [1], [0, 0, 1, 1], [], []>} : vector<512x12xbf16>, vector<12x4xbf16>, vector<512x4xf32> -> vector<512x4xf32>
    %c2 = arith.constant 2 : index
    %c0_24 = arith.constant 0 : index
    %c0_25 = arith.constant 0 : index
    %20 = vector.load %arg2[%c2, %c0_24, %c0_25] : memref<3x12x4xbf16, #tpu.memory_space<vmem>>, vector<1x12x4xbf16>
    %21 = vector.shape_cast %20 : vector<1x12x4xbf16> to vector<12x4xbf16>
    %cst_26 = arith.constant dense<0.000000e+00> : vector<512x4xf32>
    %22 = tpu.matmul %13, %21, %cst_26 {dimension_numbers = #tpu.dot_dimension_numbers<[1], [0], [0], [1], [0, 0, 1, 1], [], []>} : vector<512x12xbf16>, vector<12x4xbf16>, vector<512x4xf32> -> vector<512x4xf32>
    %c1_i32 = arith.constant 1 : i32
    %23 = tpu.dynamic_rotate %16 by %c1_i32 dim 0 : vector<512x4xf32>, i32 -> vector<512x4xf32>
    %24 = arith.addf %23, %19 : vector<512x4xf32>
    %c511_i32 = arith.constant 511 : i32
    %25 = tpu.dynamic_rotate %22 by %c511_i32 dim 0 : vector<512x4xf32>, i32 -> vector<512x4xf32>
    %26 = arith.addf %24, %25 : vector<512x4xf32>
    %c0_27 = arith.constant 0 : index
    %c0_28 = arith.constant 0 : index
    %27 = vector.load %arg4[%c0_27, %c0_28] : memref<2x4xf32, #tpu.memory_space<vmem>>, vector<1x4xf32>
    %28 = vector.broadcast %27 : vector<1x4xf32> to vector<512x4xf32>
    %29 = arith.addf %26, %28 : vector<512x4xf32>
    %cst_29 = arith.constant 0.000000e+00 : f32
    %30 = vector.broadcast %cst_29 : f32 to vector<512x4xf32>
    %31 = arith.maximumf %29, %30 : vector<512x4xf32>
    %32 = vector.shape_cast %31 : vector<512x4xf32> to vector<16x32x4xf32>
    %cst_30 = arith.constant 0.000000e+00 : bf16
    %33 = vector.broadcast %cst_30 : bf16 to vector<1x32x4xbf16>
    %c0_31 = arith.constant 0 : index
    %c0_32 = arith.constant 0 : index
    %c0_33 = arith.constant 0 : index
    %34 = vector.load %arg7[%c0_31, %c0_32, %c0_33] : memref<18x32x4xbf16, #tpu.memory_space<vmem>>, vector<1x32x4xbf16>
    tpu.vector_store %arg7[%c0_31, %c0_32, %c0_33], %33 {strides = array<i32>} : memref<18x32x4xbf16, #tpu.memory_space<vmem>>, vector<1x32x4xbf16>,
    %c17_34 = arith.constant 17 : index
    %c0_35 = arith.constant 0 : index
    %c0_36 = arith.constant 0 : index
    %35 = vector.load %arg7[%c17_34, %c0_35, %c0_36] : memref<18x32x4xbf16, #tpu.memory_space<vmem>>, vector<1x32x4xbf16>
    tpu.vector_store %arg7[%c17_34, %c0_35, %c0_36], %33 {strides = array<i32>} : memref<18x32x4xbf16, #tpu.memory_space<vmem>>, vector<1x32x4xbf16>,
    %36 = arith.truncf %32 : vector<16x32x4xf32> to vector<16x32x4xbf16>
    %c1_37 = arith.constant 1 : index
    %c0_38 = arith.constant 0 : index
    %c0_39 = arith.constant 0 : index
    %37 = vector.load %arg7[%c1_37, %c0_38, %c0_39] : memref<18x32x4xbf16, #tpu.memory_space<vmem>>, vector<16x32x4xbf16>
    tpu.vector_store %arg7[%c1_37, %c0_38, %c0_39], %36 {strides = array<i32>} : memref<18x32x4xbf16, #tpu.memory_space<vmem>>, vector<16x32x4xbf16>,
    %cst_40 = arith.constant 0.000000e+00 : bf16
    %38 = vector.broadcast %cst_40 : bf16 to vector<16x16x4xbf16>
    %c1_41 = arith.constant 1 : index
    %c16_42 = arith.constant 16 : index
    %c0_43 = arith.constant 0 : index
    %39 = vector.load %arg7[%c1_41, %c16_42, %c0_43] : memref<18x32x4xbf16, #tpu.memory_space<vmem>>, vector<16x16x4xbf16>
    tpu.vector_store %arg7[%c1_41, %c16_42, %c0_43], %38 {strides = array<i32>} : memref<18x32x4xbf16, #tpu.memory_space<vmem>>, vector<16x16x4xbf16>,
    %c0_44 = arith.constant 0 : index
    %c0_45 = arith.constant 0 : index
    %c0_46 = arith.constant 0 : index
    %40 = vector.load %arg7[%c0_44, %c0_45, %c0_46] : memref<18x32x4xbf16, #tpu.memory_space<vmem>>, vector<18x32x4xbf16>
    %41 = vector.shape_cast %40 : vector<18x32x4xbf16> to vector<576x4xbf16>
    %42 = vector.extract_strided_slice %41 {offsets = [0, 0], sizes = [512, 4], strides = [1, 1]} : vector<576x4xbf16> to vector<512x4xbf16>
    %43 = vector.extract_strided_slice %41 {offsets = [32, 0], sizes = [512, 4], strides = [1, 1]} : vector<576x4xbf16> to vector<512x4xbf16>
    %44 = vector.extract_strided_slice %41 {offsets = [64, 0], sizes = [512, 4], strides = [1, 1]} : vector<576x4xbf16> to vector<512x4xbf16>
    %45 = tpu.concatenate %42, %43, %44 in 1 : vector<512x4xbf16>, vector<512x4xbf16>, vector<512x4xbf16> -> vector<512x12xbf16>
    %c0_47 = arith.constant 0 : index
    %c0_48 = arith.constant 0 : index
    %c0_49 = arith.constant 0 : index
    %46 = vector.load %arg3[%c0_47, %c0_48, %c0_49] : memref<3x12x4xbf16, #tpu.memory_space<vmem>>, vector<1x12x4xbf16>
    %47 = vector.shape_cast %46 : vector<1x12x4xbf16> to vector<12x4xbf16>
    %cst_50 = arith.constant dense<0.000000e+00> : vector<512x4xf32>
    %48 = tpu.matmul %45, %47, %cst_50 {dimension_numbers = #tpu.dot_dimension_numbers<[1], [0], [0], [1], [0, 0, 1, 1], [], []>} : vector<512x12xbf16>, vector<12x4xbf16>, vector<512x4xf32> -> vector<512x4xf32>
    %c1_51 = arith.constant 1 : index
    %c0_52 = arith.constant 0 : index
    %c0_53 = arith.constant 0 : index
    %49 = vector.load %arg3[%c1_51, %c0_52, %c0_53] : memref<3x12x4xbf16, #tpu.memory_space<vmem>>, vector<1x12x4xbf16>
    %50 = vector.shape_cast %49 : vector<1x12x4xbf16> to vector<12x4xbf16>
    %cst_54 = arith.constant dense<0.000000e+00> : vector<512x4xf32>
    %51 = tpu.matmul %45, %50, %cst_54 {dimension_numbers = #tpu.dot_dimension_numbers<[1], [0], [0], [1], [0, 0, 1, 1], [], []>} : vector<512x12xbf16>, vector<12x4xbf16>, vector<512x4xf32> -> vector<512x4xf32>
    %c2_55 = arith.constant 2 : index
    %c0_56 = arith.constant 0 : index
    %c0_57 = arith.constant 0 : index
    %52 = vector.load %arg3[%c2_55, %c0_56, %c0_57] : memref<3x12x4xbf16, #tpu.memory_space<vmem>>, vector<1x12x4xbf16>
    %53 = vector.shape_cast %52 : vector<1x12x4xbf16> to vector<12x4xbf16>
    %cst_58 = arith.constant dense<0.000000e+00> : vector<512x4xf32>
    %54 = tpu.matmul %45, %53, %cst_58 {dimension_numbers = #tpu.dot_dimension_numbers<[1], [0], [0], [1], [0, 0, 1, 1], [], []>} : vector<512x12xbf16>, vector<12x4xbf16>, vector<512x4xf32> -> vector<512x4xf32>
    %c1_i32_59 = arith.constant 1 : i32
    %55 = tpu.dynamic_rotate %48 by %c1_i32_59 dim 0 : vector<512x4xf32>, i32 -> vector<512x4xf32>
    %56 = arith.addf %55, %51 : vector<512x4xf32>
    %c511_i32_60 = arith.constant 511 : i32
    %57 = tpu.dynamic_rotate %54 by %c511_i32_60 dim 0 : vector<512x4xf32>, i32 -> vector<512x4xf32>
    %58 = arith.addf %56, %57 : vector<512x4xf32>
    %c1_61 = arith.constant 1 : index
    %c0_62 = arith.constant 0 : index
    %c0_63 = arith.constant 0 : index
    %59 = vector.load %arg6[%c1_61, %c0_62, %c0_63] : memref<18x32x4xbf16, #tpu.memory_space<vmem>>, vector<16x32x4xbf16>
    %60 = vector.shape_cast %58 : vector<512x4xf32> to vector<16x32x4xf32>
    %c1_64 = arith.constant 1 : index
    %c0_65 = arith.constant 0 : index
    %61 = vector.load %arg4[%c1_64, %c0_65] : memref<2x4xf32, #tpu.memory_space<vmem>>, vector<1x4xf32>
    %62 = vector.shape_cast %61 : vector<1x4xf32> to vector<1x1x4xf32>
    %63 = vector.broadcast %62 : vector<1x1x4xf32> to vector<16x32x4xf32>
    %64 = arith.addf %60, %63 : vector<16x32x4xf32>
    %65 = arith.extf %59 : vector<16x32x4xbf16> to vector<16x32x4xf32>
    %66 = arith.addf %64, %65 : vector<16x32x4xf32>
    %cst_66 = arith.constant 0.000000e+00 : f32
    %67 = vector.broadcast %cst_66 : f32 to vector<16x32x4xf32>
    %68 = arith.maximumf %66, %67 : vector<16x32x4xf32>
    %69 = vector.shape_cast %68 : vector<16x32x4xf32> to vector<1x16x32x4xf32>
    %c0_67 = arith.constant 0 : index
    %c0_68 = arith.constant 0 : index
    %c0_69 = arith.constant 0 : index
    %c0_70 = arith.constant 0 : index
    %70 = vector.load %arg5[%c0_67, %c0_68, %c0_69, %c0_70] : memref<1x16x32x4xf32, #tpu.memory_space<vmem>>, vector<1x16x32x4xf32>
    tpu.vector_store %arg5[%c0_67, %c0_68, %c0_69, %c0_70], %69 {strides = array<i32>} : memref<1x16x32x4xf32, #tpu.memory_space<vmem>>, vector<1x16x32x4xf32>,
    return
  }
  func.func @transform_0(%arg0: i32) -> (i32, i32, i32, i32) {
    %c0_i32 = arith.constant 0 : i32
    %c0_i32_0 = arith.constant 0 : i32
    %c0_i32_1 = arith.constant 0 : i32
    %c0_i32_2 = arith.constant 0 : i32
    return %arg0, %c0_i32, %c0_i32_0, %c0_i32_1 : i32, i32, i32, i32
  }
  func.func @transform_1(%arg0: i32) -> (i32, i32, i32) {
    %c0_i32 = arith.constant 0 : i32
    %c0_i32_0 = arith.constant 0 : i32
    %c0_i32_1 = arith.constant 0 : i32
    %c0_i32_2 = arith.constant 0 : i32
    return %c0_i32, %c0_i32_0, %c0_i32_1 : i32, i32, i32
  }
  func.func @transform_2(%arg0: i32) -> (i32, i32, i32) {
    %c0_i32 = arith.constant 0 : i32
    %c0_i32_0 = arith.constant 0 : i32
    %c0_i32_1 = arith.constant 0 : i32
    %c0_i32_2 = arith.constant 0 : i32
    return %c0_i32, %c0_i32_0, %c0_i32_1 : i32, i32, i32
  }
  func.func @transform_3(%arg0: i32) -> (i32, i32) {
    %c0_i32 = arith.constant 0 : i32
    %c0_i32_0 = arith.constant 0 : i32
    %c0_i32_1 = arith.constant 0 : i32
    return %c0_i32, %c0_i32_0 : i32, i32
  }
  func.func @transform_4(%arg0: i32) -> (i32, i32, i32, i32) {
    %c0_i32 = arith.constant 0 : i32
    %c0_i32_0 = arith.constant 0 : i32
    %c0_i32_1 = arith.constant 0 : i32
    %c0_i32_2 = arith.constant 0 : i32
    return %arg0, %c0_i32, %c0_i32_0, %c0_i32_1 : i32, i32, i32, i32
  }
}

</mosaic_0001>

<bundles_post_ra>
// kernel: tpu_custom_call.1
= control target key start
LH: loop header
LB: loop body
LE: loop exit
PB: predicated region body
PF: predicated region fallthrough
CT: control target
= control target key end

     0   :  { %s4939_s15 = smov 0   ;;  %s7264_s0 = inlined_call_operand.vmem [shape: bf16[2,16,16,4], index: 0, kind: input, shape index: {}]   ;;  %s7265_s1 = inlined_call_operand.vmem [shape: bf16[3,12,4], index: 1, kind: input, shape index: {}]   ;;  %s7266_s2 = inlined_call_operand.vmem [shape: bf16[3,12,4], index: 2, kind: input, shape index: {}]   ;;  %s7267_s3 = inlined_call_operand.vmem [shape: f32[2,4], index: 3, kind: input, shape index: {}]   ;;  %s7268_s4 = inlined_call_operand.vmem [shape: f32[2,16,32,4], index: 4, kind: output, shape index: {}]  }
   0x1 LB: > { %s4109_s16 = sadd.s32 4294967295, %s4909_s15   ;;  %p4113_p0 = scmp.ge.s32.totalorder %s4909_s15, 1  ;;  %s4909_s15 = sphi %s4939_s15, %s14_s15  }
   0x2   : > { %p162_p1 = scmp.lt.s32.totalorder %s4909_s15, 3 }
   0x4   : > { %p163_p2 = pnand %p4113_p0, %p162_p1 }
   0x6   : > { %166 = sbr.rel (%p163_p2) target bundleno = 1374 (0x55e), region = 36 }
   0xb   : > { %p188_p3 = scmp.lt.s32.totalorder %s4109_s16, 1  ;;  %vm199_vm0 = vcmask 27648   ;;  %v7270_v0 = vmov 0   ;;  %s4912_s21 = smov 4   ;;  %vm920_vm1 = vcmask 1045504   ;;  %vm686_vm2 = vcmask 31744  }
   0xc   : > { %226 = vst.msk [vmem:[#allocation2 + $0x98] sm:$0xf] %vm199_vm0, %v7270_v0  ;;  %s4913_s22 = smov 8   ;;  %v4264_v40 = vld [vmem:[%s7265_s1] sm:$0xf]  ;;  %vm783_vm3 = vcmask 64512  }
   0xd   : > { %s7350_s16 = smov (!%p188_p3, %s4109_s16), 1  ;;  %227 = vst.msk [vmem:[#allocation2 + $0x9c] sm:$0xf] %vm199_vm0, %v7270_v0  ;;  %v4670_v41 = vld [vmem:[%s7265_s1] sm:$0x30]  ;;  %vm855_vm4 = vcmask 97280  }
   0xe   : > { %200 = vst.msk [vmem:[#allocation2] sm:$0xf] %vm199_vm0, %v7270_v0  ;;  %s4632_s17 = sshll.u32 %s7350_s16, 7  ;;  %v4302_v42 = vld [vmem:[%s7265_s1 + $0x8] sm:$0xf]  ;;  %v4265_v44 = vor.u32 %v4670_v41, %v4264_v40  ;;  %s4633_s5 = sshll.u32 %s7350_s16, 9 }
   0xf   : > { %201 = vst.msk [vmem:[#allocation2 + $0x4] sm:$0xf] %vm199_vm0, %v7270_v0  ;;  %s4961_s20 = scalar_lea.vmem %s7264_s0, %s4632_s17  ;;  %v4671_v45 = vld [vmem:[%s7265_s1 + $0x8] sm:$0x30]  ;;  %v4340_v47 = vld [vmem:[%s7265_s1 + $0x10] sm:$0xf]  ;;  %s6479_s16 = scalar_lea.vmem %s7268_s4, %s4633_s5 }
  0x10   : > { %202 = vst.msk [vmem:[#allocation2 + $0x8] sm:$0xf] %vm199_vm0, %v7270_v0  ;;  %v258_v1 = vld [vmem:[%s4961_s20 + $0x40] sm:$0xf]  ;;  %v259_v2 = vld [vmem:[%s4961_s20 + $0x44] sm:$0xf]  ;;  %v4303_v46 = vor.u32 %v4671_v45, %v4302_v42 }
  0x11   : > { %v260_v3 = vld [vmem:[%s4961_s20 + $0x48] sm:$0xf]  ;;  %290 = vst.msk [vmem:[#allocation2 + $0x90] sm:$0xf] %vm199_vm0, %v258_v1  ;;  %v261_v4 = vld [vmem:[%s4961_s20 + $0x4c] sm:$0xf] }
  0x12   : > { %291 = vst.msk [vmem:[#allocation2 + $0x94] sm:$0xf] %vm199_vm0, %v259_v2  ;;  %v264_v10 = vld [vmem:[%s4961_s20 + $0x58] sm:$0xf]  ;;  %v265_v11 = vld [vmem:[%s4961_s20 + $0x5c] sm:$0xf] }
  0x13   : > { %292 = vst.msk [vmem:[#allocation2 + $0xa0] sm:$0xf] %vm199_vm0, %v260_v3  ;;  %v262_v12 = vld [vmem:[%s4961_s20 + $0x50] sm:$0xf]  ;;  %v263_v13 = vld [vmem:[%s4961_s20 + $0x54] sm:$0xf] }
  0x14   : > { %v4972_v5 = vld [vmem:[#allocation2 + $0x98] sm:$0xff]  ;;  %293 = vst.msk [vmem:[#allocation2 + $0xa4] sm:$0xf] %vm199_vm0, %v261_v4  ;;  %v266_v14 = vld [vmem:[%s4961_s20 + $0x60] sm:$0xf]  ;;  %v922_v50 = vsel %vm920_vm1, %v4265_v44, 0 }
  0x15   : > { %582 = vrot.lane.b32.xlu1 %v4972_v5, %s4912_s21  ;;  %203 = vst.msk [vmem:[#allocation2 + $0xc] sm:$0xf] %vm199_vm0, %v7270_v0  ;;  %v267_v15 = vld [vmem:[%s4961_s20 + $0x64] sm:$0xf]  ;;  %v270_v16 = vld [vmem:[%s4961_s20 + $0x70] sm:$0xf]  ;;  %4871 = vmatpush.bf16.msra.mxu2 %v922_v50 }
  0x16   : > { %205 = vst.msk [vmem:[#allocation2 + $0x110] sm:$0xf] %vm199_vm0, %v7270_v0  ;;  %v271_v17 = vld [vmem:[%s4961_s20 + $0x74] sm:$0xf]  ;;  %v268_v21 = vld [vmem:[%s4961_s20 + $0x68] sm:$0xf]  ;;  %931 = vmatpush.bf16.msra.mxu0 %v922_v50 }
  0x17   : > { %206 = vst.msk [vmem:[#allocation2 + $0x114] sm:$0xf] %vm199_vm0, %v7270_v0  ;;  %v269_v22 = vld [vmem:[%s4961_s20 + $0x6c] sm:$0xf]  ;;  %v272_v24 = vld [vmem:[%s4961_s20 + $0x78] sm:$0xf] }
  0x18   : > { %207 = vst.msk [vmem:[#allocation2 + $0x118] sm:$0xf] %vm199_vm0, %v7270_v0  ;;  %v273_v25 = vld [vmem:[%s4961_s20 + $0x7c] sm:$0xf]  ;;  %v244_v28 = vld [vmem:[%s4961_s20 + $0x8] sm:$0xf] }
  0x19   : > { %v4985_v6 = vld [vmem:[#allocation2 + $0x90] sm:$0xff]  ;;  %208 = vst.msk [vmem:[#allocation2 + $0x11c] sm:$0xf] %vm199_vm0, %v7270_v0  ;;  %v245_v29 = vld [vmem:[%s4961_s20 + $0xc] sm:$0xf]  ;;  %v1102_v52 = vsel %vm920_vm1, %v4303_v46, 0 }
  0x1a   : > { %210 = vst.msk [vmem:[#allocation2 + $0x18] sm:$0xf] %vm199_vm0, %v7270_v0  ;;  %580 = vrot.lane.b32.xlu0 %v4985_v6, %s4912_s21  ;;  %v242_v33 = vld [vmem:[%s4961_s20] sm:$0xf]  ;;  %v243_v34 = vld [vmem:[%s4961_s20 + $0x4] sm:$0xf]  ;;  %4872 = vmatpush.bf16.msra.mxu3 %v1102_v52 }
  0x1b   : > { %v4993_v7 = vld [vmem:[#allocation2 + $0xa0] sm:$0xff]  ;;  %211 = vst.msk [vmem:[#allocation2 + $0x1c] sm:$0xf] %vm199_vm0, %v7270_v0  ;;  %v256_v35 = vld [vmem:[%s4961_s20 + $0x38] sm:$0xf]  ;;  %1111 = vmatpush.bf16.msra.mxu1 %v1102_v52 }
  0x1c   : > { %212 = vst.msk [vmem:[#allocation2 + $0x28] sm:$0xf] %vm199_vm0, %v7270_v0  ;;  %584 = vrot.lane.b32.xlu2 %v4993_v7, %s4912_s21  ;;  %v257_v36 = vld [vmem:[%s4961_s20 + $0x3c] sm:$0xf]  ;;  %v246_v38 = vld [vmem:[%s4961_s20 + $0x10] sm:$0xf] }
  0x1d   : > { %213 = vst.msk [vmem:[#allocation2 + $0x2c] sm:$0xf] %vm199_vm0, %v7270_v0  ;;  %v247_v39 = vld [vmem:[%s4961_s20 + $0x14] sm:$0xf] }
  0x1e   : > { %214 = vst.msk [vmem:[#allocation2 + $0x38] sm:$0xf] %vm199_vm0, %v7270_v0  ;;  %v4672_v48 = vld [vmem:[%s7265_s1 + $0x10] sm:$0x30] }
  0x1f   : > { %215 = vst.msk [vmem:[#allocation2 + $0x3c] sm:$0xf] %vm199_vm0, %v7270_v0  ;;  %v4341_v51 = vor.u32 %v4672_v48, %v4340_v47  ;;  %v4668_v56 = vld [vmem:[#allocation2 + $0x110] sm:$0xff] }
  0x20   : > { %216 = vst.msk [vmem:[#allocation2 + $0x48] sm:$0xf] %vm199_vm0, %v7270_v0  ;;  %v4669_v49 = vld [vmem:[#allocation2 + $0x118] sm:$0xff] }
  0x21   : > { %217 = vst.msk [vmem:[#allocation2 + $0x4c] sm:$0xf] %vm199_vm0, %v7270_v0  ;;  %v1282_v53 = vsel %vm920_vm1, %v4341_v51, 0 }
  0x22   : > { %218 = vst.msk [vmem:[#allocation2 + $0x58] sm:$0xf] %vm199_vm0, %v7270_v0  ;;  %654 = vrot.lane.b32.xlu0 %v4993_v7, %s4913_s22  ;;  %1291 = vmatpush.bf16.msrb.mxu2 %v1282_v53  ;;  %v5203_v54 = vld [vmem:[#allocation2 + $0x18] sm:$0xff] }
  0x23   : > { %219 = vst.msk [vmem:[#allocation2 + $0x5c] sm:$0xf] %vm199_vm0, %v7270_v0 }
  0x24   : > { %220 = vst.msk [vmem:[#allocation2 + $0x68] sm:$0xf] %vm199_vm0, %v7270_v0  ;;  %v5239_v2 = vld [vmem:[#allocation2 + $0x28] sm:$0xff] }
  0x25   : > { %221 = vst.msk [vmem:[#allocation2 + $0x6c] sm:$0xf] %vm199_vm0, %v7270_v0 }
  0x26   : > { %222 = vst.msk [vmem:[#allocation2 + $0x78] sm:$0xf] %vm199_vm0, %v7270_v0  ;;  %v5231_v1 = vld [vmem:[#allocation2 + $0x38] sm:$0xff] }
  0x27   : > { %223 = vst.msk [vmem:[#allocation2 + $0x7c] sm:$0xf] %vm199_vm0, %v7270_v0 }
  0x28   : > { %224 = vst.msk [vmem:[#allocation2 + $0x88] sm:$0xf] %vm199_vm0, %v7270_v0 }
  0x29   : > { %225 = vst.msk [vmem:[#allocation2 + $0x8c] sm:$0xf] %vm199_vm0, %v7270_v0 }
  0x2a   : > { %228 = vst.msk [vmem:[#allocation2 + $0xa8] sm:$0xf] %vm199_vm0, %v7270_v0 }
  0x2b   : > { %229 = vst.msk [vmem:[#allocation2 + $0xac] sm:$0xf] %vm199_vm0, %v7270_v0 }
  0x2c   : > { %230 = vst.msk [vmem:[#allocation2 + $0xb8] sm:$0xf] %vm199_vm0, %v7270_v0 }
  0x2d   : > { %231 = vst.msk [vmem:[#allocation2 + $0xbc] sm:$0xf] %vm199_vm0, %v7270_v0 }
  0x2e   : > { %232 = vst.msk [vmem:[#allocation2 + $0xc8] sm:$0xf] %vm199_vm0, %v7270_v0 }
  0x2f   : > { %233 = vst.msk [vmem:[#allocation2 + $0xcc] sm:$0xf] %vm199_vm0, %v7270_v0 }
  0x30   : > { %234 = vst.msk [vmem:[#allocation2 + $0xd8] sm:$0xf] %vm199_vm0, %v7270_v0 }
  0x31   : > { %235 = vst.msk [vmem:[#allocation2 + $0xdc] sm:$0xf] %vm199_vm0, %v7270_v0 }
  0x32   : > { %236 = vst.msk [vmem:[#allocation2 + $0xe8] sm:$0xf] %vm199_vm0, %v7270_v0  ;;  %v5047_v8 = vld [vmem:[#allocation2 + $0xa8] sm:$0xff] }
  0x33   : > { %237 = vst.msk [vmem:[#allocation2 + $0xec] sm:$0xf] %vm199_vm0, %v7270_v0  ;;  %586 = vrot.lane.b32.xlu0 %v5047_v8, %s4912_s21  ;;  %656 = vrot.lane.b32.xlu1 %v5047_v8, %s4913_s22 }
  0x34   : > { %238 = vst.msk [vmem:[#allocation2 + $0xf8] sm:$0xf] %vm199_vm0, %v7270_v0  ;;  %v5065_v9 = vld [vmem:[#allocation2 + $0xb8] sm:$0xff] }
  0x35   : > { %239 = vst.msk [vmem:[#allocation2 + $0xfc] sm:$0xf] %vm199_vm0, %v7270_v0 }
  0x36   : > { %240 = vst.msk [vmem:[#allocation2 + $0x108] sm:$0xf] %vm199_vm0, %v7270_v0  ;;  %v5127_v26 = vld [vmem:[#allocation2 + $0xc8] sm:$0xff] }
  0x37   : > { %241 = vst.msk [vmem:[#allocation2 + $0x10c] sm:$0xf] %vm199_vm0, %v7270_v0 }
  0x38   : > { %1971 = vst.msk [vmem:[#allocation3] sm:$0xf] %vm199_vm0, %v7270_v0  ;;  %v5121_v23 = vld [vmem:[#allocation2 + $0xd8] sm:$0xff] }
  0x39   : > { %1972 = vst.msk [vmem:[#allocation3 + $0x4] sm:$0xf] %vm199_vm0, %v7270_v0 }
  0x3a   : > { %1973 = vst.msk [vmem:[#allocation3 + $0x8] sm:$0xf] %vm199_vm0, %v7270_v0  ;;  %v5133_v27 = vld [vmem:[#allocation2 + $0xe8] sm:$0xff] }
  0x3b   : > { %1974 = vst.msk [vmem:[#allocation3 + $0xc] sm:$0xf] %vm199_vm0, %v7270_v0  ;;  %660 = vrot.lane.b32.xlu1 %v5065_v9, %s4913_s22 }
  0x3c   : > { %1976 = vst.msk [vmem:[#allocation3 + $0x110] sm:$0xf] %vm199_vm0, %v7270_v0  ;;  %v5183_v43 = vld [vmem:[#allocation2 + $0xf8] sm:$0xff] }
  0x3d   : > { %1977 = vst.msk [vmem:[#allocation3 + $0x114] sm:$0xf] %vm199_vm0, %v7270_v0 }
  0x3e   : > { %1978 = vst.msk [vmem:[#allocation3 + $0x118] sm:$0xf] %vm199_vm0, %v7270_v0  ;;  %v4667_v37 = vld [vmem:[#allocation2 + $0x108] sm:$0xff] }
  0x3f   : > { %1979 = vst.msk [vmem:[#allocation3 + $0x11c] sm:$0xf] %vm199_vm0, %v7270_v0 }
  0x40   : > { %296 = vst.msk [vmem:[#allocation2 + $0xc0] sm:$0xf] %vm199_vm0, %v264_v10  ;;  %v5245_v10 = vld [vmem:[#allocation2 + $0x88] sm:$0xff] }
  0x41   : > { %297 = vst.msk [vmem:[#allocation2 + $0xc4] sm:$0xf] %vm199_vm0, %v265_v11 }
  0x42   : > { %294 = vst.msk [vmem:[#allocation2 + $0xb0] sm:$0xf] %vm199_vm0, %v262_v12 }
  0x43   : > { %295 = vst.msk [vmem:[#allocation2 + $0xb4] sm:$0xf] %vm199_vm0, %v263_v13  ;;  %590 = vrot.lane.b32.xlu1 %v5065_v9, %s4912_s21 }
  0x44   : > { %298 = vst.msk [vmem:[#allocation2 + $0xd0] sm:$0xf] %vm199_vm0, %v266_v14 }
  0x45   : > { %299 = vst.msk [vmem:[#allocation2 + $0xd4] sm:$0xf] %vm199_vm0, %v267_v15 }
  0x46   : > { %302 = vst.msk [vmem:[#allocation2 + $0xf0] sm:$0xf] %vm199_vm0, %v270_v16 }
  0x47   : > { %303 = vst.msk [vmem:[#allocation2 + $0xf4] sm:$0xf] %vm199_vm0, %v271_v17 }
  0x48   : > { %v5101_v18 = vld [vmem:[#allocation2 + $0xc0] sm:$0xff]  ;;  %300 = vst.msk [vmem:[#allocation2 + $0xe0] sm:$0xf] %vm199_vm0, %v268_v21 }
  0x49   : > { %662 = vrot.lane.b32.xlu0 %v5101_v18, %s4913_s22  ;;  %301 = vst.msk [vmem:[#allocation2 + $0xe4] sm:$0xf] %vm199_vm0, %v269_v22  ;;  %v5262_v22 = vld [vmem:[#allocation2 + $0x48] sm:$0xff] }
  0x4a   : > { %v5105_v19 = vld [vmem:[#allocation2 + $0xb0] sm:$0xff]  ;;  %304 = vst.msk [vmem:[#allocation2 + $0x100] sm:$0xf] %vm199_vm0, %v272_v24 }
  0x4b   : > { %658 = vrot.lane.b32.xlu2 %v5105_v19, %s4913_s22  ;;  %305 = vst.msk [vmem:[#allocation2 + $0x104] sm:$0xf] %vm199_vm0, %v273_v25 }
  0x4c   : > { %v5109_v20 = vld [vmem:[#allocation2 + $0xd0] sm:$0xff]  ;;  %276 = vst.msk [vmem:[#allocation2 + $0x20] sm:$0xf] %vm199_vm0, %v244_v28 }
  0x4d   : > { %666 = vrot.lane.b32.xlu1 %v5109_v20, %s4913_s22  ;;  %277 = vst.msk [vmem:[#allocation2 + $0x24] sm:$0xf] %vm199_vm0, %v245_v29  ;;  %v248_v29 = vld [vmem:[%s4961_s20 + $0x18] sm:$0xf] }
  0x4e   : > { %v5147_v30 = vld [vmem:[#allocation2 + $0xf0] sm:$0xff]  ;;  %274 = vst.msk [vmem:[#allocation2 + $0x10] sm:$0xf] %vm199_vm0, %v242_v33 }
  0x4f   : > { %275 = vst.msk [vmem:[#allocation2 + $0x14] sm:$0xf] %vm199_vm0, %v243_v34 }
  0x50   : > { %v5151_v31 = vld [vmem:[#allocation2 + $0xe0] sm:$0xff]  ;;  %288 = vst.msk [vmem:[#allocation2 + $0x80] sm:$0xf] %vm199_vm0, %v256_v35 }
  0x51   : > { %592 = vrot.lane.b32.xlu0 %v5101_v18, %s4912_s21  ;;  %289 = vst.msk [vmem:[#allocation2 + $0x84] sm:$0xf] %vm199_vm0, %v257_v36  ;;  %v250_v36 = vld [vmem:[%s4961_s20 + $0x20] sm:$0xf] }
  0x52   : > { %v4666_v32 = vld [vmem:[#allocation2 + $0x100] sm:$0xff]  ;;  %278 = vst.msk [vmem:[#allocation2 + $0x30] sm:$0xf] %vm199_vm0, %v246_v38 }
  0x53   : > { %588 = vrot.lane.b32.xlu2 %v5105_v19, %s4912_s21  ;;  %279 = vst.msk [vmem:[#allocation2 + $0x34] sm:$0xf] %vm199_vm0, %v247_v39 }
  0x54   : > { %v5207_v55 = vld [vmem:[#allocation2 + $0x20] sm:$0xff]  ;;  %280 = vst.msk [vmem:[#allocation2 + $0x40] sm:$0xf] %vm199_vm0, %v248_v29 }
  0x55   : > { %596 = vrot.lane.b32.xlu1 %v5109_v20, %s4912_s21  ;;  %282 = vst.msk [vmem:[#allocation2 + $0x50] sm:$0xf] %vm199_vm0, %v250_v36  ;;  %v4634_v36 = vld [vmem:[#allocation2] sm:$0xff] }
  0x56   : > { %v5218_v59 = vld [vmem:[#allocation2 + $0x10] sm:$0xff] }
  0x58   : > { %v5220_v60 = vld [vmem:[#allocation2 + $0x80] sm:$0xff] }
  0x59   : > { %668 = vrot.lane.b32.xlu0 %v5121_v23, %s4913_s22 }
  0x5a   : > { %v5213_v57 = vld [vmem:[#allocation2 + $0x30] sm:$0xff] }
  0x5b   : > { %664 = vrot.lane.b32.xlu2 %v5127_v26, %s4913_s22 }
  0x5d   : > { %672 = vrot.lane.b32.xlu1 %v5133_v27, %s4913_s22 }
  0x61   : > { %598 = vrot.lane.b32.xlu0 %v5121_v23, %s4912_s21 }
  0x63   : > { %594 = vrot.lane.b32.xlu2 %v5127_v26, %s4912_s21 }
  0x65   : > { %602 = vrot.lane.b32.xlu1 %v5133_v27, %s4912_s21 }
  0x69   : > { %674 = vrot.lane.b32.xlu0 %v5147_v30, %s4913_s22 }
  0x6b   : > { %670 = vrot.lane.b32.xlu2 %v5151_v31, %s4913_s22 }
  0x6d   : > { %678 = vrot.lane.b32.xlu1 %v4666_v32, %s4913_s22 }
  0x71   : > { %604 = vrot.lane.b32.xlu0 %v5147_v30, %s4912_s21 }
  0x73   : > { %600 = vrot.lane.b32.xlu2 %v5151_v31, %s4912_s21 }
  0x75   : > { %608 = vrot.lane.b32.xlu1 %v4666_v32, %s4912_s21  ;;  %v249_v32 = vld [vmem:[%s4961_s20 + $0x1c] sm:$0xf] }
  0x76   : > { %v585_v3 = vpop.permute.xlu2 %584  ;;  %281 = vst.msk [vmem:[#allocation2 + $0x44] sm:$0xf] %vm199_vm0, %v249_v32 }
  0x77   : > { %v743_v21 = vsel %vm686_vm2, %v4985_v6, %v585_v3 }
  0x79   : > { %680 = vrot.lane.b32.xlu0 %v4667_v37, %s4913_s22 }
  0x7b   : > { %676 = vrot.lane.b32.xlu2 %v5183_v43, %s4913_s22 }
  0x7d   : > { %684 = vrot.lane.b32.xlu1 %v4669_v49, %s4913_s22  ;;  %v5283_v38 = vld [vmem:[#allocation2 + $0x40] sm:$0xff] }
  0x81   : > { %610 = vrot.lane.b32.xlu0 %v4667_v37, %s4912_s21  ;;  %v251_v37 = vld [vmem:[%s4961_s20 + $0x24] sm:$0xf] }
  0x82   : > { %283 = vst.msk [vmem:[#allocation2 + $0x54] sm:$0xf] %vm199_vm0, %v251_v37 }
  0x83   : > { %606 = vrot.lane.b32.xlu2 %v5183_v43, %s4912_s21 }
  0x85   : > { %550 = vrot.lane.b32.xlu1 %v5203_v54, %s4912_s21 }
  0x87   : > { %v583_v4 = vpop.permute.xlu1 %582 }
  0x88   : > { %v740_v11 = vsel %vm686_vm2, %v5245_v10, %v583_v4 }
  0x89   : > { %622 = vrot.lane.b32.xlu0 %v5207_v55, %s4913_s22  ;;  %v5302_v45 = vld [vmem:[#allocation2 + $0x50] sm:$0xff] }
  0x8b   : > { %682 = vrot.lane.b32.xlu2 %v4668_v56, %s4913_s22 }
  0x8c   : > { %v581_v58 = vpop.permute.xlu0 %580 }
  0x8d   : > { %626 = vrot.lane.b32.xlu1 %v5213_v57, %s4913_s22  ;;  %v737_v61 = vsel %vm686_vm2, %v5220_v60, %v581_v58  ;;  %v253_v58 = vld [vmem:[%s4961_s20 + $0x2c] sm:$0xf] }
  0x8e   : > { %285 = vst.msk [vmem:[#allocation2 + $0x64] sm:$0xf] %vm199_vm0, %v253_v58 }
  0x91   : > { %552 = vrot.lane.b32.xlu0 %v5207_v55, %s4912_s21 }
  0x93   : > { %548 = vrot.lane.b32.xlu2 %v5218_v59, %s4912_s21 }
  0x94   : > { %v655_v62 = vpop.permute.xlu0 %654 }
  0x95   : > { %v5229_v63 = vsel %vm783_vm3, %v737_v61, %v655_v62  ;;  %556 = vrot.lane.b32.xlu1 %v5213_v57, %s4912_s21 }
  0x96   : > { %4282 = vmatmul.msk.bf16.vlgmr.msra.gmra.mxu2 %vm855_vm4, %v5229_v63  ;;  %4320 = vmatmul.msk.bf16.vlgmr.msra.gmra.mxu3 %vm855_vm4, %v5229_v63 }
  0x99   : > { %628 = vrot.lane.b32.xlu0 %v5231_v1, %s4913_s22 }
  0x9b   : > { %624 = vrot.lane.b32.xlu2 %v5239_v2, %s4913_s22 }
  0x9d   : > { %632 = vrot.lane.b32.xlu1 %v5262_v22, %s4913_s22 }
  0xa1   : > { %558 = vrot.lane.b32.xlu0 %v5231_v1, %s4912_s21 }
  0xa3   : > { %554 = vrot.lane.b32.xlu2 %v5239_v2, %s4912_s21 }
  0xa5   : > { %v659_v12 = vpop.permute.xlu2 %658  ;;  %v657_v13 = vpop.permute.xlu1 %656  ;;  %562 = vrot.lane.b32.xlu1 %v5262_v22, %s4912_s21 }
  0xa6   : > { %v5254_v14 = vsel %vm783_vm3, %v740_v11, %v657_v13  ;;  %v587_v17 = vpop.permute.xlu0 %586  ;;  %v5267_v28 = vsel %vm783_vm3, %v743_v21, %v659_v12 }
  0xa7   : > { %4283 = vmatmul.msk.bf16.gmra.mxu2 %vm855_vm4, %v5254_v14  ;;  %4321 = vmatmul.msk.bf16.gmra.mxu3 %vm855_vm4, %v5254_v14  ;;  %v746_v39 = vsel %vm686_vm2, %v4972_v5, %v587_v17 }
  0xa9   : > { %634 = vrot.lane.b32.xlu0 %v5302_v45, %s4913_s22 }
  0xab   : > { %630 = vrot.lane.b32.xlu2 %v5283_v38, %s4913_s22 }
  0xad   : > { %v589_v15 = vpop.permute.xlu2 %588  ;;  %v661_v16 = vpop.permute.xlu1 %660 }
  0xae   : > { %v5294_v42 = vsel %vm783_vm3, %v746_v39, %v661_v16  ;;  %v749_v49 = vsel %vm686_vm2, %v4993_v7, %v589_v15  ;;  %v252_v7 = vld [vmem:[%s4961_s20 + $0x28] sm:$0xf] }
  0xaf   : > { %284 = vst.msk [vmem:[#allocation2 + $0x60] sm:$0xf] %vm199_vm0, %v252_v7  ;;  %v4635_v7 = vld [vmem:[#allocation2 + $0x8] sm:$0xff] }
  0xb1   : > { %564 = vrot.lane.b32.xlu0 %v5302_v45, %s4912_s21 }
  0xb3   : > { %560 = vrot.lane.b32.xlu2 %v5283_v38, %s4912_s21 }
  0xb5   : > { %v665_v24 = vpop.permute.xlu2 %664  ;;  %v591_v25 = vpop.permute.xlu1 %590 }
  0xb6   : > { %v752_v62 = vsel %vm686_vm2, %v5047_v8, %v591_v25  ;;  %v5345_v15 = vld [vmem:[#allocation2 + $0x60] sm:$0xff]  ;;  %v5364_v25 = vld [vmem:[#allocation2 + $0x68] sm:$0xff] }
  0xb7   : > { %4284 = vmatmul.msk.bf16.gmra.mxu2 %vm855_vm4, %v5267_v28  ;;  %4322 = vmatmul.msk.bf16.gmra.mxu3 %vm855_vm4, %v5267_v28  ;;  %v5343_v13 = vsel %vm783_vm3, %v752_v62, %v665_v24  ;;  %v5362_v24 = vld [vmem:[#allocation2 + $0x58] sm:$0xff] }
  0xb8   : > { %638 = vrot.lane.b32.xlu1 %v5345_v15, %s4913_s22 }
  0xb9   : > { %640 = vrot.lane.b32.xlu0 %v5364_v25, %s4913_s22 }
  0xbb   : > { %v663_v33 = vpop.permute.xlu0 %662  ;;  %636 = vrot.lane.b32.xlu2 %v5362_v24, %s4913_s22 }
  0xbc   : > { %v5319_v51 = vsel %vm783_vm3, %v749_v49, %v663_v33 }
  0xbd   : > { %v5277_v34 = vpop.permute.xlu2 %594 }
  0xbf   : > { %v667_v35 = vpop.permute.xlu1 %666 }
  0xc0   : > { %568 = vrot.lane.b32.xlu1 %v5345_v15, %s4912_s21 }
  0xc1   : > { %570 = vrot.lane.b32.xlu0 %v5364_v25, %s4912_s21 }
  0xc3   : > { %v593_v40 = vpop.permute.xlu0 %592  ;;  %566 = vrot.lane.b32.xlu2 %v5362_v24, %s4912_s21 }
  0xc5   : > { %v5291_v41 = vpop.permute.xlu2 %670 }
  0xc7   : > { %v5296_v44 = vpop.permute.xlu1 %596  ;;  %4285 = vmatmul.msk.bf16.gmra.mxu2 %vm855_vm4, %v5294_v42  ;;  %4323 = vmatmul.msk.bf16.gmra.mxu3 %vm855_vm4, %v5294_v42 }
  0xc9   : > { %646 = vrot.lane.b32.xlu0 %v5220_v60, %s4913_s22 }
  0xcb   : > { %v669_v46 = vpop.permute.xlu0 %668 }
  0xcd   : > { %v5308_v47 = vpop.permute.xlu2 %600 }
  0xcf   : > { %v5310_v48 = vpop.permute.xlu1 %672 }
  0xd1   : > { %576 = vrot.lane.b32.xlu0 %v5220_v60, %s4912_s21  ;;  %v761_v60 = vsel %vm686_vm2, %v5101_v18, %v5296_v44 }
  0xd3   : > { %v5316_v50 = vpop.permute.xlu0 %598 }
  0xd5   : > { %v5323_v53 = vpop.permute.xlu2 %676 }
  0xd7   : > { %v5321_v52 = vpop.permute.xlu1 %602  ;;  %4286 = vmatmul.msk.bf16.gmra.mxu2 %vm855_vm4, %v5319_v51  ;;  %4324 = vmatmul.msk.bf16.gmra.mxu3 %vm855_vm4, %v5319_v51 }
  0xd9   : > { %652 = vrot.lane.b32.xlu0 %v4972_v5, %s4913_s22  ;;  %v764_v5 = vsel %vm686_vm2, %v5127_v26, %v5316_v50 }
  0xdb   : > { %v5329_v56 = vpop.permute.xlu0 %674 }
  0xdd   : > { %v607_v3 = vpop.permute.xlu2 %606 }
  0xde   : > { %v776_v8 = vsel %vm686_vm2, %v5133_v27, %v607_v3  ;;  %v755_v27 = vsel %vm686_vm2, %v5105_v19, %v593_v40 }
  0xdf   : > { %v679_v61 = vpop.permute.xlu1 %678  ;;  %v5380_v39 = vsel %vm783_vm3, %v755_v27, %v667_v35  ;;  %v758_v35 = vsel %vm686_vm2, %v5065_v9, %v5277_v34  ;;  %v5418_v34 = vld [vmem:[#allocation2 + $0x78] sm:$0xff]  ;;  %v255_v27 = vld [vmem:[%s4961_s20 + $0x34] sm:$0xf] }
  0xe0   : > { %644 = vrot.lane.b32.xlu1 %v5418_v34, %s4913_s22  ;;  %287 = vst.msk [vmem:[#allocation2 + $0x74] sm:$0xf] %vm199_vm0, %v255_v27 }
  0xe3   : > { %v605_v4 = vpop.permute.xlu0 %604 }
  0xe4   : > { %v773_v11 = vsel %vm686_vm2, %v5151_v31, %v605_v4  ;;  %v5431_v4 = vsel %vm783_vm3, %v761_v60, %v5291_v41  ;;  %v1517_v41 = vlaneseq }
  0xe5   : > { %v5340_v12 = vsel %vm783_vm3, %v773_v11, %v679_v61  ;;  %v5360_v21 = vpop.permute.xlu2 %682  ;;  %v5404_v61 = vsel %vm783_vm3, %v758_v35, %v669_v46 }
  0xe7   : > { %4287 = vmatmul.msk.bf16.gmra.mxu2 %vm855_vm4, %v5343_v13  ;;  %4325 = vmatmul.msk.bf16.gmra.mxu3 %vm855_vm4, %v5343_v13  ;;  %v5355_v31 = vpop.permute.xlu1 %608 }
  0xe8   : > { %574 = vrot.lane.b32.xlu1 %v5418_v34, %s4912_s21 }
  0xeb   : > { %v681_v16 = vpop.permute.xlu0 %680 }
  0xec   : > { %v5358_v17 = vsel %vm783_vm3, %v776_v8, %v681_v16  ;;  %v254_v16 = vld [vmem:[%s4961_s20 + $0x30] sm:$0xf] }
  0xed   : > { %v549_v49 = vpop.permute.xlu2 %548  ;;  %286 = vst.msk [vmem:[#allocation2 + $0x70] sm:$0xf] %vm199_vm0, %v254_v16 }
  0xee   : > { %v689_v19 = vsel %vm686_vm2, %v4634_v36, %v549_v49 }
  0xef   : > { %v685_v33 = vpop.permute.xlu1 %684 }
  0xf0   : > { %650 = vrot.lane.b32.xlu1 %v4985_v6, %s4913_s22 }
  0xf3   : > { %v611_v29 = vpop.permute.xlu0 %610 }
  0xf4   : > { %v782_v32 = vsel %vm686_vm2, %v5183_v43, %v611_v29  ;;  %v5457_v29 = vsel %vm783_vm3, %v764_v5, %v5310_v48  ;;  %v5467_v26 = vld [vmem:[#allocation2 + $0x70] sm:$0xff] }
  0xf5   : > { %v5377_v37 = vsel %vm783_vm3, %v782_v32, %v685_v33  ;;  %v625_v3 = vpop.permute.xlu2 %624  ;;  %v5461_v32 = vshrl.u32 %v1517_v41, 7  ;;  %642 = vrot.lane.b32.xlu2 %v5467_v26, %s4913_s22 }
  0xf6   : > { %7277 = vst [vmem:[#allocation4_spill] sm:$0xff] %v5377_v37 }
  0xf7   : > { %4288 = vmatmul.msk.bf16.gmra.mxu2 %vm855_vm4, %v5380_v39  ;;  %4326 = vmatmul.msk.bf16.gmra.mxu3 %vm855_vm4, %v5380_v39  ;;  %v551_v58 = vpop.permute.xlu1 %550  ;;  %vm1519_vm5 = vcmp.lt.s32.totalorder %v5461_v32, 1  ;;  %vm1712_vm6 = vcmp.lt.s32.totalorder %v5461_v32, 7 }
  0xf8   : > { %v692_v62 = vsel %vm686_vm2, %v4635_v7, %v551_v58 }
  0xf9   : > { %v5414_v9 = vsel %vm783_vm3, %v692_v62, %v625_v3 }
  0xfb   : > { %v623_v43 = vpop.permute.xlu0 %622 }
  0xfc   : > { %v5392_v40 = vsel %vm783_vm3, %v689_v19, %v623_v43 }
  0xfd   : > { %4266 = vmatmul.msk.bf16.vlgmr.msra.gmra.mxu0 %vm855_vm4, %v5392_v40  ;;  %4304 = vmatmul.msk.bf16.vlgmr.msra.gmra.mxu1 %vm855_vm4, %v5392_v40  ;;  %v555_v49 = vpop.permute.xlu2 %554 }
  0xfe   : > { %v698_v6 = vsel %vm686_vm2, %v5203_v54, %v555_v49  ;;  %572 = vrot.lane.b32.xlu2 %v5467_v26, %s4912_s21 }
  0xff   : > { %v627_v8 = vpop.permute.xlu1 %626 }
 0x103   : > { %v553_v46 = vpop.permute.xlu0 %552 }
 0x104   : > { %v695_v11 = vsel %vm686_vm2, %v5218_v59, %v553_v46  ;;  %v767_v46 = vsel %vm686_vm2, %v5109_v20, %v5308_v47 }
 0x105   : > { %v5453_v44 = vsel %vm783_vm3, %v695_v11, %v627_v8  ;;  %v5505_v5 = vsel %vm783_vm3, %v767_v46, %v5329_v56 }
 0x106   : > { %648 = vrot.lane.b32.xlu2 %v5245_v10, %s4913_s22 }
 0x107   : > { %4289 = vmatmul.msk.bf16.gmra.mxu2 %vm855_vm4, %v5404_v61  ;;  %4327 = vmatmul.msk.bf16.gmra.mxu3 %vm855_vm4, %v5404_v61  ;;  %v557_v16 = vpop.permute.xlu1 %556 }
 0x10b   : > { %v629_v35 = vpop.permute.xlu0 %628 }
 0x10c   : > { %v5486_v7 = vsel %vm783_vm3, %v698_v6, %v629_v35  ;;  %v770_v6 = vsel %vm686_vm2, %v5121_v23, %v5321_v52 }
 0x10d   : > { %4267 = vmatmul.msk.bf16.gmra.mxu0 %vm855_vm4, %v5414_v9  ;;  %4305 = vmatmul.msk.bf16.gmra.mxu1 %vm855_vm4, %v5414_v9 }
 0x10e   : > { %578 = vrot.lane.b32.xlu2 %v5245_v10, %s4912_s21 }
 0x117   : > { %4290 = vmatmul.msk.bf16.gmra.mxu2 %vm855_vm4, %v5431_v4  ;;  %4328 = vmatmul.msk.bf16.gmra.mxu3 %vm855_vm4, %v5431_v4 }
 0x119   : > { %v5447_v18 = vpop.f32.mrf.mxu2  ;;  %v5449_v59 = vpop.f32.mrf.mxu3 }
 0x11a   : > { %v7269_v48 = vrot.slane %v5447_v18, 7 }
 0x11d   : > { %4268 = vmatmul.msk.bf16.gmra.mxu0 %vm855_vm4, %v5453_v44  ;;  %4306 = vmatmul.msk.bf16.gmra.mxu1 %vm855_vm4, %v5453_v44 }
 0x121   : > { %v1015_v50 = vpop.f32.mrf.mxu2  ;;  %v1195_v33 = vpop.f32.mrf.mxu3 }
 0x122   : > { %v1486_v36 = vrot.slane %v1015_v50, 7  ;;  %v701_v50 = vsel %vm686_vm2, %v5207_v55, %v557_v16 }
 0x124   : > { %v1550_v19 = vsel %vm1519_vm5, %v7269_v48, %v1486_v36 }
 0x125   : > { %v5477_v43 = vadd.f32 %v1550_v19, %v1195_v33  ;;  %v631_v33 = vpop.permute.xlu2 %630 }
 0x126   : > { %v5518_v20 = vsel %vm783_vm3, %v701_v50, %v631_v33 }
 0x127   : > { %4291 = vmatmul.msk.bf16.gmra.mxu2 %vm855_vm4, %v5457_v29  ;;  %4329 = vmatmul.msk.bf16.gmra.mxu3 %vm855_vm4, %v5457_v29 }
 0x12a   : > { %v1018_v58 = vpop.f32.mrf.mxu2  ;;  %v1198_v62 = vpop.f32.mrf.mxu3 }
 0x12b   : > { %v1487_v3 = vrot.slane %v1018_v58, 7  ;;  %v559_v58 = vpop.permute.xlu0 %558 }
 0x12c   : > { %v704_v46 = vsel %vm686_vm2, %v5239_v2, %v559_v58 }
 0x12d   : > { %4269 = vmatmul.msk.bf16.gmra.mxu0 %vm855_vm4, %v5486_v7  ;;  %4307 = vmatmul.msk.bf16.gmra.mxu1 %vm855_vm4, %v5486_v7  ;;  %v1549_v54 = vsel %vm1519_vm5, %v1486_v36, %v1487_v3  ;;  %v561_v33 = vpop.permute.xlu2 %560 }
 0x12e   : > { %v5496_v60 = vadd.f32 %v1549_v54, %v1198_v62 }
 0x132   : > { %v1020_v11 = vpop.f32.mrf.mxu2  ;;  %v1200_v8 = vpop.f32.mrf.mxu3 }
 0x133   : > { %v1488_v27 = vrot.slane %v1020_v11, 7  ;;  %v633_v11 = vpop.permute.xlu1 %632 }
 0x134   : > { %v5548_v23 = vsel %vm783_vm3, %v704_v46, %v633_v11 }
 0x135   : > { %v1548_v41 = vsel %vm1519_vm5, %v1487_v3, %v1488_v27  ;;  %v5535_v3 = vsel %vm783_vm3, %v770_v6, %v5323_v53 }
 0x136   : > { %v5511_v36 = vadd.f32 %v1548_v41, %v1200_v8 }
 0x137   : > { %4292 = vmatmul.msk.bf16.gmra.mxu2 %vm855_vm4, %v5505_v5  ;;  %4330 = vmatmul.msk.bf16.gmra.mxu3 %vm855_vm4, %v5505_v5 }
 0x13a   : > { %v1023_v47 = vpop.f32.mrf.mxu2  ;;  %v1203_v56 = vpop.f32.mrf.mxu3 }
 0x13b   : > { %v1489_v49 = vrot.slane %v1023_v47, 7 }
 0x13d   : > { %4270 = vmatmul.msk.bf16.gmra.mxu0 %vm855_vm4, %v5518_v20  ;;  %4308 = vmatmul.msk.bf16.gmra.mxu1 %vm855_vm4, %v5518_v20  ;;  %v1547_v55 = vsel %vm1519_vm5, %v1488_v27, %v1489_v49 }
 0x13e   : > { %v5528_v19 = vadd.f32 %v1547_v55, %v1203_v56  ;;  %v635_v55 = vpop.permute.xlu0 %634 }
 0x142   : > { %v1025_v35 = vpop.f32.mrf.mxu2  ;;  %v1205_v10 = vpop.f32.mrf.mxu3 }
 0x143   : > { %v1490_v62 = vrot.slane %v1025_v35, 7 }
 0x145   : > { %v1546_v54 = vsel %vm1519_vm5, %v1489_v49, %v1490_v62  ;;  %v707_v49 = vsel %vm686_vm2, %v5213_v57, %v561_v33 }
 0x146   : > { %v5541_v8 = vadd.f32 %v1546_v54, %v1205_v10  ;;  %v5569_v35 = vsel %vm783_vm3, %v707_v49, %v635_v55  ;;  %v779_v55 = vsel %vm686_vm2, %v5147_v30, %v5355_v31 }
 0x147   : > { %4293 = vmatmul.msk.bf16.gmra.mxu2 %vm855_vm4, %v5535_v3  ;;  %4331 = vmatmul.msk.bf16.gmra.mxu3 %vm855_vm4, %v5535_v3 }
 0x14a   : > { %v1028_v52 = vpop.f32.mrf.mxu2  ;;  %v1208_v53 = vpop.f32.mrf.mxu3 }
 0x14b   : > { %v1491_v16 = vrot.slane %v1028_v52, 7  ;;  %v563_v52 = vpop.permute.xlu1 %562 }
 0x14d   : > { %4271 = vmatmul.msk.bf16.gmra.mxu0 %vm855_vm4, %v5548_v23  ;;  %4309 = vmatmul.msk.bf16.gmra.mxu1 %vm855_vm4, %v5548_v23  ;;  %v1545_v2 = vsel %vm1519_vm5, %v1490_v62, %v1491_v16 }
 0x14e   : > { %v5556_v27 = vadd.f32 %v1545_v2, %v1208_v53  ;;  %v710_v2 = vsel %vm686_vm2, %v5231_v1, %v563_v52 }
 0x152   : > { %v1030_v41 = vpop.f32.mrf.mxu2  ;;  %v1210_v50 = vpop.f32.mrf.mxu3 }
 0x153   : > { %v1492_v47 = vrot.slane %v1030_v41, 7  ;;  %v637_v41 = vpop.permute.xlu2 %636 }
 0x155   : > { %v1544_v56 = vsel %vm1519_vm5, %v1491_v16, %v1492_v47 }
 0x156   : > { %v5562_v6 = vadd.f32 %v1544_v56, %v1210_v50  ;;  %v5592_v50 = vsel %vm783_vm3, %v710_v2, %v637_v41  ;;  %v639_v2 = vpop.permute.xlu1 %638 }
 0x157   : > { %4294 = vmatmul.msk.bf16.gmra.mxu2 %vm855_vm4, %v5340_v12  ;;  %4332 = vmatmul.msk.bf16.gmra.mxu3 %vm855_vm4, %v5340_v12 }
 0x15a   : > { %v1033_v10 = vpop.f32.mrf.mxu2  ;;  %v1213_v58 = vpop.f32.mrf.mxu3 }
 0x15b   : > { %v1493_v62 = vrot.slane %v1033_v10, 7 }
 0x15d   : > { %4272 = vmatmul.msk.bf16.gmra.mxu0 %vm855_vm4, %v5569_v35  ;;  %4310 = vmatmul.msk.bf16.gmra.mxu1 %vm855_vm4, %v5569_v35  ;;  %v1543_v57 = vsel %vm1519_vm5, %v1492_v47, %v1493_v62 }
 0x15e   : > { %v5577_v54 = vadd.f32 %v1543_v57, %v1213_v58 }
 0x162   : > { %v1035_v46 = vpop.f32.mrf.mxu2  ;;  %v5579_v11 = vpop.f32.mrf.mxu3 }
 0x163   : > { %v1494_v53 = vrot.slane %v1035_v46, 7  ;;  %v5609_v46 = vsel %vm783_vm3, %v779_v55, %v5360_v21 }
 0x164   : > { %7279 = vst [vmem:[#allocation6_spill] sm:$0xff] %v5609_v46 }
 0x165   : > { %v5583_v16 = vsel %vm1519_vm5, %v1493_v62, %v1494_v53  ;;  %v565_v62 = vpop.permute.xlu0 %564 }
 0x167   : > { %4295 = vmatmul.msk.bf16.gmra.mxu2 %vm855_vm4, %v5358_v17  ;;  %4333 = vmatmul.msk.bf16.gmra.mxu3 %vm855_vm4, %v5358_v17 }
 0x16a   : > { %v1038_v33 = vpop.f32.mrf.mxu2  ;;  %v1218_v47 = vpop.f32.mrf.mxu3 }
 0x16b   : > { %v1495_v56 = vrot.slane %v1038_v33, 7 }
 0x16d   : > { %4273 = vmatmul.msk.bf16.gmra.mxu0 %vm855_vm4, %v5592_v50  ;;  %4311 = vmatmul.msk.bf16.gmra.mxu1 %vm855_vm4, %v5592_v50  ;;  %v1541_v1 = vsel %vm1519_vm5, %v1494_v53, %v1495_v56  ;;  %v713_v53 = vsel %vm686_vm2, %v5283_v38, %v565_v62 }
 0x16e   : > { %v5600_v49 = vadd.f32 %v1541_v1, %v1218_v47  ;;  %v5622_v30 = vsel %vm783_vm3, %v713_v53, %v639_v2  ;;  %v567_v1 = vpop.permute.xlu2 %566  ;;  %v641_v53 = vpop.permute.xlu0 %640 }
 0x16f   : > { %v716_v62 = vsel %vm686_vm2, %v5262_v22, %v567_v1  ;;  %v569_v1 = vpop.permute.xlu1 %568 }
 0x172   : > { %v1040_v10 = vpop.f32.mrf.mxu2  ;;  %v5605_v58 = vpop.f32.mrf.mxu3 }
 0x173   : > { %7278 = vst [vmem:[#allocation5_spill] sm:$0xff] %v5605_v58  ;;  %v1496_v57 = vrot.slane %v1040_v10, 7 }
 0x175   : > { %v5613_v52 = vsel %vm1519_vm5, %v1495_v56, %v1496_v57 }
 0x176   : > { %7280 = vst [vmem:[#allocation7_spill] sm:$0xff] %v5613_v52  ;;  %v643_v48 = vpop.permute.xlu2 %642 }
 0x177   : > { %4296 = vmatmul.msk.bf16.gmra.mxu2 %vm855_vm4, %v5609_v46  ;;  %4334 = vmatmul.msk.bf16.gmra.mxu3 %vm855_vm4, %v5609_v46 }
 0x17a   : > { %v1043_v31 = vpop.f32.mrf.mxu2  ;;  %v1223_v21 = vpop.f32.mrf.mxu3 }
 0x17b   : > { %v1497_v41 = vrot.slane %v1043_v31, 7 }
 0x17d   : > { %4274 = vmatmul.msk.bf16.gmra.mxu0 %vm855_vm4, %v5622_v30  ;;  %4312 = vmatmul.msk.bf16.gmra.mxu1 %vm855_vm4, %v5622_v30  ;;  %v1539_v38 = vsel %vm1519_vm5, %v1496_v57, %v1497_v41  ;;  %v5645_v57 = vsel %vm783_vm3, %v716_v62, %v641_v53 }
 0x17e   : > { %v5630_v33 = vadd.f32 %v1539_v38, %v1223_v21 }
 0x180   : > { %7281 = vst [vmem:[#allocation8_spill] sm:$0xff] %v5630_v33 }
 0x182   : > { %v1045_v47 = vpop.f32.mrf.mxu2  ;;  %v5632_v56 = vpop.f32.mrf.mxu3 }
 0x183   : > { %7282 = vst [vmem:[#allocation9_spill] sm:$0xff] %v5632_v56  ;;  %v1498_v55 = vrot.slane %v1045_v47, 7 }
 0x185   : > { %v5636_v10 = vsel %vm1519_vm5, %v1497_v41, %v1498_v55 }
 0x186   : > { %7283 = vst [vmem:[#allocation10_spill] sm:$0xff] %v5636_v10 }
 0x187   : > { %4297 = vmatmul.msk.bf16.gmra.mxu2 %vm855_vm4, %v5377_v37  ;;  %4335 = vmatmul.msk.bf16.gmra.mxu3 %vm855_vm4, %v5377_v37 }
 0x18a   : > { %v1048_v2 = vpop.f32.mrf.mxu2  ;;  %v1228_v31 = vpop.f32.mrf.mxu3 }
 0x18b   : > { %v1499_v21 = vrot.slane %v1048_v2, 7  ;;  %v719_v2 = vsel %vm686_vm2, %v5302_v45, %v569_v1 }
 0x18d   : > { %4275 = vmatmul.msk.bf16.gmra.mxu0 %vm855_vm4, %v5645_v57  ;;  %4313 = vmatmul.msk.bf16.gmra.mxu1 %vm855_vm4, %v5645_v57  ;;  %v1537_v22 = vsel %vm1519_vm5, %v1498_v55, %v1499_v21  ;;  %v5666_v55 = vsel %vm783_vm3, %v719_v2, %v643_v48  ;;  %v5678_v2 = vpop.f32.mrf.mxu0 }
 0x18e   : > { %v5653_v41 = vadd.f32 %v1537_v22, %v1228_v31 }
 0x190   : > { %7284 = vst [vmem:[#allocation11_spill] sm:$0xff] %v5653_v41 }
 0x192   : > { %v1050_v38 = vpop.f32.mrf.mxu2  ;;  %v5655_v47 = vpop.f32.mrf.mxu3 }
 0x193   : > { %7285 = vst [vmem:[#allocation12_spill] sm:$0xff] %v5655_v47  ;;  %v1500_v62 = vrot.slane %v1050_v38, 7  ;;  %v645_v47 = vpop.permute.xlu1 %644 }
 0x195   : > { %v5659_v53 = vsel %vm1519_vm5, %v1499_v21, %v1500_v62 }
 0x196   : > { %7286 = vst [vmem:[#allocation13_spill] sm:$0xff] %v5659_v53 }
 0x197   : > { %4342 = vmatmul.msk.bf16.vlgmr.msrb.gmra.mxu2 %vm855_vm4, %v5392_v40  ;;  %v571_v40 = vpop.permute.xlu0 %570 }
 0x198   : > { %v722_v53 = vsel %vm686_vm2, %v5362_v24, %v571_v40 }
 0x19a   : > { %v1053_v31 = vpop.f32.mrf.mxu2  ;;  %v1233_v22 = vpop.f32.mrf.mxu3 }
 0x19b   : > { %v1501_v0 = vrot.slane %v1053_v31, 7 }
 0x19d   : > { %4276 = vmatmul.msk.bf16.gmra.mxu0 %vm855_vm4, %v5666_v55  ;;  %4314 = vmatmul.msk.bf16.gmra.mxu1 %vm855_vm4, %v5666_v55  ;;  %v1535_v21 = vsel %vm1519_vm5, %v1500_v62, %v1501_v0  ;;  %v5689_v62 = vsel %vm783_vm3, %v722_v53, %v645_v47  ;;  %v573_v47 = vpop.permute.xlu2 %572 }
 0x19e   : > { %v5674_v45 = vadd.f32 %v1535_v21, %v1233_v22 }
 0x1a0   : > { %7287 = vst [vmem:[#allocation14_spill] sm:$0xff] %v5674_v45  ;;  %v647_v45 = vpop.permute.xlu0 %646 }
 0x1a2   : > { %v1055_v38 = vpop.f32.mrf.mxu2  ;;  %v5676_v1 = vpop.f32.mrf.mxu3 }
 0x1a3   : > { %7288 = vst [vmem:[#allocation15_spill] sm:$0xff] %v5676_v1  ;;  %v1502_v48 = vrot.slane %v1055_v38, 7  ;;  %v5699_v38 = vpop.f32.mrf.mxu0 }
 0x1a5   : > { %v5682_v31 = vsel %vm1519_vm5, %v1501_v0, %v1502_v48 }
 0x1a6   : > { %7289 = vst [vmem:[#allocation16_spill] sm:$0xff] %v5682_v31  ;;  %v725_v31 = vsel %vm686_vm2, %v5345_v15, %v573_v47 }
 0x1a7   : > { %4343 = vmatmul.msk.bf16.gmra.mxu2 %vm855_vm4, %v5414_v9 }
 0x1aa   : > { %v1058_v22 = vpop.f32.mrf.mxu2  ;;  %v1238_v21 = vpop.f32.mrf.mxu3 }
 0x1ab   : > { %v1503_v1 = vrot.slane %v1058_v22, 7 }
 0x1ad   : > { %4277 = vmatmul.msk.bf16.gmra.mxu0 %vm855_vm4, %v5689_v62  ;;  %4315 = vmatmul.msk.bf16.gmra.mxu1 %vm855_vm4, %v5689_v62  ;;  %v1533_v0 = vsel %vm1519_vm5, %v1502_v48, %v1503_v1  ;;  %v5711_v48 = vpop.f32.mrf.mxu0 }
 0x1ae   : > { %v5697_v24 = vadd.f32 %v1533_v0, %v1238_v21  ;;  %v5714_v21 = vsel %vm783_vm3, %v725_v31, %v647_v45 }
 0x1b0   : > { %7290 = vst [vmem:[#allocation17_spill] sm:$0xff] %v5697_v24 }
 0x1b2   : > { %v1060_v9 = vpop.f32.mrf.mxu2  ;;  %v5701_v40 = vpop.f32.mrf.mxu3 }
 0x1b3   : > { %7291 = vst [vmem:[#allocation18_spill] sm:$0xff] %v5701_v40  ;;  %v1504_v53 = vrot.slane %v1060_v9, 7 }
 0x1b5   : > { %v5705_v22 = vsel %vm1519_vm5, %v1503_v1, %v1504_v53 }
 0x1b6   : > { %7292 = vst [vmem:[#allocation19_spill] sm:$0xff] %v5705_v22  ;;  %v575_v22 = vpop.permute.xlu1 %574 }
 0x1b7   : > { %4344 = vmatmul.msk.bf16.gmra.mxu2 %vm855_vm4, %v5453_v44  ;;  %v5724_v44 = vpop.f32.mrf.mxu0  ;;  %v728_v31 = vsel %vm686_vm2, %v5364_v25, %v575_v22 }
 0x1ba   : > { %v1063_v0 = vpop.f32.mrf.mxu2  ;;  %v1243_v40 = vpop.f32.mrf.mxu3 }
 0x1bb   : > { %v1505_v24 = vrot.slane %v1063_v0, 7  ;;  %v649_v0 = vpop.permute.xlu2 %648 }
 0x1bd   : > { %4278 = vmatmul.msk.bf16.gmra.mxu0 %vm855_vm4, %v5714_v21  ;;  %v1531_v1 = vsel %vm1519_vm5, %v1504_v53, %v1505_v24 }
 0x1be   : > { %v5720_v9 = vadd.f32 %v1531_v1, %v1243_v40  ;;  %v5735_v40 = vsel %vm783_vm3, %v728_v31, %v649_v0 }
 0x1bf   : > { %v5745_v25 = vpop.f32.mrf.mxu0 }
 0x1c0   : > { %7293 = vst [vmem:[#allocation20_spill] sm:$0xff] %v5720_v9 }
 0x1c2   : > { %v1065_v15 = vpop.f32.mrf.mxu2  ;;  %v5722_v47 = vpop.f32.mrf.mxu3 }
 0x1c3   : > { %7294 = vst [vmem:[#allocation21_spill] sm:$0xff] %v5722_v47  ;;  %v1506_v41 = vrot.slane %v1065_v15, 7  ;;  %v4520_v15 = vld [vmem:[%s7266_s2] sm:$0xf] }
 0x1c5   : > { %v5728_v45 = vsel %vm1519_vm5, %v1505_v24, %v1506_v41  ;;  %v4709_v24 = vld [vmem:[%s7266_s2] sm:$0x30] }
 0x1c6   : > { %7295 = vst [vmem:[#allocation22_spill] sm:$0xff] %v5728_v45  ;;  %v4521_v47 = vor.u32 %v4709_v24, %v4520_v15  ;;  %v4711_v15 = vld [vmem:[%s7266_s2 + $0x10] sm:$0x30]  ;;  %v577_v24 = vpop.permute.xlu0 %576 }
 0x1c7   : > { %4345 = vmatmul.msk.bf16.gmra.mxu2 %vm855_vm4, %v5486_v7 }
 0x1c8   : > { %v2753_v22 = vsel %vm920_vm1, %v4521_v47, 0  ;;  %v4710_v47 = vld [vmem:[%s7266_s2 + $0x8] sm:$0x30] }
 0x1c9   : > { %2762 = vmatpush.bf16.msrb.mxu3 %v2753_v22 }
 0x1ca   : > { %v1068_v53 = vpop.f32.mrf.mxu2  ;;  %v1248_v1 = vpop.f32.mrf.mxu3 }
 0x1cb   : > { %v1507_v45 = vrot.slane %v1068_v53, 7  ;;  %v4596_v53 = vld [vmem:[%s7266_s2 + $0x10] sm:$0xf] }
 0x1cc   : > { %v4597_v56 = vor.u32 %v4711_v15, %v4596_v53  ;;  %v5774_v15 = vpop.f32.mrf.mxu0 }
 0x1cd   : > { %4279 = vmatmul.msk.bf16.gmra.mxu0 %vm855_vm4, %v5735_v40  ;;  %v1529_v7 = vsel %vm1519_vm5, %v1506_v41, %v1507_v45  ;;  %v4558_v41 = vld [vmem:[%s7266_s2 + $0x8] sm:$0xf] }
 0x1ce   : > { %v5750_v31 = vadd.f32 %v1529_v7, %v1248_v1  ;;  %v4559_v1 = vor.u32 %v4710_v47, %v4558_v41  ;;  %v3113_v22 = vsel %vm920_vm1, %v4597_v56, 0 }
 0x1cf   : > { %3122 = vmatpush.bf16.msrb.mxu1 %v3113_v22 }
 0x1d0   : > { %7296 = vst [vmem:[#allocation23_spill] sm:$0xff] %v5750_v31  ;;  %v2933_v53 = vsel %vm920_vm1, %v4559_v1, 0  ;;  %v1113_v31 = vpop.f32.mrf.mxu1 }
 0x1d1   : > { %2942 = vmatpush.bf16.msrb.mxu0 %v2933_v53 }
 0x1d2   : > { %v1070_v0 = vpop.f32.mrf.mxu2  ;;  %v5752_v9 = vpop.f32.mrf.mxu3 }
 0x1d3   : > { %7297 = vst [vmem:[#allocation24_spill] sm:$0xff] %v5752_v9  ;;  %v1508_v10 = vrot.slane %v1070_v0, 7  ;;  %v731_v9 = vsel %vm686_vm2, %v5467_v26, %v577_v24  ;;  %v651_v0 = vpop.permute.xlu1 %650 }
 0x1d4   : > { %v5779_v41 = vsel %vm783_vm3, %v731_v9, %v651_v0  ;;  %v5787_v24 = vpop.f32.mrf.mxu0 }
 0x1d5   : > { %v5768_v7 = vsel %vm1519_vm5, %v1507_v45, %v1508_v10 }
 0x1d6   : > { %7298 = vst [vmem:[#allocation25_spill] sm:$0xff] %v5768_v7 }
 0x1d7   : > { %4346 = vmatmul.msk.bf16.gmra.mxu2 %vm855_vm4, %v5518_v20  ;;  %v579_v20 = vpop.permute.xlu2 %578 }
 0x1d8   : > { %v734_v0 = vsel %vm686_vm2, %v5418_v34, %v579_v20 }
 0x1da   : > { %v1073_v45 = vpop.f32.mrf.mxu2  ;;  %v1253_v47 = vpop.f32.mrf.mxu3 }
 0x1db   : > { %v1509_v7 = vrot.slane %v1073_v45, 7  ;;  %v653_v45 = vpop.permute.xlu0 %652 }
 0x1dd   : > { %4280 = vmatmul.msk.bf16.gmra.mxu0 %vm855_vm4, %v5779_v41  ;;  %v1527_v26 = vsel %vm1519_vm5, %v1508_v10, %v1509_v7  ;;  %v5800_v10 = vsel %vm783_vm3, %v734_v0, %v653_v45 }
 0x1de   : > { %v5785_v56 = vadd.f32 %v1527_v26, %v1253_v47 }
 0x1e0   : > { %7299 = vst [vmem:[#allocation26_spill] sm:$0xff] %v5785_v56 }
 0x1e2   : > { %v1075_v1 = vpop.f32.mrf.mxu2  ;;  %v5789_v22 = vpop.f32.mrf.mxu3 }
 0x1e3   : > { %7300 = vst [vmem:[#allocation27_spill] sm:$0xff] %v5789_v22  ;;  %v1510_v53 = vrot.slane %v1075_v1, 7  ;;  %v5802_v22 = vpop.f32.mrf.mxu0 }
 0x1e5   : > { %v5793_v9 = vsel %vm1519_vm5, %v1509_v7, %v1510_v53 }
 0x1e6   : > { %7301 = vst [vmem:[#allocation28_spill] sm:$0xff] %v5793_v9 }
 0x1e7   : > { %4347 = vmatmul.msk.bf16.gmra.mxu2 %vm855_vm4, %v5548_v23 }
 0x1ea   : > { %v1078_v47 = vpop.f32.mrf.mxu2  ;;  %v1258_v26 = vpop.f32.mrf.mxu3 }
 0x1eb   : > { %v1511_v56 = vrot.slane %v1078_v47, 7 }
 0x1ed   : > { %4281 = vmatmul.msk.bf16.gmra.mxu0 %vm855_vm4, %v5800_v10  ;;  %v1525_v7 = vsel %vm1519_vm5, %v1510_v53, %v1511_v56 }
 0x1ee   : > { %v5808_v1 = vadd.f32 %v1525_v7, %v1258_v26  ;;  %v1453_v26 = vrot.slane %v5678_v2, 7  ;;  %v1454_v7 = vrot.slane %v5699_v38, 7  ;;  %v1455_v2 = vrot.slane %v5711_v48, 7 }
 0x1f0   : > { %7302 = vst [vmem:[#allocation29_spill] sm:$0xff] %v5808_v1 }
 0x1f2   : > { %v1080_v34 = vpop.f32.mrf.mxu2  ;;  %v5810_v20 = vpop.f32.mrf.mxu3 }
 0x1f3   : > { %7303 = vst [vmem:[#allocation30_spill] sm:$0xff] %v5810_v20  ;;  %v1512_v23 = vrot.slane %v1080_v34, 7 }
 0x1f5   : > { %v5814_v0 = vsel %vm1519_vm5, %v1511_v56, %v1512_v23  ;;  %v1582_v56 = vsel %vm1519_vm5, %v1453_v26, %v1454_v7 }
 0x1f6   : > { %7304 = vst [vmem:[#allocation31_spill] sm:$0xff] %v5814_v0 }
 0x1f7   : > { %4348 = vmatmul.msk.bf16.gmra.mxu2 %vm855_vm4, %v5569_v35  ;;  %v1115_v35 = vpop.f32.mrf.mxu1  ;;  %4316 = vmatmul.msk.bf16.gmra.mxu1 %vm855_vm4, %v5714_v21 }
 0x1fa   : > { %v1083_v45 = vpop.f32.mrf.mxu2  ;;  %v1263_v47 = vpop.f32.mrf.mxu3 }
 0x1fb   : > { %v1513_v9 = vrot.slane %v1083_v45, 7  ;;  %v1581_v45 = vsel %vm1519_vm5, %v1454_v7, %v1455_v2 }
 0x1fd   : > { %v1523_v53 = vsel %vm1519_vm5, %v1512_v23, %v1513_v9 }
 0x1fe   : > { %v5822_v20 = vadd.f32 %v1523_v53, %v1263_v47 }
 0x1ff   : > { %v1118_v53 = vpop.f32.mrf.mxu1 }
 0x200   : > { %7305 = vst [vmem:[#allocation32_spill] sm:$0xff] %v5822_v20  ;;  %v1456_v20 = vrot.slane %v5724_v44, 7 }
 0x202   : > { %v1085_v34 = vpop.f32.mrf.mxu2  ;;  %v5826_v1 = vpop.f32.mrf.mxu3  ;;  %v1580_v48 = vsel %vm1519_vm5, %v1455_v2, %v1456_v20  ;;  %v1458_v2 = vrot.slane %v5774_v15, 7  ;;  %v5877_v15 = vld [vmem:[%s7267_s3] ss:$0 sm:$0xff] }
 0x203   : > { %v1514_v0 = vrot.slane %v1085_v34, 7  ;;  %7306 = vst [vmem:[#allocation33_spill] sm:$0xff] %v5826_v1 }
 0x205   : > { %v5832_v23 = vsel %vm1519_vm5, %v1513_v9, %v1514_v0 }
 0x206   : > { %7307 = vst [vmem:[#allocation34_spill] sm:$0xff] %v5832_v23 }
 0x207   : > { %4349 = vmatmul.msk.bf16.gmra.mxu2 %vm855_vm4, %v5592_v50  ;;  %v1120_v50 = vpop.f32.mrf.mxu1  ;;  %4317 = vmatmul.msk.bf16.gmra.mxu1 %vm855_vm4, %v5735_v40 }
 0x20a   : > { %v1088_v38 = vpop.f32.mrf.mxu2  ;;  %v1268_v34 = vpop.f32.mrf.mxu3 }
 0x20b   : > { %v1515_v47 = vrot.slane %v1088_v38, 7  ;;  %v1457_v38 = vrot.slane %v5745_v25, 7 }
 0x20d   : > { %v1521_v1 = vsel %vm1519_vm5, %v1514_v0, %v1515_v47  ;;  %v5867_v25 = vsel %vm1519_vm5, %v1457_v38, %v1458_v2 }
 0x20e   : > { %v5842_v37 = vadd.f32 %v1521_v1, %v1268_v34  ;;  %v5859_v1 = vsel %vm1519_vm5, %v1456_v20, %v1457_v38 }
 0x20f   : > { %v1123_v0 = vpop.f32.mrf.mxu1 }
 0x210   : > { %7308 = vst [vmem:[#allocation35_spill] sm:$0xff] %v5842_v37 }
 0x212   : > { %v1090_v9 = vpop.f32.mrf.mxu2 }
 0x213   : > { %v1516_v23 = vrot.slane %v1090_v9, 7 }
 0x215   : > { %v5850_v7 = vsel %vm1519_vm5, %v1515_v47, %v1516_v23  ;;  %v1583_v34 = vsel %vm1519_vm5, %v1516_v23, %v1453_v26  ;;  %v1459_v23 = vrot.slane %v5787_v24, 7 }
 0x216   : > { %7309 = vst [vmem:[#allocation36_spill] sm:$0xff] %v5850_v7  ;;  %v1584_v20 = vadd.f32 %v1583_v34, %v1113_v31 }
 0x217   : > { %4350 = vmatmul.msk.bf16.gmra.mxu2 %vm855_vm4, %v5622_v30  ;;  %v5870_v37 = vpop.f32.mrf.mxu1  ;;  %4318 = vmatmul.msk.bf16.gmra.mxu1 %vm855_vm4, %v5779_v41  ;;  %v5889_v34 = vsel %vm1519_vm5, %v1458_v2, %v1459_v23 }
 0x21a   : > { %v5855_v44 = vpop.f32.mrf.mxu2 }
 0x21b   : > { %7310 = vst [vmem:[#allocation37_spill] sm:$0xff] %v5855_v44  ;;  %v7274_v30 = vrot.slane %v5855_v44, 1  ;;  %v1585_v44 = vadd.f32 %v1582_v56, %v1115_v35 }
 0x21f   : > { %v5891_v52 = vpop.f32.mrf.mxu1 }
 0x222   : > { %v1295_v9 = vpop.f32.mrf.mxu2 }
 0x223   : > { %v1649_v47 = vrot.slane %v1295_v9, 1 }
 0x225   : > { %v1775_v26 = vsel %vm1712_vm6, %v7274_v30, %v1649_v47  ;;  %v5893_v30 = vpop.f32.mrf.mxu0 }
 0x226   : > { %v1777_v38 = vadd.f32 %v1775_v26, %v1584_v20 }
 0x227   : > { %4351 = vmatmul.msk.bf16.gmra.mxu2 %vm855_vm4, %v5645_v57  ;;  %v7275_v57 = vrot.slane %v5802_v22, 7 }
 0x228   : > { %v1843_v9 = vadd.f32 %v5877_v15, %v1777_v38 }
 0x229   : > { %v5904_v56 = vsel %vm1519_vm5, %v1459_v23, %v7275_v57 }
 0x22a   : > { %v1907_v7 = vmax.f32 %v1843_v9, 0.0  ;;  %v1298_v31 = vpop.f32.mrf.mxu2 }
 0x22b   : > { %v1650_v33 = vrot.slane %v1298_v31, 1 }
 0x22c   : > { %v1980_v58 = vpack.c.bf16 %v1907_v7, %v1907_v7  ;;  %v5906_v7 = vpop.f32.mrf.mxu1  ;;  %4319 = vmatmul.msk.bf16.gmra.mxu1 %vm855_vm4, %v5800_v10 }
 0x22d   : > { %v1774_v24 = vsel %vm1712_vm6, %v1649_v47, %v1650_v33  ;;  %v1586_v47 = vadd.f32 %v1581_v45, %v1118_v53  ;;  %v5913_v31 = vpop.f32.mrf.mxu0  ;;  %v1587_v45 = vadd.f32 %v1580_v48, %v1120_v50 }
 0x22e   : > { %2045 = vst.msk [vmem:[#allocation3 + $0x10] sm:$0xf] %vm199_vm0, %v1980_v58  ;;  %v1778_v20 = vadd.f32 %v1774_v24, %v1585_v44 }
 0x230   : > { %v1844_v26 = vadd.f32 %v5877_v15, %v1778_v20 }
 0x232   : > { %v1908_v38 = vmax.f32 %v1844_v26, 0.0  ;;  %v1300_v2 = vpop.f32.mrf.mxu2 }
 0x233   : > { %v1651_v35 = vrot.slane %v1300_v2, 1 }
 0x234   : > { %v1981_v9 = vpack.c.bf16 %v1908_v38, %v1908_v38  ;;  %v5918_v2 = vpop.f32.mrf.mxu1 }
 0x235   : > { %v1773_v58 = vsel %vm1712_vm6, %v1650_v33, %v1651_v35 }
 0x236   : > { %2046 = vst.msk [vmem:[#allocation3 + $0x14] sm:$0xf] %vm199_vm0, %v1981_v9  ;;  %v1779_v44 = vadd.f32 %v1773_v58, %v1586_v47  ;;  %v7311_v9 = vmov 0   ;;  %v5930_v58 = vpop.f32.mrf.mxu0 }
 0x237   : > { %4352 = vmatmul.msk.bf16.gmra.mxu2 %vm855_vm4, %v5666_v55 }
 0x238   : > { %v1845_v23 = vadd.f32 %v5877_v15, %v1779_v44 }
 0x23a   : > { %v1909_v24 = vmax.f32 %v1845_v23, 0.0  ;;  %v1303_v20 = vpop.f32.mrf.mxu2 }
 0x23b   : > { %v1652_v26 = vrot.slane %v1303_v20, 1 }
 0x23c   : > { %v1982_v53 = vpack.c.bf16 %v1909_v24, %v1909_v24  ;;  %v5932_v23 = vpop.f32.mrf.mxu1 }
 0x23d   : > { %v1772_v33 = vsel %vm1712_vm6, %v1651_v35, %v1652_v26  ;;  %v5922_v38 = vld [vmem:[#allocation3 + $0x10] sm:$0xff]  ;;  %v1588_v35 = vadd.f32 %v5859_v1, %v1123_v0 }
 0x23e   : > { %2047 = vst.msk [vmem:[#allocation3 + $0x18] sm:$0xf] %vm199_vm0, %v1982_v53  ;;  %v1780_v47 = vadd.f32 %v1772_v33, %v1587_v45  ;;  %2383 = vrot.lane.b32.xlu1 %v5922_v38, %s4912_s21 }
 0x23f   : > { %2109 = vst.msk [vmem:[#allocation3 + $0x18] sm:$0xf] %vm199_vm0, %v7311_v9 }
 0x240   : > { %v1846_v55 = vadd.f32 %v5877_v15, %v1780_v47 }
 0x242   : > { %v1910_v48 = vmax.f32 %v1846_v55, 0.0  ;;  %v1305_v50 = vpop.f32.mrf.mxu2  ;;  %v5943_v55 = vpop.f32.mrf.mxu0 }
 0x243   : > { %v1653_v44 = vrot.slane %v1305_v50, 1 }
 0x244   : > { %v1983_v24 = vpack.c.bf16 %v1910_v48, %v1910_v48  ;;  %v5945_v0 = vpop.f32.mrf.mxu1 }
 0x245   : > { %v1771_v20 = vsel %vm1712_vm6, %v1652_v26, %v1653_v44  ;;  %v1589_v26 = vadd.f32 %v5867_v25, %v5870_v37 }
 0x246   : > { %2048 = vst.msk [vmem:[#allocation3 + $0x1c] sm:$0xf] %vm199_vm0, %v1983_v24  ;;  %v1781_v45 = vadd.f32 %v1771_v20, %v1588_v35 }
 0x247   : > { %2110 = vst.msk [vmem:[#allocation3 + $0x1c] sm:$0xf] %vm199_vm0, %v7311_v9  ;;  %4353 = vmatmul.msk.bf16.gmra.mxu2 %vm855_vm4, %v5689_v62 }
 0x248   : > { %v1847_v53 = vadd.f32 %v5877_v15, %v1781_v45 }
 0x24a   : > { %v1911_v33 = vmax.f32 %v1847_v53, 0.0  ;;  %v1308_v47 = vpop.f32.mrf.mxu2  ;;  %v1590_v53 = vadd.f32 %v5889_v34, %v5891_v52  ;;  %v5957_v46 = vpop.f32.mrf.mxu0 }
 0x24b   : > { %v1654_v1 = vrot.slane %v1308_v47, 1 }
 0x24c   : > { %v1984_v48 = vpack.c.bf16 %v1911_v33, %v1911_v33  ;;  %v5955_v57 = vpop.f32.mrf.mxu1 }
 0x24d   : > { %v1770_v50 = vsel %vm1712_vm6, %v1653_v44, %v1654_v1 }
 0x24e   : > { %2049 = vst.msk [vmem:[#allocation3 + $0x20] sm:$0xf] %vm199_vm0, %v1984_v48  ;;  %v1782_v35 = vadd.f32 %v1770_v50, %v1589_v26  ;;  %v5962_v44 = vld [vmem:[#allocation3 + $0x18] sm:$0xff]  ;;  %v1591_v48 = vadd.f32 %v5904_v56, %v5906_v7  ;;  %v1461_v50 = vrot.slane %v5893_v30, 7  ;;  %v7312_v56 = vrot.slane %v5802_v22, 7 }
 0x24f   : > { %2385 = vrot.lane.b32.xlu0 %v5962_v44, %s4912_s21 }
 0x250   : > { %v1848_v62 = vadd.f32 %v5877_v15, %v1782_v35  ;;  %v1575_v7 = vsel %vm1519_vm5, %v7312_v56, %v1461_v50 }
 0x252   : > { %v1912_v24 = vmax.f32 %v1848_v62, 0.0  ;;  %v1310_v20 = vpop.f32.mrf.mxu2 }
 0x253   : > { %v1655_v45 = vrot.slane %v1310_v20, 1  ;;  %v5979_v20 = vpop.f32.mrf.mxu0 }
 0x254   : > { %v1985_v47 = vpack.c.bf16 %v1912_v24, %v1912_v24 }
 0x255   : > { %v1769_v37 = vsel %vm1712_vm6, %v1654_v1, %v1655_v45 }
 0x256   : > { %2050 = vst.msk [vmem:[#allocation3 + $0x24] sm:$0xf] %vm199_vm0, %v1985_v47  ;;  %v1783_v25 = vadd.f32 %v1769_v37, %v1590_v53  ;;  %v1592_v37 = vadd.f32 %v1575_v7, %v5918_v2 }
 0x257   : > { %4354 = vmatmul.msk.bf16.gmra.mxu2 %vm855_vm4, %v5714_v21  ;;  %v5976_v21 = vpop.f32.mrf.mxu1 }
 0x258   : > { %v1849_v33 = vadd.f32 %v5877_v15, %v1783_v25 }
 0x25a   : > { %v1913_v52 = vmax.f32 %v1849_v33, 0.0  ;;  %v1313_v34 = vpop.f32.mrf.mxu2  ;;  %v1462_v33 = vrot.slane %v5913_v31, 7 }
 0x25b   : > { %v1656_v26 = vrot.slane %v1313_v34, 1  ;;  %v6004_v31 = vpop.f32.mrf.mxu0 }
 0x25c   : > { %v1986_v1 = vpack.c.bf16 %v1913_v52, %v1913_v52 }
 0x25d   : > { %v1768_v35 = vsel %vm1712_vm6, %v1655_v45, %v1656_v26  ;;  %v5974_v62 = vld [vmem:[#allocation3 + $0x20] sm:$0xff] }
 0x25e   : > { %2051 = vst.msk [vmem:[#allocation3 + $0x28] sm:$0xf] %vm199_vm0, %v1986_v1  ;;  %v1784_v24 = vadd.f32 %v1768_v35, %v1591_v48  ;;  %2457 = vrot.lane.b32.xlu2 %v5974_v62, %s4913_s22 }
 0x25f   : > { %2111 = vst.msk [vmem:[#allocation3 + $0x28] sm:$0xf] %vm199_vm0, %v7311_v9  ;;  %v6001_v22 = vpop.f32.mrf.mxu1 }
 0x260   : > { %v1850_v30 = vadd.f32 %v5877_v15, %v1784_v24 }
 0x262   : > { %v1914_v45 = vmax.f32 %v1850_v30, 0.0  ;;  %v1315_v53 = vpop.f32.mrf.mxu2 }
 0x263   : > { %v1657_v47 = vrot.slane %v1315_v53, 1 }
 0x264   : > { %v1987_v25 = vpack.c.bf16 %v1914_v45, %v1914_v45 }
 0x265   : > { %v1767_v52 = vsel %vm1712_vm6, %v1656_v26, %v1657_v47  ;;  %v1574_v26 = vsel %vm1519_vm5, %v1461_v50, %v1462_v33 }
 0x266   : > { %2052 = vst.msk [vmem:[#allocation3 + $0x2c] sm:$0xf] %vm199_vm0, %v1987_v25  ;;  %v1785_v34 = vadd.f32 %v1767_v52, %v1592_v37  ;;  %2387 = vrot.lane.b32.xlu2 %v5974_v62, %s4912_s21  ;;  %v1593_v24 = vadd.f32 %v1574_v26, %v5932_v23  ;;  %v6022_v25 = vpop.f32.mrf.mxu0 }
 0x267   : > { %2112 = vst.msk [vmem:[#allocation3 + $0x2c] sm:$0xf] %vm199_vm0, %v7311_v9  ;;  %4355 = vmatmul.msk.bf16.gmra.mxu2 %vm855_vm4, %v5735_v40  ;;  %v1463_v40 = vrot.slane %v5930_v58, 7  ;;  %v6020_v23 = vpop.f32.mrf.mxu1 }
 0x268   : > { %v1851_v2 = vadd.f32 %v5877_v15, %v1785_v34 }
 0x269   : > { %v1573_v50 = vsel %vm1519_vm5, %v1462_v33, %v1463_v40 }
 0x26a   : > { %v1915_v48 = vmax.f32 %v1851_v2, 0.0  ;;  %v1318_v1 = vpop.f32.mrf.mxu2  ;;  %v1594_v52 = vadd.f32 %v1573_v50, %v5945_v0  ;;  %v1464_v2 = vrot.slane %v5943_v55, 7 }
 0x26b   : > { %v1658_v35 = vrot.slane %v1318_v1, 1 }
 0x26c   : > { %v1988_v30 = vpack.c.bf16 %v1915_v48, %v1915_v48  ;;  %v1572_v0 = vsel %vm1519_vm5, %v1463_v40, %v1464_v2 }
 0x26d   : > { %v1766_v56 = vsel %vm1712_vm6, %v1657_v47, %v1658_v35 }
 0x26e   : > { %2053 = vst.msk [vmem:[#allocation3 + $0x30] sm:$0xf] %vm199_vm0, %v1988_v30  ;;  %v1786_v7 = vadd.f32 %v1766_v56, %v1593_v24  ;;  %v6013_v45 = vld [vmem:[#allocation3 + $0x28] sm:$0xff] }
 0x26f   : > { %2459 = vrot.lane.b32.xlu1 %v6013_v45, %s4913_s22  ;;  %v1150_v30 = vpop.f32.mrf.mxu1 }
 0x270   : > { %v1852_v53 = vadd.f32 %v5877_v15, %v1786_v7  ;;  %v1465_v7 = vrot.slane %v5957_v46, 7 }
 0x272   : > { %v1916_v37 = vmax.f32 %v1852_v53, 0.0  ;;  %v1320_v58 = vpop.f32.mrf.mxu2  ;;  %v6038_v53 = vpop.f32.mrf.mxu0  ;;  %v1571_v46 = vsel %vm1519_vm5, %v1464_v2, %v1465_v7 }
 0x273   : > { %v1659_v47 = vrot.slane %v1320_v58, 1 }
 0x274   : > { %v1989_v34 = vpack.c.bf16 %v1916_v37, %v1916_v37 }
 0x275   : > { %v1765_v26 = vsel %vm1712_vm6, %v1658_v35, %v1659_v47  ;;  %v1595_v35 = vadd.f32 %v1572_v0, %v5955_v57 }
 0x276   : > { %2054 = vst.msk [vmem:[#allocation3 + $0x34] sm:$0xf] %vm199_vm0, %v1989_v34  ;;  %v1787_v48 = vadd.f32 %v1765_v26, %v1594_v52  ;;  %v1466_v26 = vrot.slane %v5979_v20, 7 }
 0x277   : > { %4356 = vmatmul.msk.bf16.gmra.mxu2 %vm855_vm4, %v5779_v41  ;;  %2389 = vrot.lane.b32.xlu1 %v6013_v45, %s4912_s21 }
 0x278   : > { %v1853_v33 = vadd.f32 %v5877_v15, %v1787_v48  ;;  %v1570_v20 = vsel %vm1519_vm5, %v1465_v7, %v1466_v26 }
 0x27a   : > { %v1917_v1 = vmax.f32 %v1853_v33, 0.0  ;;  %v1323_v24 = vpop.f32.mrf.mxu2  ;;  %v1153_v33 = vpop.f32.mrf.mxu1 }
 0x27b   : > { %v1660_v55 = vrot.slane %v1323_v24, 1 }
 0x27c   : > { %v1990_v56 = vpack.c.bf16 %v1917_v1, %v1917_v1  ;;  %v6057_v1 = vpop.f32.mrf.mxu0 }
 0x27d   : > { %v1764_v41 = vsel %vm1712_vm6, %v1659_v47, %v1660_v55  ;;  %v6042_v50 = vld [vmem:[#allocation3 + $0x30] sm:$0xff]  ;;  %v1596_v47 = vadd.f32 %v1571_v46, %v5976_v21 }
 0x27e   : > { %2055 = vst.msk [vmem:[#allocation3 + $0x38] sm:$0xf] %vm199_vm0, %v1990_v56  ;;  %v1788_v37 = vadd.f32 %v1764_v41, %v1595_v35  ;;  %2461 = vrot.lane.b32.xlu0 %v6042_v50, %s4913_s22  ;;  %v1597_v35 = vadd.f32 %v1570_v20, %v6001_v22  ;;  %v1467_v41 = vrot.slane %v6004_v31, 7 }
 0x27f   : > { %2113 = vst.msk [vmem:[#allocation3 + $0x38] sm:$0xf] %vm199_vm0, %v7311_v9 }
 0x280   : > { %v1854_v57 = vadd.f32 %v5877_v15, %v1788_v37  ;;  %v1569_v22 = vsel %vm1519_vm5, %v1466_v26, %v1467_v41 }
 0x282   : > { %v1918_v40 = vmax.f32 %v1854_v57, 0.0  ;;  %v1325_v58 = vpop.f32.mrf.mxu2  ;;  %v1155_v46 = vpop.f32.mrf.mxu1 }
 0x283   : > { %v1661_v52 = vrot.slane %v1325_v58, 1 }
 0x284   : > { %v1991_v34 = vpack.c.bf16 %v1918_v40, %v1918_v40  ;;  %v6078_v7 = vpop.f32.mrf.mxu0 }
 0x285   : > { %v1763_v48 = vsel %vm1712_vm6, %v1660_v55, %v1661_v52 }
 0x286   : > { %2056 = vst.msk [vmem:[#allocation3 + $0x3c] sm:$0xf] %vm199_vm0, %v1991_v34  ;;  %v1789_v0 = vadd.f32 %v1763_v48, %v1596_v47  ;;  %2391 = vrot.lane.b32.xlu0 %v6042_v50, %s4912_s21  ;;  %v1468_v48 = vrot.slane %v6022_v25, 7 }
 0x287   : > { %2114 = vst.msk [vmem:[#allocation3 + $0x3c] sm:$0xf] %vm199_vm0, %v7311_v9  ;;  %4357 = vmatmul.msk.bf16.gmra.mxu2 %vm855_vm4, %v5800_v10 }
 0x288   : > { %v1855_v21 = vadd.f32 %v5877_v15, %v1789_v0 }
 0x28a   : > { %v1919_v2 = vmax.f32 %v1855_v21, 0.0  ;;  %v1328_v24 = vpop.f32.mrf.mxu2  ;;  %v1158_v26 = vpop.f32.mrf.mxu1 }
 0x28b   : > { %v1662_v55 = vrot.slane %v1328_v24, 1 }
 0x28c   : > { %v1992_v56 = vpack.c.bf16 %v1919_v2, %v1919_v2  ;;  %v6094_v24 = vpop.f32.mrf.mxu0 }
 0x28d   : > { %v1762_v37 = vsel %vm1712_vm6, %v1661_v52, %v1662_v55  ;;  %v1598_v52 = vadd.f32 %v1569_v22, %v6020_v23  ;;  %v1568_v23 = vsel %vm1519_vm5, %v1467_v41, %v1468_v48 }
 0x28e   : > { %2057 = vst.msk [vmem:[#allocation3 + $0x40] sm:$0xf] %vm199_vm0, %v1992_v56  ;;  %v1790_v10 = vadd.f32 %v1762_v37, %v1597_v35  ;;  %v6073_v57 = vld [vmem:[#allocation3 + $0x38] sm:$0xff]  ;;  %v1599_v35 = vadd.f32 %v1568_v23, %v1150_v30  ;;  %v1469_v37 = vrot.slane %v6038_v53, 7 }
 0x28f   : > { %2463 = vrot.lane.b32.xlu2 %v6073_v57, %s4913_s22 }
 0x290   : > { %v1856_v40 = vadd.f32 %v5877_v15, %v1790_v10  ;;  %v1567_v30 = vsel %vm1519_vm5, %v1468_v48, %v1469_v37 }
 0x292   : > { %v1920_v31 = vmax.f32 %v1856_v40, 0.0  ;;  %v1330_v58 = vpop.f32.mrf.mxu2 }
 0x293   : > { %v1663_v47 = vrot.slane %v1330_v58, 1 }
 0x294   : > { %v1993_v34 = vpack.c.bf16 %v1920_v31, %v1920_v31  ;;  %v1160_v31 = vpop.f32.mrf.mxu1 }
 0x295   : > { %v1761_v0 = vsel %vm1712_vm6, %v1662_v55, %v1663_v47 }
 0x296   : > { %2058 = vst.msk [vmem:[#allocation3 + $0x44] sm:$0xf] %vm199_vm0, %v1993_v34  ;;  %v1791_v21 = vadd.f32 %v1761_v0, %v1598_v52  ;;  %v1470_v34 = vrot.slane %v6057_v1, 7  ;;  %v6110_v0 = vpop.f32.mrf.mxu0 }
 0x297   : > { %4358 = vmatmul.msk.bf16.gmra.mxu2 %vm855_vm4, %v5229_v63  ;;  %2393 = vrot.lane.b32.xlu2 %v6073_v57, %s4912_s21 }
 0x298   : > { %v1857_v20 = vadd.f32 %v5877_v15, %v1791_v21  ;;  %v1566_v1 = vsel %vm1519_vm5, %v1469_v37, %v1470_v34 }
 0x29a   : > { %v1921_v2 = vmax.f32 %v1857_v20, 0.0  ;;  %v1333_v25 = vpop.f32.mrf.mxu2 }
 0x29b   : > { %v1664_v55 = vrot.slane %v1333_v25, 1  ;;  %v1601_v25 = vadd.f32 %v1566_v1, %v1155_v46 }
 0x29c   : > { %v1994_v56 = vpack.c.bf16 %v1921_v2, %v1921_v2 }
 0x29d   : > { %v1760_v63 = vsel %vm1712_vm6, %v1663_v47, %v1664_v55  ;;  %v6099_v10 = vld [vmem:[#allocation3 + $0x40] sm:$0xff]  ;;  %v1600_v47 = vadd.f32 %v1567_v30, %v1153_v33 }
 0x29e   : > { %2059 = vst.msk [vmem:[#allocation3 + $0x48] sm:$0xf] %vm199_vm0, %v1994_v56  ;;  %v1792_v40 = vadd.f32 %v1760_v63, %v1599_v35  ;;  %2465 = vrot.lane.b32.xlu1 %v6099_v10, %s4913_s22  ;;  %v1471_v35 = vrot.slane %v6078_v7, 7  ;;  %v1163_v56 = vpop.f32.mrf.mxu1 }
 0x29f   : > { %2115 = vst.msk [vmem:[#allocation3 + $0x48] sm:$0xf] %vm199_vm0, %v7311_v9 }
 0x2a0   : > { %v1858_v41 = vadd.f32 %v5877_v15, %v1792_v40  ;;  %v1565_v46 = vsel %vm1519_vm5, %v1470_v34, %v1471_v35 }
 0x2a2   : > { %v1922_v53 = vmax.f32 %v1858_v41, 0.0  ;;  %v1335_v22 = vpop.f32.mrf.mxu2  ;;  %v6130_v41 = vpop.f32.mrf.mxu0 }
 0x2a3   : > { %v1665_v58 = vrot.slane %v1335_v22, 1  ;;  %v1602_v22 = vadd.f32 %v1565_v46, %v1158_v26 }
 0x2a4   : > { %v1995_v52 = vpack.c.bf16 %v1922_v53, %v1922_v53 }
 0x2a5   : > { %v1759_v21 = vsel %vm1712_vm6, %v1664_v55, %v1665_v58 }
 0x2a6   : > { %2060 = vst.msk [vmem:[#allocation3 + $0x4c] sm:$0xf] %vm199_vm0, %v1995_v52  ;;  %v1793_v20 = vadd.f32 %v1759_v21, %v1600_v47  ;;  %2395 = vrot.lane.b32.xlu1 %v6099_v10, %s4912_s21  ;;  %v1472_v47 = vrot.slane %v6094_v24, 7  ;;  %v4673_v52 = vld [vmem:[#allocation3] sm:$0xff]  ;;  %v1165_v1 = vpop.f32.mrf.mxu1 }
 0x2a7   : > { %2116 = vst.msk [vmem:[#allocation3 + $0x4c] sm:$0xf] %vm199_vm0, %v7311_v9  ;;  %4359 = vmatmul.msk.bf16.gmra.mxu2 %vm855_vm4, %v5254_v14 }
 0x2a8   : > { %v1859_v33 = vadd.f32 %v5877_v15, %v1793_v20  ;;  %v1564_v24 = vsel %vm1519_vm5, %v1471_v35, %v1472_v47 }
 0x2aa   : > { %v1923_v48 = vmax.f32 %v1859_v33, 0.0  ;;  %v1338_v23 = vpop.f32.mrf.mxu2  ;;  %v6146_v26 = vpop.f32.mrf.mxu0 }
 0x2ab   : > { %v1666_v2 = vrot.slane %v1338_v23, 1 }
 0x2ac   : > { %v1996_v55 = vpack.c.bf16 %v1923_v48, %v1923_v48 }
 0x2ad   : > { %v1758_v63 = vsel %vm1712_vm6, %v1665_v58, %v1666_v2 }
 0x2ae   : > { %2061 = vst.msk [vmem:[#allocation3 + $0x50] sm:$0xf] %vm199_vm0, %v1996_v55  ;;  %v1794_v14 = vadd.f32 %v1758_v63, %v1601_v25  ;;  %v6128_v40 = vld [vmem:[#allocation3 + $0x48] sm:$0xff] }
 0x2af   : > { %2467 = vrot.lane.b32.xlu0 %v6128_v40, %s4913_s22 }
 0x2b0   : > { %v1860_v37 = vadd.f32 %v5877_v15, %v1794_v14  ;;  %v2384_v20 = vpop.permute.xlu1 %2383 }
 0x2b1   : > { %v2523_v48 = vsel %vm686_vm2, %v4673_v52, %v2384_v20 }
 0x2b2   : > { %v1924_v7 = vmax.f32 %v1860_v37, 0.0  ;;  %v1340_v30 = vpop.f32.mrf.mxu2  ;;  %v1473_v37 = vrot.slane %v6110_v0, 7  ;;  %v1168_v0 = vpop.f32.mrf.mxu1 }
 0x2b3   : > { %v1667_v53 = vrot.slane %v1340_v30, 1 }
 0x2b4   : > { %v1997_v58 = vpack.c.bf16 %v1924_v7, %v1924_v7  ;;  %v1563_v30 = vsel %vm1519_vm5, %v1472_v47, %v1473_v37 }
 0x2b5   : > { %v1757_v21 = vsel %vm1712_vm6, %v1666_v2, %v1667_v53 }
 0x2b6   : > { %2062 = vst.msk [vmem:[#allocation3 + $0x54] sm:$0xf] %vm199_vm0, %v1997_v58  ;;  %v1795_v33 = vadd.f32 %v1757_v21, %v1602_v22  ;;  %v1604_v21 = vadd.f32 %v1563_v30, %v1163_v56 }
 0x2b7   : > { %4360 = vmatmul.msk.bf16.gmra.mxu2 %vm855_vm4, %v5267_v28  ;;  %2397 = vrot.lane.b32.xlu0 %v6128_v40, %s4912_s21  ;;  %v1603_v28 = vadd.f32 %v1564_v24, %v1160_v31 }
 0x2b8   : > { %v1861_v34 = vadd.f32 %v5877_v15, %v1795_v33  ;;  %v2458_v23 = vpop.permute.xlu2 %2457  ;;  %v1474_v33 = vrot.slane %v6130_v41, 7 }
 0x2b9   : > { %v2618_v55 = vsel %vm783_vm3, %v2523_v48, %v2458_v23 }
 0x2ba   : > { %v1925_v2 = vmax.f32 %v1861_v34, 0.0  ;;  %v1343_v25 = vpop.f32.mrf.mxu2  ;;  %4522 = vmatmul.msk.bf16.vlgmr.msrb.gmra.mxu3 %vm855_vm4, %v2618_v55  ;;  %4560 = vmatmul.msk.bf16.vlgmr.msrb.gmra.mxu0 %vm855_vm4, %v2618_v55  ;;  %v1562_v41 = vsel %vm1519_vm5, %v1473_v37, %v1474_v33  ;;  %v1170_v23 = vpop.f32.mrf.mxu1 }
 0x2bb   : > { %v1668_v63 = vrot.slane %v1343_v25, 1  ;;  %4598 = vmatmul.msk.bf16.vlgmr.msrb.gmra.mxu1 %vm855_vm4, %v2618_v55  ;;  %v1605_v25 = vadd.f32 %v1562_v41, %v1165_v1 }
 0x2bc   : > { %v1998_v14 = vpack.c.bf16 %v1925_v2, %v1925_v2 }
 0x2bd   : > { %v1756_v35 = vsel %vm1712_vm6, %v1667_v53, %v1668_v63  ;;  %v6158_v46 = vld [vmem:[#allocation3 + $0x50] sm:$0xff]  ;;  %v6168_v53 = vpop.f32.mrf.mxu0 }
 0x2be   : > { %2063 = vst.msk [vmem:[#allocation3 + $0x58] sm:$0xf] %vm199_vm0, %v1998_v14  ;;  %v1796_v7 = vadd.f32 %v1756_v35, %v1603_v28  ;;  %2469 = vrot.lane.b32.xlu2 %v6158_v46, %s4913_s22 }
 0x2bf   : > { %2117 = vst.msk [vmem:[#allocation3 + $0x58] sm:$0xf] %vm199_vm0, %v7311_v9 }
 0x2c0   : > { %v1862_v31 = vadd.f32 %v5877_v15, %v1796_v7 }
 0x2c2   : > { %v1926_v22 = vmax.f32 %v1862_v31, 0.0  ;;  %v1345_v58 = vpop.f32.mrf.mxu2 }
 0x2c3   : > { %v1669_v52 = vrot.slane %v1345_v58, 1  ;;  %v1476_v58 = vrot.slane %v6168_v53, 7 }
 0x2c4   : > { %v1999_v20 = vpack.c.bf16 %v1926_v22, %v1926_v22 }
 0x2c5   : > { %v1755_v34 = vsel %vm1712_vm6, %v1668_v63, %v1669_v52  ;;  %v1475_v63 = vrot.slane %v6146_v26, 7  ;;  %v993_v28 = vpop.f32.mrf.mxu0 }
 0x2c6   : > { %2064 = vst.msk [vmem:[#allocation3 + $0x5c] sm:$0xf] %vm199_vm0, %v1999_v20  ;;  %v1797_v24 = vadd.f32 %v1755_v34, %v1604_v21  ;;  %2399 = vrot.lane.b32.xlu2 %v6158_v46, %s4912_s21 }
 0x2c7   : > { %2118 = vst.msk [vmem:[#allocation3 + $0x5c] sm:$0xf] %vm199_vm0, %v7311_v9  ;;  %4361 = vmatmul.msk.bf16.gmra.mxu2 %vm855_vm4, %v5294_v42  ;;  %v1561_v1 = vsel %vm1519_vm5, %v1474_v33, %v1475_v63 }
 0x2c8   : > { %v1863_v56 = vadd.f32 %v5877_v15, %v1797_v24  ;;  %v1606_v30 = vadd.f32 %v1561_v1, %v1168_v0  ;;  %v1560_v0 = vsel %vm1519_vm5, %v1475_v63, %v1476_v58 }
 0x2c9   : > { %v1607_v41 = vadd.f32 %v1560_v0, %v1170_v23 }
 0x2ca   : > { %v1927_v47 = vmax.f32 %v1863_v56, 0.0  ;;  %v1348_v48 = vpop.f32.mrf.mxu2 }
 0x2cb   : > { %v1670_v2 = vrot.slane %v1348_v48, 1  ;;  %v4674_v48 = vld [vmem:[#allocation3 + $0x8] sm:$0xff] }
 0x2cc   : > { %v2000_v55 = vpack.c.bf16 %v1927_v47, %v1927_v47 }
 0x2cd   : > { %v1754_v42 = vsel %vm1712_vm6, %v1669_v52, %v1670_v2  ;;  %v1173_v52 = vpop.f32.mrf.mxu1  ;;  %v995_v34 = vpop.f32.mrf.mxu0 }
 0x2ce   : > { %2065 = vst.msk [vmem:[#allocation3 + $0x60] sm:$0xf] %vm199_vm0, %v2000_v55  ;;  %v1798_v14 = vadd.f32 %v1754_v42, %v1605_v25  ;;  %v6187_v35 = vld [vmem:[#allocation3 + $0x58] sm:$0xff] }
 0x2cf   : > { %2471 = vrot.lane.b32.xlu1 %v6187_v35, %s4913_s22 }
 0x2d0   : > { %v1864_v7 = vadd.f32 %v5877_v15, %v1798_v14 }
 0x2d2   : > { %v1928_v37 = vmax.f32 %v1864_v7, 0.0  ;;  %v1350_v31 = vpop.f32.mrf.mxu2 }
 0x2d3   : > { %v1671_v26 = vrot.slane %v1350_v31, 1 }
 0x2d4   : > { %v2001_v22 = vpack.c.bf16 %v1928_v37, %v1928_v37 }
 0x2d5   : > { %v1753_v21 = vsel %vm1712_vm6, %v1670_v2, %v1671_v26  ;;  %v1477_v2 = vrot.slane %v993_v28, 7  ;;  %v1175_v14 = vpop.f32.mrf.mxu1  ;;  %v998_v28 = vpop.f32.mrf.mxu0 }
 0x2d6   : > { %2066 = vst.msk [vmem:[#allocation3 + $0x64] sm:$0xf] %vm199_vm0, %v2001_v22  ;;  %v1799_v20 = vadd.f32 %v1753_v21, %v1606_v30 }
 0x2d7   : > { %4362 = vmatmul.msk.bf16.gmra.mxu2 %vm855_vm4, %v5319_v51  ;;  %2401 = vrot.lane.b32.xlu1 %v6187_v35, %s4912_s21  ;;  %v2386_v51 = vpop.permute.xlu0 %2385  ;;  %v1559_v7 = vsel %vm1519_vm5, %v1476_v58, %v1477_v2 }
 0x2d8   : > { %v1865_v33 = vadd.f32 %v5877_v15, %v1799_v20  ;;  %v2526_v63 = vsel %vm686_vm2, %v4674_v48, %v2386_v51  ;;  %v1608_v22 = vadd.f32 %v1559_v7, %v1173_v52  ;;  %v1478_v20 = vrot.slane %v995_v34, 7 }
 0x2da   : > { %v1929_v53 = vmax.f32 %v1865_v33, 0.0  ;;  %v1353_v24 = vpop.f32.mrf.mxu2  ;;  %v1558_v34 = vsel %vm1519_vm5, %v1477_v2, %v1478_v20 }
 0x2db   : > { %v1672_v56 = vrot.slane %v1353_v24, 1 }
 0x2dc   : > { %v2002_v47 = vpack.c.bf16 %v1929_v53, %v1929_v53 }
 0x2dd   : > { %v1752_v25 = vsel %vm1712_vm6, %v1671_v26, %v1672_v56  ;;  %v6207_v55 = vld [vmem:[#allocation3 + $0x60] sm:$0xff]  ;;  %v1178_v0 = vpop.f32.mrf.mxu1 }
 0x2de   : > { %2067 = vst.msk [vmem:[#allocation3 + $0x68] sm:$0xf] %vm199_vm0, %v2002_v47  ;;  %v1800_v42 = vadd.f32 %v1752_v25, %v1607_v41  ;;  %2473 = vrot.lane.b32.xlu0 %v6207_v55, %s4913_s22  ;;  %v1000_v41 = vpop.f32.mrf.mxu0  ;;  %v1609_v47 = vadd.f32 %v1558_v34, %v1175_v14  ;;  %v1479_v25 = vrot.slane %v998_v28, 7 }
 0x2df   : > { %2119 = vst.msk [vmem:[#allocation3 + $0x68] sm:$0xf] %vm199_vm0, %v7311_v9 }
 0x2e0   : > { %v1866_v23 = vadd.f32 %v5877_v15, %v1800_v42  ;;  %v1557_v14 = vsel %vm1519_vm5, %v1478_v20, %v1479_v25 }
 0x2e1   : > { %v2460_v31 = vpop.permute.xlu1 %2459 }
 0x2e2   : > { %v1930_v1 = vmax.f32 %v1866_v23, 0.0  ;;  %v1355_v37 = vpop.f32.mrf.mxu2  ;;  %v2620_v30 = vsel %vm783_vm3, %v2526_v63, %v2460_v31 }
 0x2e3   : > { %v1673_v26 = vrot.slane %v1355_v37, 1  ;;  %4523 = vmatmul.msk.bf16.gmra.mxu3 %vm855_vm4, %v2620_v30  ;;  %4561 = vmatmul.msk.bf16.gmra.mxu0 %vm855_vm4, %v2620_v30 }
 0x2e4   : > { %v2003_v21 = vpack.c.bf16 %v1930_v1, %v1930_v1  ;;  %4599 = vmatmul.msk.bf16.gmra.mxu1 %vm855_vm4, %v2620_v30  ;;  %v1610_v30 = vadd.f32 %v1557_v14, %v1178_v0 }
 0x2e5   : > { %v1751_v33 = vsel %vm1712_vm6, %v1672_v56, %v1673_v26  ;;  %v1180_v31 = vpop.f32.mrf.mxu1 }
 0x2e6   : > { %2068 = vst.msk [vmem:[#allocation3 + $0x6c] sm:$0xf] %vm199_vm0, %v2003_v21  ;;  %v1801_v58 = vadd.f32 %v1751_v33, %v1608_v22  ;;  %2403 = vrot.lane.b32.xlu0 %v6207_v55, %s4912_s21  ;;  %v1480_v21 = vrot.slane %v1000_v41, 7  ;;  %v1003_v20 = vpop.f32.mrf.mxu0 }
 0x2e7   : > { %2120 = vst.msk [vmem:[#allocation3 + $0x6c] sm:$0xf] %vm199_vm0, %v7311_v9  ;;  %4363 = vmatmul.msk.bf16.gmra.mxu2 %vm855_vm4, %v5343_v13  ;;  %v2388_v13 = vpop.permute.xlu2 %2387 }
 0x2e8   : > { %v1867_v52 = vadd.f32 %v5877_v15, %v1801_v58  ;;  %v2529_v2 = vsel %vm686_vm2, %v5922_v38, %v2388_v13 }
 0x2ea   : > { %v1931_v53 = vmax.f32 %v1867_v52, 0.0  ;;  %v1358_v24 = vpop.f32.mrf.mxu2  ;;  %v1556_v52 = vsel %vm1519_vm5, %v1479_v25, %v1480_v21 }
 0x2eb   : > { %v1674_v56 = vrot.slane %v1358_v24, 1  ;;  %v2390_v24 = vpop.permute.xlu1 %2389 }
 0x2ec   : > { %v2004_v48 = vpack.c.bf16 %v1931_v53, %v1931_v53 }
 0x2ed   : > { %v1750_v51 = vsel %vm1712_vm6, %v1673_v26, %v1674_v56 }
 0x2ee   : > { %2069 = vst.msk [vmem:[#allocation3 + $0x70] sm:$0xf] %vm199_vm0, %v2004_v48  ;;  %v1802_v42 = vadd.f32 %v1750_v51, %v1609_v47  ;;  %v6237_v23 = vld [vmem:[#allocation3 + $0x68] sm:$0xff]  ;;  %v1481_v47 = vrot.slane %v1003_v20, 7  ;;  %v1183_v48 = vpop.f32.mrf.mxu1 }
 0x2ef   : > { %2475 = vrot.lane.b32.xlu2 %v6237_v23, %s4913_s22  ;;  %v2464_v25 = vpop.permute.xlu2 %2463 }
 0x2f0   : > { %v1868_v63 = vadd.f32 %v5877_v15, %v1802_v42  ;;  %v2462_v28 = vpop.permute.xlu0 %2461  ;;  %v2532_v42 = vsel %vm686_vm2, %v5962_v44, %v2390_v24  ;;  %v1555_v14 = vsel %vm1519_vm5, %v1480_v21, %v1481_v47 }
 0x2f1   : > { %v2622_v37 = vsel %vm783_vm3, %v2529_v2, %v2462_v28  ;;  %v2624_v28 = vsel %vm783_vm3, %v2532_v42, %v2464_v25 }
 0x2f2   : > { %v1932_v7 = vmax.f32 %v1868_v63, 0.0  ;;  %v1360_v1 = vpop.f32.mrf.mxu2  ;;  %v1005_v63 = vpop.f32.mrf.mxu0 }
 0x2f3   : > { %v1675_v26 = vrot.slane %v1360_v1, 1  ;;  %4524 = vmatmul.msk.bf16.gmra.mxu3 %vm855_vm4, %v2622_v37  ;;  %4562 = vmatmul.msk.bf16.gmra.mxu0 %vm855_vm4, %v2622_v37 }
 0x2f4   : > { %v2005_v22 = vpack.c.bf16 %v1932_v7, %v1932_v7  ;;  %4600 = vmatmul.msk.bf16.gmra.mxu1 %vm855_vm4, %v2622_v37 }
 0x2f5   : > { %v1749_v38 = vsel %vm1712_vm6, %v1674_v56, %v1675_v26  ;;  %v1611_v56 = vadd.f32 %v1556_v52, %v1180_v31  ;;  %v1612_v31 = vadd.f32 %v1555_v14, %v1183_v48 }
 0x2f6   : > { %2070 = vst.msk [vmem:[#allocation3 + $0x74] sm:$0xf] %vm199_vm0, %v2005_v22  ;;  %v1803_v33 = vadd.f32 %v1749_v38, %v1610_v30  ;;  %v1185_v21 = vpop.f32.mrf.mxu1 }
 0x2f7   : > { %4364 = vmatmul.msk.bf16.gmra.mxu2 %vm855_vm4, %v5380_v39  ;;  %2405 = vrot.lane.b32.xlu2 %v6237_v23, %s4912_s21 }
 0x2f8   : > { %v1869_v58 = vadd.f32 %v5877_v15, %v1803_v33 }
 0x2fa   : > { %v1933_v34 = vmax.f32 %v1869_v58, 0.0  ;;  %v1363_v0 = vpop.f32.mrf.mxu2  ;;  %v1008_v33 = vpop.f32.mrf.mxu0 }
 0x2fb   : > { %v1676_v53 = vrot.slane %v1363_v0, 1  ;;  %v1483_v24 = vrot.slane %v1008_v33, 7 }
 0x2fc   : > { %v2006_v41 = vpack.c.bf16 %v1933_v34, %v1933_v34 }
 0x2fd   : > { %v1748_v51 = vsel %vm1712_vm6, %v1675_v26, %v1676_v53  ;;  %v6262_v39 = vld [vmem:[#allocation3 + $0x70] sm:$0xff]  ;;  %v1482_v26 = vrot.slane %v1005_v63, 7 }
 0x2fe   : > { %2071 = vst.msk [vmem:[#allocation3 + $0x78] sm:$0xf] %vm199_vm0, %v2006_v41  ;;  %v1804_v13 = vadd.f32 %v1748_v51, %v1611_v56  ;;  %2477 = vrot.lane.b32.xlu1 %v6262_v39, %s4913_s22  ;;  %v2392_v41 = vpop.permute.xlu0 %2391 }
 0x2ff   : > { %2121 = vst.msk [vmem:[#allocation3 + $0x78] sm:$0xf] %vm199_vm0, %v7311_v9  ;;  %v1554_v20 = vsel %vm1519_vm5, %v1481_v47, %v1482_v26  ;;  %v1188_v47 = vpop.f32.mrf.mxu1  ;;  %v2535_v42 = vsel %vm686_vm2, %v5974_v62, %v2392_v41 }
 0x300   : > { %v1870_v2 = vadd.f32 %v5877_v15, %v1804_v13  ;;  %v1613_v0 = vadd.f32 %v1554_v20, %v1185_v21  ;;  %v1553_v13 = vsel %vm1519_vm5, %v1482_v26, %v1483_v24 }
 0x302   : > { %v1934_v7 = vmax.f32 %v1870_v2, 0.0  ;;  %v1365_v1 = vpop.f32.mrf.mxu2 }
 0x303   : > { %v1677_v37 = vrot.slane %v1365_v1, 1  ;;  %4525 = vmatmul.msk.bf16.gmra.mxu3 %vm855_vm4, %v2624_v28  ;;  %4563 = vmatmul.msk.bf16.gmra.mxu0 %vm855_vm4, %v2624_v28  ;;  %v1614_v1 = vadd.f32 %v1553_v13, %v1188_v47 }
 0x304   : > { %v2007_v44 = vpack.c.bf16 %v1934_v7, %v1934_v7  ;;  %4601 = vmatmul.msk.bf16.gmra.mxu1 %vm855_vm4, %v2624_v28  ;;  %v1010_v7 = vpop.f32.mrf.mxu0 }
 0x305   : > { %v1747_v30 = vsel %vm1712_vm6, %v1676_v53, %v1677_v37 }
 0x306   : > { %2072 = vst.msk [vmem:[#allocation3 + $0x7c] sm:$0xf] %vm199_vm0, %v2007_v44  ;;  %v1805_v22 = vadd.f32 %v1747_v30, %v1612_v31  ;;  %2407 = vrot.lane.b32.xlu1 %v6262_v39, %s4912_s21  ;;  %v1484_v44 = vrot.slane %v1010_v7, 7 }
 0x307   : > { %2122 = vst.msk [vmem:[#allocation3 + $0x7c] sm:$0xf] %vm199_vm0, %v7311_v9  ;;  %4365 = vmatmul.msk.bf16.gmra.mxu2 %vm855_vm4, %v5404_v61  ;;  %v1190_v30 = vpop.f32.mrf.mxu1 }
 0x308   : > { %v1871_v38 = vadd.f32 %v5877_v15, %v1805_v22  ;;  %v1552_v22 = vsel %vm1519_vm5, %v1483_v24, %v1484_v44 }
 0x309   : > { %v1615_v33 = vadd.f32 %v1552_v22, %v1190_v30 }
 0x30a   : > { %v1935_v58 = vmax.f32 %v1871_v38, 0.0  ;;  %v1368_v52 = vpop.f32.mrf.mxu2 }
 0x30b   : > { %v1678_v34 = vrot.slane %v1368_v52, 1 }
 0x30c   : > { %v2008_v53 = vpack.c.bf16 %v1935_v58, %v1935_v58 }
 0x30d   : > { %v1746_v56 = vsel %vm1712_vm6, %v1677_v37, %v1678_v34 }
 0x30e   : > { %2073 = vst.msk [vmem:[#allocation3 + $0x80] sm:$0xf] %vm199_vm0, %v2008_v53  ;;  %v1806_v61 = vadd.f32 %v1746_v56, %v1613_v0  ;;  %v6293_v48 = vld [vmem:[#allocation3 + $0x78] sm:$0xff]  ;;  %v2394_v0 = vpop.permute.xlu2 %2393  ;;  %v7313_v56 = vrot.slane %v5447_v18, 7 }
 0x30f   : > { %2479 = vrot.lane.b32.xlu0 %v6293_v48, %s4913_s22  ;;  %v2538_v53 = vsel %vm686_vm2, %v6013_v45, %v2394_v0 }
 0x310   : > { %v1872_v51 = vadd.f32 %v5877_v15, %v1806_v61  ;;  %v2466_v25 = vpop.permute.xlu1 %2465  ;;  %v1551_v41 = vsel %vm1519_vm5, %v1484_v44, %v7313_v56 }
 0x311   : > { %v2626_v14 = vsel %vm783_vm3, %v2535_v42, %v2466_v25  ;;  %v1616_v25 = vadd.f32 %v1551_v41, %v5449_v59  ;;  %v6345_v59 = vld [vmem:[%s7267_s3] ss:$0 sm:$0xff] }
 0x312   : > { %v1936_v63 = vmax.f32 %v1872_v51, 0.0  ;;  %v1370_v2 = vpop.f32.mrf.mxu2 }
 0x313   : > { %v1679_v28 = vrot.slane %v1370_v2, 1  ;;  %4526 = vmatmul.msk.bf16.gmra.mxu3 %vm855_vm4, %v2626_v14  ;;  %4564 = vmatmul.msk.bf16.gmra.mxu0 %vm855_vm4, %v2626_v14 }
 0x314   : > { %v2009_v37 = vpack.c.bf16 %v1936_v63, %v1936_v63  ;;  %4602 = vmatmul.msk.bf16.gmra.mxu1 %vm855_vm4, %v2626_v14 }
 0x315   : > { %v1745_v31 = vsel %vm1712_vm6, %v1678_v34, %v1679_v28 }
 0x316   : > { %2074 = vst.msk [vmem:[#allocation3 + $0x84] sm:$0xf] %vm199_vm0, %v2009_v37  ;;  %v1807_v62 = vadd.f32 %v1745_v31, %v1614_v1 }
 0x317   : > { %4366 = vmatmul.msk.bf16.gmra.mxu2 %vm855_vm4, %v5431_v4  ;;  %2409 = vrot.lane.b32.xlu0 %v6293_v48, %s4912_s21 }
 0x318   : > { %v1873_v26 = vadd.f32 %v5877_v15, %v1807_v62  ;;  %v2396_v1 = vpop.permute.xlu1 %2395  ;;  %v2470_v44 = vpop.permute.xlu2 %2469 }
 0x319   : > { %v2541_v62 = vsel %vm686_vm2, %v6042_v50, %v2396_v1 }
 0x31a   : > { %v1937_v21 = vmax.f32 %v1873_v26, 0.0  ;;  %v1373_v38 = vpop.f32.mrf.mxu2 }
 0x31b   : > { %v1680_v20 = vrot.slane %v1373_v38, 1 }
 0x31c   : > { %v2010_v58 = vpack.c.bf16 %v1937_v21, %v1937_v21  ;;  %v2630_v21 = vsel %vm783_vm3, %v2541_v62, %v2470_v44 }
 0x31d   : > { %v1744_v52 = vsel %vm1712_vm6, %v1679_v28, %v1680_v20  ;;  %v4689_v34 = vld [vmem:[#allocation3 + $0x80] sm:$0xff] }
 0x31e   : > { %2075 = vst.msk [vmem:[#allocation3 + $0x88] sm:$0xf] %vm199_vm0, %v2010_v58  ;;  %v1808_v4 = vadd.f32 %v1744_v52, %v1615_v33  ;;  %2481 = vrot.lane.b32.xlu2 %v4689_v34, %s4913_s22 }
 0x31f   : > { %2123 = vst.msk [vmem:[#allocation3 + $0x88] sm:$0xf] %vm199_vm0, %v7311_v9 }
 0x320   : > { %v1874_v24 = vadd.f32 %v5877_v15, %v1808_v4 }
 0x321   : > { %v2468_v47 = vpop.permute.xlu0 %2467 }
 0x322   : > { %v1938_v61 = vmax.f32 %v1874_v24, 0.0  ;;  %v1375_v51 = vpop.f32.mrf.mxu2  ;;  %v2628_v42 = vsel %vm783_vm3, %v2538_v53, %v2468_v47 }
 0x323   : > { %v1681_v13 = vrot.slane %v1375_v51, 1  ;;  %4527 = vmatmul.msk.bf16.gmra.mxu3 %vm855_vm4, %v2628_v42  ;;  %4565 = vmatmul.msk.bf16.gmra.mxu0 %vm855_vm4, %v2628_v42 }
 0x324   : > { %v2011_v63 = vpack.c.bf16 %v1938_v61, %v1938_v61  ;;  %4603 = vmatmul.msk.bf16.gmra.mxu1 %vm855_vm4, %v2628_v42 }
 0x325   : > { %v1743_v15 = vsel %vm1712_vm6, %v1680_v20, %v1681_v13 }
 0x326   : > { %2076 = vst.msk [vmem:[#allocation3 + $0x8c] sm:$0xf] %vm199_vm0, %v2011_v63  ;;  %v1809_v18 = vadd.f32 %v1743_v15, %v1616_v25  ;;  %2411 = vrot.lane.b32.xlu2 %v4689_v34, %s4912_s21 }
 0x327   : > { %2124 = vst.msk [vmem:[#allocation3 + $0x8c] sm:$0xf] %vm199_vm0, %v7311_v9  ;;  %4367 = vmatmul.msk.bf16.gmra.mxu2 %vm855_vm4, %v5457_v29 }
 0x328   : > { %v1875_v45 = vadd.f32 %v6345_v59, %v1809_v18 }
 0x329   : > { %v2398_v56 = vpop.permute.xlu0 %2397 }
 0x32a   : > { %v1939_v2 = vmax.f32 %v1875_v45, 0.0  ;;  %v1378_v14 = vpop.f32.mrf.mxu2  ;;  %v2544_v41 = vsel %vm686_vm2, %v6073_v57, %v2398_v56 }
 0x32b   : > { %v1682_v28 = vrot.slane %v1378_v14, 1 }
 0x32c   : > { %v2012_v7 = vpack.c.bf16 %v1939_v2, %v1939_v2  ;;  %v6405_v2 = vpop.f32.mrf.mxu3 }
 0x32d   : > { %v1742_v37 = vsel %vm1712_vm6, %v1681_v13, %v1682_v28 }
 0x32e   : > { %2077 = vst.msk [vmem:[#allocation3 + $0x90] sm:$0xf] %vm199_vm0, %v2012_v7  ;;  %v1810_v29 = vadd.f32 %v1742_v37, %v5477_v43  ;;  %v4690_v31 = vld [vmem:[#allocation3 + $0x88] sm:$0xff] }
 0x32f   : > { %2483 = vrot.lane.b32.xlu1 %v4690_v31, %s4913_s22 }
 0x330   : > { %v1876_v26 = vadd.f32 %v6345_v59, %v1810_v29 }
 0x332   : > { %v1940_v30 = vmax.f32 %v1876_v26, 0.0  ;;  %v1380_v22 = vpop.f32.mrf.mxu2 }
 0x333   : > { %v1683_v38 = vrot.slane %v1380_v22, 1  ;;  %4528 = vmatmul.msk.bf16.gmra.mxu3 %vm855_vm4, %v2630_v21  ;;  %4566 = vmatmul.msk.bf16.gmra.mxu0 %vm855_vm4, %v2630_v21 }
 0x334   : > { %v2013_v20 = vpack.c.bf16 %v1940_v30, %v1940_v30  ;;  %4604 = vmatmul.msk.bf16.gmra.mxu1 %vm855_vm4, %v2630_v21 }
 0x335   : > { %v1741_v43 = vsel %vm1712_vm6, %v1682_v28, %v1683_v38 }
 0x336   : > { %2078 = vst.msk [vmem:[#allocation3 + $0x94] sm:$0xf] %vm199_vm0, %v2013_v20  ;;  %v1811_v50 = vadd.f32 %v1741_v43, %v5496_v60 }
 0x337   : > { %4368 = vmatmul.msk.bf16.gmra.mxu2 %vm855_vm4, %v5505_v5  ;;  %2413 = vrot.lane.b32.xlu1 %v4690_v31, %s4912_s21  ;;  %v6412_v62 = vpop.f32.mrf.mxu0 }
 0x338   : > { %v1877_v33 = vadd.f32 %v6345_v59, %v1811_v50  ;;  %v6368_v58 = vpop.f32.mrf.mxu1 }
 0x339   : > { %v3476_v51 = vrot.slane %v6368_v58, 1 }
 0x33a   : > { %v1941_v52 = vmax.f32 %v1877_v33, 0.0  ;;  %v1383_v34 = vpop.f32.mrf.mxu2 }
 0x33b   : > { %v1684_v4 = vrot.slane %v1383_v34, 1 }
 0x33c   : > { %v2014_v0 = vpack.c.bf16 %v1941_v52, %v1941_v52 }
 0x33d   : > { %v1740_v53 = vsel %vm1712_vm6, %v1683_v38, %v1684_v4  ;;  %v4691_v24 = vld [vmem:[#allocation3 + $0x90] sm:$0xff]  ;;  %v6414_v44 = vpop.f32.mrf.mxu3 }
 0x33e   : > { %2079 = vst.msk [vmem:[#allocation3 + $0x98] sm:$0xf] %vm199_vm0, %v2014_v0  ;;  %v1812_v60 = vadd.f32 %v1740_v53, %v5511_v36  ;;  %2485 = vrot.lane.b32.xlu0 %v4691_v24, %s4913_s22 }
 0x33f   : > { %2125 = vst.msk [vmem:[#allocation3 + $0x98] sm:$0xf] %vm199_vm0, %v7311_v9  ;;  %v2946_v52 = vpop.f32.mrf.mxu0 }
 0x340   : > { %v1878_v5 = vadd.f32 %v6345_v59, %v1812_v60  ;;  %v6380_v61 = vpop.f32.mrf.mxu1 }
 0x341   : > { %v3477_v13 = vrot.slane %v6380_v61, 1  ;;  %v2472_v25 = vpop.permute.xlu1 %2471 }
 0x342   : > { %v1942_v47 = vmax.f32 %v1878_v5, 0.0  ;;  %v1385_v42 = vpop.f32.mrf.mxu2  ;;  %v2632_v63 = vsel %vm783_vm3, %v2544_v41, %v2472_v25 }
 0x343   : > { %v1685_v36 = vrot.slane %v1385_v42, 1  ;;  %v6391_v57 = vsel %vm1712_vm6, %v3476_v51, %v3477_v13  ;;  %4529 = vmatmul.msk.bf16.gmra.mxu3 %vm855_vm4, %v2632_v63  ;;  %4567 = vmatmul.msk.bf16.gmra.mxu0 %vm855_vm4, %v2632_v63  ;;  %v3284_v42 = vrot.slane %v6414_v44, 7 }
 0x344   : > { %v2015_v15 = vpack.c.bf16 %v1942_v47, %v1942_v47  ;;  %4605 = vmatmul.msk.bf16.gmra.mxu1 %vm855_vm4, %v2632_v63 }
 0x345   : > { %v1739_v18 = vsel %vm1712_vm6, %v1684_v4, %v1685_v36  ;;  %v2766_v34 = vpop.f32.mrf.mxu3 }
 0x346   : > { %2080 = vst.msk [vmem:[#allocation3 + $0x9c] sm:$0xf] %vm199_vm0, %v2015_v15  ;;  %v1813_v45 = vadd.f32 %v1739_v18, %v5528_v19  ;;  %2415 = vrot.lane.b32.xlu0 %v4691_v24, %s4912_s21  ;;  %v2400_v19 = vpop.permute.xlu2 %2399  ;;  %v3285_v60 = vrot.slane %v2766_v34, 7 }
 0x347   : > { %2126 = vst.msk [vmem:[#allocation3 + $0x9c] sm:$0xf] %vm199_vm0, %v7311_v9  ;;  %4369 = vmatmul.msk.bf16.gmra.mxu2 %vm855_vm4, %v5535_v3  ;;  %v2547_v30 = vsel %vm686_vm2, %v6099_v10, %v2400_v19 }
 0x348   : > { %v1879_v14 = vadd.f32 %v6345_v59, %v1813_v45 }
 0x349   : > { %v2402_v24 = vpop.permute.xlu1 %2401 }
 0x34a   : > { %v1943_v28 = vmax.f32 %v1879_v14, 0.0  ;;  %v1388_v7 = vpop.f32.mrf.mxu2 }
 0x34b   : > { %v1686_v1 = vrot.slane %v1388_v7, 1 }
 0x34c   : > { %v2016_v37 = vpack.c.bf16 %v1943_v28, %v1943_v28  ;;  %v4713_v28 = vld [vmem:[#allocation2 + $0x10] sm:$0xff]  }
 0x34d   : > { %v1738_v29 = vsel %vm1712_vm6, %v1685_v36, %v1686_v1  ;;  %v3410_v36 = vsel %vm1519_vm5, %v3284_v42, %v3285_v60 }
 0x34e   : > { %2081 = vst.msk [vmem:[#allocation3 + $0xa0] sm:$0xf] %vm199_vm0, %v2016_v37  ;;  %v1814_v31 = vadd.f32 %v1738_v29, %v5541_v8  ;;  %v4692_v3 = vld [vmem:[#allocation3 + $0x98] sm:$0xff]  ;;  %v2476_v47 = vpop.permute.xlu2 %2475  ;;  %v3413_v7 = vadd.f32 %v3410_v36, %v2946_v52  ;;  %v6451_v37 = vld [vmem:[%s7267_s3 + $0x1] ss:$0 sm:$0xff]  ;;  %v1625_v52 = vadd.f32 %v5583_v16, %v5579_v11 }
 0x34f   : > { %2487 = vrot.lane.b32.xlu2 %v4692_v3, %s4913_s22 }
 0x350   : > { %v1880_v26 = vadd.f32 %v6345_v59, %v1814_v31  ;;  %v2474_v22 = vpop.permute.xlu0 %2473 }
 0x351   : > { %v2634_v20 = vsel %vm783_vm3, %v2547_v30, %v2474_v22 }
 0x352   : > { %v1944_v21 = vmax.f32 %v1880_v26, 0.0  ;;  %v1390_v38 = vpop.f32.mrf.mxu2  ;;  %v4715_v26 = vunpack.c.h.bf16 %v4713_v28 }
 0x353   : > { %v1687_v43 = vrot.slane %v1390_v38, 1  ;;  %4530 = vmatmul.msk.bf16.gmra.mxu3 %vm855_vm4, %v2634_v20  ;;  %4568 = vmatmul.msk.bf16.gmra.mxu0 %vm855_vm4, %v2634_v20 }
 0x354   : > { %v2017_v50 = vpack.c.bf16 %v1944_v21, %v1944_v21  ;;  %4606 = vmatmul.msk.bf16.gmra.mxu1 %vm855_vm4, %v2634_v20 }
 0x355   : > { %v1737_v8 = vsel %vm1712_vm6, %v1686_v1, %v1687_v43 }
 0x356   : > { %2082 = vst.msk [vmem:[#allocation3 + $0xa4] sm:$0xf] %vm199_vm0, %v2017_v50  ;;  %v1815_v10 = vadd.f32 %v1737_v8, %v5556_v27  ;;  %v2550_v27 = vsel %vm686_vm2, %v6128_v40, %v2402_v24 }
 0x357   : > { %4370 = vmatmul.msk.bf16.gmra.mxu2 %vm855_vm4, %v5340_v12  ;;  %2417 = vrot.lane.b32.xlu2 %v4692_v3, %s4912_s21 }
 0x358   : > { %v1881_v33 = vadd.f32 %v6345_v59, %v1815_v10  ;;  %v2404_v24 = vpop.permute.xlu0 %2403 }
 0x35a   : > { %v1945_v4 = vmax.f32 %v1881_v33, 0.0  ;;  %v1393_v0 = vpop.f32.mrf.mxu2  ;;  %v4840_v33 = vld [vmem:[#allocation2 + $0x18] sm:$0xff]  }
 0x35b   : > { %v1688_v53 = vrot.slane %v1393_v0, 1  ;;  %v4718_v11 = vunpack.c.l.bf16 %v4840_v33 }
 0x35c   : > { %v2018_v56 = vpack.c.bf16 %v1945_v4, %v1945_v4 }
 0x35d   : > { %v1736_v5 = vsel %vm1712_vm6, %v1687_v43, %v1688_v53  ;;  %v4693_v41 = vld [vmem:[#allocation3 + $0xa0] sm:$0xff] }
 0x35e   : > { %2083 = vst.msk [vmem:[#allocation3 + $0xa8] sm:$0xf] %vm199_vm0, %v2018_v56  ;;  %v1816_v12 = vadd.f32 %v1736_v5, %v5562_v6  ;;  %2489 = vrot.lane.b32.xlu1 %v4693_v41, %s4913_s22  ;;  %v2636_v6 = vsel %vm783_vm3, %v2550_v27, %v2476_v47  ;;  %v2553_v47 = vsel %vm686_vm2, %v6158_v46, %v2404_v24 }
 0x35f   : > { %2127 = vst.msk [vmem:[#allocation3 + $0xa8] sm:$0xf] %vm199_vm0, %v7311_v9 }
 0x360   : > { %v1882_v25 = vadd.f32 %v6345_v59, %v1816_v12  ;;  %v2949_v63 = vpop.f32.mrf.mxu0 }
 0x361   : > { %v3129_v18 = vpop.f32.mrf.mxu1 }
 0x362   : > { %v1946_v15 = vmax.f32 %v1882_v25, 0.0  ;;  %v1395_v40 = vpop.f32.mrf.mxu2  ;;  %v3478_v14 = vrot.slane %v3129_v18, 1 }
 0x363   : > { %v1689_v45 = vrot.slane %v1395_v40, 1  ;;  %4531 = vmatmul.msk.bf16.gmra.mxu3 %vm855_vm4, %v2636_v6  ;;  %4569 = vmatmul.msk.bf16.gmra.mxu0 %vm855_vm4, %v2636_v6 }
 0x364   : > { %v2019_v1 = vpack.c.bf16 %v1946_v15, %v1946_v15  ;;  %v3601_v19 = vsel %vm1712_vm6, %v3477_v13, %v3478_v14  ;;  %4607 = vmatmul.msk.bf16.gmra.mxu1 %vm855_vm4, %v2636_v6 }
 0x365   : > { %v1735_v29 = vsel %vm1712_vm6, %v1688_v53, %v1689_v45  ;;  %v3605_v3 = vadd.f32 %v3601_v19, %v3413_v7 }
 0x366   : > { %2084 = vst.msk [vmem:[#allocation3 + $0xac] sm:$0xf] %vm199_vm0, %v2019_v1  ;;  %v1817_v31 = vadd.f32 %v1735_v29, %v5577_v54  ;;  %v2769_v30 = vpop.f32.mrf.mxu3  ;;  %2419 = vrot.lane.b32.xlu1 %v4693_v41, %s4912_s21 }
 0x367   : > { %2128 = vst.msk [vmem:[#allocation3 + $0xac] sm:$0xf] %vm199_vm0, %v7311_v9  ;;  %4371 = vmatmul.msk.bf16.gmra.mxu2 %vm855_vm4, %v5358_v17  ;;  %v3735_v13 = vadd.f32 %v6451_v37, %v3605_v3  ;;  %v3286_v22 = vrot.slane %v2769_v30, 7  ;;  %v7314_v30 = vld [vmem:[#allocation6_spill] sm:$0xff] }
 0x368   : > { %v1883_v61 = vadd.f32 %v6345_v59, %v1817_v31  ;;  %v2951_v21 = vpop.f32.mrf.mxu0 }
 0x369   : > { %v3863_v54 = vadd.f32 %v4715_v26, %v3735_v13  ;;  %v3409_v20 = vsel %vm1519_vm5, %v3285_v60, %v3286_v22  ;;  %v3131_v50 = vpop.f32.mrf.mxu1  ;;  %v4719_v26 = vunpack.c.h.bf16 %v4840_v33 }
 0x36a   : > { %v1947_v38 = vmax.f32 %v1883_v61, 0.0  ;;  %v1398_v43 = vpop.f32.mrf.mxu2  ;;  %v3414_v8 = vadd.f32 %v3409_v20, %v2949_v63  ;;  %v3479_v17 = vrot.slane %v3131_v50, 1 }
 0x36b   : > { %v1690_v10 = vrot.slane %v1398_v43, 1  ;;  %v3927_v4 = vmax.f32 %v3863_v54, 0.0 }
 0x36c   : > { %v2020_v34 = vpack.c.bf16 %v1947_v38, %v1947_v38  ;;  %v3600_v53 = vsel %vm1712_vm6, %v3478_v14, %v3479_v17 }
 0x36d   : > { %v1734_v0 = vsel %vm1712_vm6, %v1689_v45, %v1690_v10  ;;  %v3606_v60 = vadd.f32 %v3600_v53, %v3414_v8  ;;  %3991 = vst.msk [vmem:[%s6479_s16 + $0x8] sm:$0xff] %vm686_vm2, %v3927_v4 }
 0x36e   : > { %2085 = vst.msk [vmem:[#allocation3 + $0xb0] sm:$0xf] %vm199_vm0, %v2020_v34  ;;  %v1818_v56 = vadd.f32 %v1734_v0, %v1625_v52  ;;  %v4694_v16 = vld [vmem:[#allocation3 + $0xa8] sm:$0xff]  ;;  %v2771_v5 = vpop.f32.mrf.mxu3  ;;  %v7316_v34 = vld [vmem:[#allocation7_spill] sm:$0xff] }
 0x36f   : > { %v3736_v12 = vadd.f32 %v6451_v37, %v3606_v60  ;;  %v3287_v27 = vrot.slane %v2771_v5, 7  ;;  %2491 = vrot.lane.b32.xlu0 %v4694_v16, %s4913_s22  ;;  %v7315_v52 = vld [vmem:[#allocation5_spill] sm:$0xff] }
 0x370   : > { %v1884_v41 = vadd.f32 %v6345_v59, %v1818_v56  ;;  %v2478_v25 = vpop.permute.xlu1 %2477  ;;  %v2954_v36 = vpop.f32.mrf.mxu0  ;;  %v1627_v4 = vadd.f32 %v7316_v34, %v7315_v52  ;;  %v4842_v34 = vld [vmem:[#allocation2 + $0x28] sm:$0xff]  }
 0x371   : > { %v3864_v6 = vadd.f32 %v4718_v11, %v3736_v12  ;;  %v3408_v15 = vsel %vm1519_vm5, %v3286_v22, %v3287_v27  ;;  %v3134_v18 = vpop.f32.mrf.mxu1  ;;  %v2638_v45 = vsel %vm783_vm3, %v2553_v47, %v2478_v25  ;;  %v2406_v12 = vpop.permute.xlu2 %2405 }
 0x372   : > { %v1948_v63 = vmax.f32 %v1884_v41, 0.0  ;;  %v1400_v40 = vpop.f32.mrf.mxu2  ;;  %v3415_v14 = vadd.f32 %v3408_v15, %v2951_v21  ;;  %v3480_v7 = vrot.slane %v3134_v18, 1 }
 0x373   : > { %v1691_v28 = vrot.slane %v1400_v40, 1  ;;  %v3928_v29 = vmax.f32 %v3864_v6, 0.0  ;;  %4532 = vmatmul.msk.bf16.gmra.mxu3 %vm855_vm4, %v2638_v45  ;;  %4570 = vmatmul.msk.bf16.gmra.mxu0 %vm855_vm4, %v2638_v45 }
 0x374   : > { %v2021_v1 = vpack.c.bf16 %v1948_v63, %v1948_v63  ;;  %v3599_v19 = vsel %vm1712_vm6, %v3479_v17, %v3480_v7  ;;  %4608 = vmatmul.msk.bf16.gmra.mxu1 %vm855_vm4, %v2638_v45  ;;  %v4841_v17 = vld [vmem:[#allocation2 + $0x20] sm:$0xff]  }
 0x375   : > { %v1733_v46 = vsel %vm1712_vm6, %v1690_v10, %v1691_v28  ;;  %v3607_v3 = vadd.f32 %v3599_v19, %v3415_v14  ;;  %3992 = vst.msk [vmem:[%s6479_s16 + $0x10] sm:$0xff] %vm686_vm2, %v3928_v29  ;;  %v4722_v5 = vunpack.c.l.bf16 %v4841_v17 }
 0x376   : > { %2086 = vst.msk [vmem:[#allocation3 + $0xb4] sm:$0xf] %vm199_vm0, %v2021_v1  ;;  %v1819_v31 = vadd.f32 %v1733_v46, %v5600_v49  ;;  %v2774_v61 = vpop.f32.mrf.mxu3 }
 0x377   : > { %4372 = vmatmul.msk.bf16.gmra.mxu2 %vm855_vm4, %v7314_v30  ;;  %v3737_v22 = vadd.f32 %v6451_v37, %v3607_v3  ;;  %v3288_v21 = vrot.slane %v2774_v61, 7  ;;  %2421 = vrot.lane.b32.xlu0 %v4694_v16, %s4912_s21  ;;  %v7317_v3 = vld [vmem:[#allocation8_spill] sm:$0xff]  ;;  %v4723_v61 = vunpack.c.h.bf16 %v4841_v17 }
 0x378   : > { %v1885_v13 = vadd.f32 %v6345_v59, %v1819_v31  ;;  %v2956_v33 = vpop.f32.mrf.mxu0 }
 0x379   : > { %v3865_v54 = vadd.f32 %v4719_v26, %v3737_v22  ;;  %v3407_v49 = vsel %vm1519_vm5, %v3287_v27, %v3288_v21  ;;  %v3136_v43 = vpop.f32.mrf.mxu1 }
 0x37a   : > { %v1949_v38 = vmax.f32 %v1885_v13, 0.0  ;;  %v1403_v20 = vpop.f32.mrf.mxu2  ;;  %v3416_v50 = vadd.f32 %v3407_v49, %v2954_v36  ;;  %v3481_v10 = vrot.slane %v3136_v43, 1  ;;  %v2556_v36 = vsel %vm686_vm2, %v6187_v35, %v2406_v12  ;;  %v7318_v13 = vld [vmem:[#allocation4_spill] sm:$0xff] }
 0x37b   : > { %v1692_v8 = vrot.slane %v1403_v20, 1  ;;  %v3929_v53 = vmax.f32 %v3865_v54, 0.0  ;;  %v4726_v12 = vunpack.c.l.bf16 %v4842_v34 }
 0x37c   : > { %v2022_v0 = vpack.c.bf16 %v1949_v38, %v1949_v38  ;;  %v3598_v56 = vsel %vm1712_vm6, %v3480_v7, %v3481_v10 }
 0x37d   : > { %v1732_v24 = vsel %vm1712_vm6, %v1691_v28, %v1692_v8  ;;  %v4695_v60 = vld [vmem:[#allocation3 + $0xb0] sm:$0xff]  ;;  %v3608_v16 = vadd.f32 %v3598_v56, %v3416_v50  ;;  %3993 = vst.msk [vmem:[%s6479_s16 + $0x18] sm:$0xff] %vm686_vm2, %v3929_v53 }
 0x37e   : > { %2087 = vst.msk [vmem:[#allocation3 + $0xb8] sm:$0xf] %vm199_vm0, %v2022_v0  ;;  %v1820_v11 = vadd.f32 %v1732_v24, %v1627_v4  ;;  %v2776_v41 = vpop.f32.mrf.mxu3  ;;  %2493 = vrot.lane.b32.xlu2 %v4695_v60, %s4913_s22  ;;  %v7319_v4 = vld [vmem:[#allocation9_spill] sm:$0xff]  ;;  %v7320_v0 = vld [vmem:[#allocation10_spill] sm:$0xff] }
 0x37f   : > { %2129 = vst.msk [vmem:[#allocation3 + $0xb8] sm:$0xf] %vm199_vm0, %v7311_v9  ;;  %v3738_v47 = vadd.f32 %v6451_v37, %v3608_v16  ;;  %v3289_v25 = vrot.slane %v2776_v41, 7  ;;  %v1629_v53 = vadd.f32 %v7320_v0, %v7319_v4  ;;  %v2408_v16 = vpop.permute.xlu1 %2407  ;;  %v7322_v4 = vld [vmem:[#allocation12_spill] sm:$0xff]  ;;  %v7323_v0 = vld [vmem:[#allocation13_spill] sm:$0xff] }
 0x380   : > { %v1886_v27 = vadd.f32 %v6345_v59, %v1820_v11  ;;  %v2959_v7 = vpop.f32.mrf.mxu0 }
 0x381   : > { %v3866_v6 = vadd.f32 %v4722_v5, %v3738_v47  ;;  %v3406_v15 = vsel %vm1519_vm5, %v3288_v21, %v3289_v25  ;;  %v3139_v18 = vpop.f32.mrf.mxu1  ;;  %v2480_v1 = vpop.permute.xlu0 %2479 }
 0x382   : > { %v1950_v63 = vmax.f32 %v1886_v27, 0.0  ;;  %v1405_v40 = vpop.f32.mrf.mxu2  ;;  %v3417_v45 = vadd.f32 %v3406_v15, %v2956_v33  ;;  %v3482_v28 = vrot.slane %v3139_v18, 1  ;;  %v2640_v19 = vsel %vm783_vm3, %v2556_v36, %v2480_v1  ;;  %v2482_v15 = vpop.permute.xlu2 %2481 }
 0x383   : > { %v1693_v14 = vrot.slane %v1405_v40, 1  ;;  %v3930_v46 = vmax.f32 %v3866_v6, 0.0  ;;  %4533 = vmatmul.msk.bf16.gmra.mxu3 %vm855_vm4, %v2640_v19  ;;  %4571 = vmatmul.msk.bf16.gmra.mxu0 %vm855_vm4, %v2640_v19  ;;  %v2559_v6 = vsel %vm686_vm2, %v6207_v55, %v2408_v16 }
 0x384   : > { %v2023_v29 = vpack.c.bf16 %v1950_v63, %v1950_v63  ;;  %v3597_v31 = vsel %vm1712_vm6, %v3481_v10, %v3482_v28  ;;  %4609 = vmatmul.msk.bf16.gmra.mxu1 %vm855_vm4, %v2640_v19  ;;  %v2642_v19 = vsel %vm783_vm3, %v2559_v6, %v2482_v15 }
 0x385   : > { %v1731_v35 = vsel %vm1712_vm6, %v1692_v8, %v1693_v14  ;;  %v3609_v30 = vadd.f32 %v3597_v31, %v3417_v45  ;;  %3994 = vst.msk [vmem:[%s6479_s16 + $0x20] sm:$0xff] %vm686_vm2, %v3930_v46 }
 0x386   : > { %2088 = vst.msk [vmem:[#allocation3 + $0xbc] sm:$0xf] %vm199_vm0, %v2023_v29  ;;  %v1821_v26 = vadd.f32 %v1731_v35, %v7317_v3  ;;  %v2779_v22 = vpop.f32.mrf.mxu3  ;;  %2423 = vrot.lane.b32.xlu2 %v4695_v60, %s4912_s21 }
 0x387   : > { %2130 = vst.msk [vmem:[#allocation3 + $0xbc] sm:$0xf] %vm199_vm0, %v7311_v9  ;;  %4373 = vmatmul.msk.bf16.gmra.mxu2 %vm855_vm4, %v7318_v13  ;;  %v3739_v38 = vadd.f32 %v6451_v37, %v3609_v30  ;;  %v3290_v54 = vrot.slane %v2779_v22, 7  ;;  %v4727_v13 = vunpack.c.h.bf16 %v4842_v34  ;;  %v4843_v34 = vld [vmem:[#allocation2 + $0x30] sm:$0xff]  }
 0x388   : > { %v1887_v21 = vadd.f32 %v6345_v59, %v1821_v26  ;;  %v2961_v33 = vpop.f32.mrf.mxu0  ;;  %v7321_v26 = vld [vmem:[#allocation11_spill] sm:$0xff] }
 0x389   : > { %v3867_v20 = vadd.f32 %v4723_v61, %v3739_v38  ;;  %v3405_v43 = vsel %vm1519_vm5, %v3289_v25, %v3290_v54  ;;  %v3141_v8 = vpop.f32.mrf.mxu1 }
 0x38a   : > { %v1951_v49 = vmax.f32 %v1887_v21, 0.0  ;;  %v1408_v50 = vpop.f32.mrf.mxu2  ;;  %v3418_v10 = vadd.f32 %v3405_v43, %v2959_v7  ;;  %v3483_v52 = vrot.slane %v3141_v8, 1 }
 0x38b   : > { %v1694_v17 = vrot.slane %v1408_v50, 1  ;;  %v3931_v56 = vmax.f32 %v3867_v20, 0.0 }
 0x38c   : > { %v2024_v24 = vpack.c.bf16 %v1951_v49, %v1951_v49  ;;  %v3596_v11 = vsel %vm1712_vm6, %v3482_v28, %v3483_v52 }
 0x38d   : > { %v1730_v60 = vsel %vm1712_vm6, %v1693_v14, %v1694_v17  ;;  %v3610_v41 = vadd.f32 %v3596_v11, %v3418_v10  ;;  %3995 = vst.msk [vmem:[%s6479_s16 + $0x28] sm:$0xff] %vm686_vm2, %v3931_v56 }
 0x38e   : > { %2089 = vst.msk [vmem:[#allocation3 + $0xc0] sm:$0xf] %vm199_vm0, %v2024_v24  ;;  %v1822_v5 = vadd.f32 %v1730_v60, %v1629_v53  ;;  %v4696_v27 = vld [vmem:[#allocation3 + $0xb8] sm:$0xff]  ;;  %v2781_v47 = vpop.f32.mrf.mxu3  ;;  %v1631_v53 = vadd.f32 %v7323_v0, %v7322_v4  ;;  %v7326_v4 = vld [vmem:[#allocation16_spill] sm:$0xff] }
 0x38f   : > { %v3740_v36 = vadd.f32 %v6451_v37, %v3610_v41  ;;  %v3291_v63 = vrot.slane %v2781_v47, 7  ;;  %2495 = vrot.lane.b32.xlu1 %v4696_v27, %s4913_s22 }
 0x390   : > { %v1888_v25 = vadd.f32 %v6345_v59, %v1822_v5  ;;  %v2964_v29 = vpop.f32.mrf.mxu0 }
 0x391   : > { %v3868_v18 = vadd.f32 %v4726_v12, %v3740_v36  ;;  %v3404_v45 = vsel %vm1519_vm5, %v3290_v54, %v3291_v63  ;;  %v3144_v28 = vpop.f32.mrf.mxu1  ;;  %v4730_v12 = vunpack.c.l.bf16 %v4843_v34 }
 0x392   : > { %v1952_v40 = vmax.f32 %v1888_v25, 0.0  ;;  %v1410_v14 = vpop.f32.mrf.mxu2  ;;  %v3419_v7 = vadd.f32 %v3404_v45, %v2961_v33  ;;  %v3484_v46 = vrot.slane %v3144_v28, 1 }
 0x393   : > { %v1695_v1 = vrot.slane %v1410_v14, 1  ;;  %v3932_v31 = vmax.f32 %v3868_v18, 0.0  ;;  %4534 = vmatmul.msk.bf16.gmra.mxu3 %vm855_vm4, %v2642_v19  ;;  %4572 = vmatmul.msk.bf16.gmra.mxu0 %vm855_vm4, %v2642_v19 }
 0x394   : > { %v2025_v35 = vpack.c.bf16 %v1952_v40, %v1952_v40  ;;  %v3595_v3 = vsel %vm1712_vm6, %v3483_v52, %v3484_v46  ;;  %4610 = vmatmul.msk.bf16.gmra.mxu1 %vm855_vm4, %v2642_v19 }
 0x395   : > { %v1729_v55 = vsel %vm1712_vm6, %v1694_v17, %v1695_v1  ;;  %v3611_v61 = vadd.f32 %v3595_v3, %v3419_v7  ;;  %3996 = vst.msk [vmem:[%s6479_s16 + $0x30] sm:$0xff] %vm686_vm2, %v3932_v31  ;;  %v7324_v3 = vld [vmem:[#allocation14_spill] sm:$0xff] }
 0x396   : > { %2090 = vst.msk [vmem:[#allocation3 + $0xc4] sm:$0xf] %vm199_vm0, %v2025_v35  ;;  %v1823_v30 = vadd.f32 %v1729_v55, %v7321_v26  ;;  %v2784_v22 = vpop.f32.mrf.mxu3 }
 0x397   : > { %v3741_v38 = vadd.f32 %v6451_v37, %v3611_v61  ;;  %v3292_v54 = vrot.slane %v2784_v22, 7  ;;  %2425 = vrot.lane.b32.xlu1 %v4696_v27, %s4912_s21  ;;  %v2410_v27 = vpop.permute.xlu0 %2409  ;;  %v4731_v61 = vunpack.c.h.bf16 %v4843_v34  ;;  %v7325_v34 = vld [vmem:[#allocation15_spill] sm:$0xff] }
 0x398   : > { %v1889_v21 = vadd.f32 %v6345_v59, %v1823_v30  ;;  %v2966_v33 = vpop.f32.mrf.mxu0  ;;  %v2562_v6 = vsel %vm686_vm2, %v6237_v23, %v2410_v27  ;;  %v1633_v0 = vadd.f32 %v7326_v4, %v7325_v34 }
 0x399   : > { %v3869_v20 = vadd.f32 %v4727_v13, %v3741_v38  ;;  %v3403_v43 = vsel %vm1519_vm5, %v3291_v63, %v3292_v54  ;;  %v3146_v8 = vpop.f32.mrf.mxu1 }
 0x39a   : > { %v1953_v49 = vmax.f32 %v1889_v21, 0.0  ;;  %v1413_v50 = vpop.f32.mrf.mxu2  ;;  %v3420_v10 = vadd.f32 %v3403_v43, %v2964_v29  ;;  %v3485_v52 = vrot.slane %v3146_v8, 1 }
 0x39b   : > { %v1696_v17 = vrot.slane %v1413_v50, 1  ;;  %v3933_v56 = vmax.f32 %v3869_v20, 0.0 }
 0x39c   : > { %v2026_v24 = vpack.c.bf16 %v1953_v49, %v1953_v49  ;;  %v3594_v11 = vsel %vm1712_vm6, %v3484_v46, %v3485_v52 }
 0x39d   : > { %v1728_v60 = vsel %vm1712_vm6, %v1695_v1, %v1696_v17  ;;  %v4697_v16 = vld [vmem:[#allocation3 + $0xc0] sm:$0xff]  ;;  %v3612_v41 = vadd.f32 %v3594_v11, %v3420_v10  ;;  %3997 = vst.msk [vmem:[%s6479_s16 + $0x38] sm:$0xff] %vm686_vm2, %v3933_v56  ;;  %v2412_v11 = vpop.permute.xlu2 %2411 }
 0x39e   : > { %2091 = vst.msk [vmem:[#allocation3 + $0xc8] sm:$0xf] %vm199_vm0, %v2026_v24  ;;  %v1824_v5 = vadd.f32 %v1728_v60, %v1631_v53  ;;  %v2786_v47 = vpop.f32.mrf.mxu3  ;;  %2497 = vrot.lane.b32.xlu0 %v4697_v16, %s4913_s22 }
 0x39f   : > { %2131 = vst.msk [vmem:[#allocation3 + $0xc8] sm:$0xf] %vm199_vm0, %v7311_v9  ;;  %v3742_v36 = vadd.f32 %v6451_v37, %v3612_v41  ;;  %v3293_v63 = vrot.slane %v2786_v47, 7 }
 0x3a0   : > { %v1890_v25 = vadd.f32 %v6345_v59, %v1824_v5  ;;  %v2969_v29 = vpop.f32.mrf.mxu0 }
 0x3a1   : > { %v3870_v40 = vadd.f32 %v4730_v12, %v3742_v36  ;;  %v3402_v18 = vsel %vm1519_vm5, %v3292_v54, %v3293_v63  ;;  %v3149_v14 = vpop.f32.mrf.mxu1  ;;  %v2484_v46 = vpop.permute.xlu1 %2483 }
 0x3a2   : > { %v1954_v15 = vmax.f32 %v1890_v25, 0.0  ;;  %v1415_v45 = vpop.f32.mrf.mxu2  ;;  %v3421_v28 = vadd.f32 %v3402_v18, %v2966_v33  ;;  %v3486_v1 = vrot.slane %v3149_v14, 1  ;;  %v2644_v31 = vsel %vm783_vm3, %v2562_v6, %v2484_v46 }
 0x3a3   : > { %v1697_v7 = vrot.slane %v1415_v45, 1  ;;  %v3934_v35 = vmax.f32 %v3870_v40, 0.0  ;;  %4535 = vmatmul.msk.bf16.gmra.mxu3 %vm855_vm4, %v2644_v31  ;;  %4573 = vmatmul.msk.bf16.gmra.mxu0 %vm855_vm4, %v2644_v31 }
 0x3a4   : > { %v2027_v19 = vpack.c.bf16 %v1954_v15, %v1954_v15  ;;  %v3593_v55 = vsel %vm1712_vm6, %v3485_v52, %v3486_v1  ;;  %4611 = vmatmul.msk.bf16.gmra.mxu1 %vm855_vm4, %v2644_v31  ;;  %v4844_v52 = vld [vmem:[#allocation2 + $0x38] sm:$0xff]  }
 0x3a5   : > { %v1727_v23 = vsel %vm1712_vm6, %v1696_v17, %v1697_v7  ;;  %v3613_v30 = vadd.f32 %v3593_v55, %v3421_v28  ;;  %3998 = vst.msk [vmem:[%s6479_s16 + $0x40] sm:$0xff] %vm686_vm2, %v3934_v35  ;;  %v4734_v41 = vunpack.c.l.bf16 %v4844_v52 }
 0x3a6   : > { %2092 = vst.msk [vmem:[#allocation3 + $0xcc] sm:$0xf] %vm199_vm0, %v2027_v19  ;;  %v1825_v26 = vadd.f32 %v1727_v23, %v7324_v3  ;;  %v2789_v13 = vpop.f32.mrf.mxu3  ;;  %2427 = vrot.lane.b32.xlu0 %v4697_v16, %s4912_s21  ;;  %v7327_v23 = vld [vmem:[#allocation17_spill] sm:$0xff] }
 0x3a7   : > { %2132 = vst.msk [vmem:[#allocation3 + $0xcc] sm:$0xf] %vm199_vm0, %v7311_v9  ;;  %v3743_v21 = vadd.f32 %v6451_v37, %v3613_v30  ;;  %v3294_v38 = vrot.slane %v2789_v13, 7 }
 0x3a8   : > { %v1891_v22 = vadd.f32 %v6345_v59, %v1825_v26  ;;  %v2971_v17 = vpop.f32.mrf.mxu0  ;;  %v4735_v26 = vunpack.c.h.bf16 %v4844_v52  ;;  %v7329_v52 = vld [vmem:[#allocation19_spill] sm:$0xff] }
 0x3a9   : > { %v3871_v49 = vadd.f32 %v4731_v61, %v3743_v21  ;;  %v3401_v20 = vsel %vm1519_vm5, %v3293_v63, %v3294_v38  ;;  %v3151_v50 = vpop.f32.mrf.mxu1  ;;  %v2565_v63 = vsel %vm686_vm2, %v6262_v39, %v2412_v11 }
 0x3aa   : > { %v1955_v54 = vmax.f32 %v1891_v22, 0.0  ;;  %v1418_v43 = vpop.f32.mrf.mxu2  ;;  %v3422_v8 = vadd.f32 %v3401_v20, %v2969_v29  ;;  %v3487_v33 = vrot.slane %v3151_v50, 1 }
 0x3ab   : > { %v1698_v10 = vrot.slane %v1418_v43, 1  ;;  %v3935_v24 = vmax.f32 %v3871_v49, 0.0 }
 0x3ac   : > { %v2028_v53 = vpack.c.bf16 %v1955_v54, %v1955_v54  ;;  %v3592_v60 = vsel %vm1712_vm6, %v3486_v1, %v3487_v33 }
 0x3ad   : > { %v1726_v56 = vsel %vm1712_vm6, %v1697_v7, %v1698_v10  ;;  %v3614_v5 = vadd.f32 %v3592_v60, %v3422_v8  ;;  %3999 = vst.msk [vmem:[%s6479_s16 + $0x48] sm:$0xff] %vm686_vm2, %v3935_v24 }
 0x3ae   : > { %2093 = vst.msk [vmem:[#allocation3 + $0xd0] sm:$0xf] %vm199_vm0, %v2028_v53  ;;  %v1826_v16 = vadd.f32 %v1726_v56, %v1633_v0  ;;  %v2791_v12 = vpop.f32.mrf.mxu3  ;;  %v4698_v27 = vld [vmem:[#allocation3 + $0xc8] sm:$0xff]  ;;  %v2414_v53 = vpop.permute.xlu1 %2413 }
 0x3af   : > { %v3744_v25 = vadd.f32 %v6451_v37, %v3614_v5  ;;  %v3295_v36 = vrot.slane %v2791_v12, 7  ;;  %2499 = vrot.lane.b32.xlu2 %v4698_v27, %s4913_s22  ;;  %v2568_v12 = vsel %vm686_vm2, %v6293_v48, %v2414_v53 }
 0x3b0   : > { %v1892_v47 = vadd.f32 %v6345_v59, %v1826_v16  ;;  %v2486_v6 = vpop.permute.xlu0 %2485  ;;  %v2974_v29 = vpop.f32.mrf.mxu0 }
 0x3b1   : > { %v3872_v40 = vadd.f32 %v4734_v41, %v3744_v25  ;;  %v3400_v18 = vsel %vm1519_vm5, %v3294_v38, %v3295_v36  ;;  %v3154_v14 = vpop.f32.mrf.mxu1  ;;  %v2646_v28 = vsel %vm783_vm3, %v2565_v63, %v2486_v6 }
 0x3b2   : > { %v1956_v15 = vmax.f32 %v1892_v47, 0.0  ;;  %v1420_v45 = vpop.f32.mrf.mxu2  ;;  %v3423_v7 = vadd.f32 %v3400_v18, %v2971_v17  ;;  %v3488_v46 = vrot.slane %v3154_v14, 1  ;;  %v4845_v17 = vld [vmem:[#allocation2 + $0x40] sm:$0xff]  }
 0x3b3   : > { %v1699_v1 = vrot.slane %v1420_v45, 1  ;;  %v3936_v35 = vmax.f32 %v3872_v40, 0.0  ;;  %4536 = vmatmul.msk.bf16.gmra.mxu3 %vm855_vm4, %v2646_v28  ;;  %4574 = vmatmul.msk.bf16.gmra.mxu0 %vm855_vm4, %v2646_v28  ;;  %v4738_v5 = vunpack.c.l.bf16 %v4845_v17 }
 0x3b4   : > { %v2029_v19 = vpack.c.bf16 %v1956_v15, %v1956_v15  ;;  %v3591_v31 = vsel %vm1712_vm6, %v3487_v33, %v3488_v46  ;;  %4612 = vmatmul.msk.bf16.gmra.mxu1 %vm855_vm4, %v2646_v28  ;;  %v7328_v33 = vld [vmem:[#allocation18_spill] sm:$0xff] }
 0x3b5   : > { %v1725_v39 = vsel %vm1712_vm6, %v1698_v10, %v1699_v1  ;;  %v3615_v3 = vadd.f32 %v3591_v31, %v3423_v7  ;;  %4000 = vst.msk [vmem:[%s6479_s16 + $0x50] sm:$0xff] %vm686_vm2, %v3936_v35  ;;  %v1635_v34 = vadd.f32 %v7329_v52, %v7328_v33  ;;  %v7330_v35 = vld [vmem:[#allocation20_spill] sm:$0xff] }
 0x3b6   : > { %2094 = vst.msk [vmem:[#allocation3 + $0xd4] sm:$0xf] %vm199_vm0, %v2029_v19  ;;  %v1827_v55 = vadd.f32 %v1725_v39, %v7327_v23  ;;  %v2794_v30 = vpop.f32.mrf.mxu3  ;;  %v4739_v23 = vunpack.c.h.bf16 %v4845_v17 }
 0x3b7   : > { %v3745_v13 = vadd.f32 %v6451_v37, %v3615_v3  ;;  %v3296_v22 = vrot.slane %v2794_v30, 7  ;;  %2429 = vrot.lane.b32.xlu2 %v4698_v27, %s4912_s21  ;;  %v2488_v27 = vpop.permute.xlu2 %2487 }
 0x3b8   : > { %v1893_v61 = vadd.f32 %v6345_v59, %v1827_v55  ;;  %v2976_v8 = vpop.f32.mrf.mxu0  ;;  %v2648_v45 = vsel %vm783_vm3, %v2568_v12, %v2488_v27  ;;  %v4887_v12 = vld [vmem:[#allocation3 + $0x80] sm:$0xff] }
 0x3b9   : > { %v3873_v38 = vadd.f32 %v4735_v26, %v3745_v13  ;;  %v3399_v54 = vsel %vm1519_vm5, %v3295_v36, %v3296_v22  ;;  %v3156_v20 = vpop.f32.mrf.mxu1 }
 0x3ba   : > { %v1957_v21 = vmax.f32 %v1893_v61, 0.0  ;;  %v1423_v49 = vpop.f32.mrf.mxu2  ;;  %v3424_v43 = vadd.f32 %v3399_v54, %v2974_v29  ;;  %v3489_v10 = vrot.slane %v3156_v20, 1 }
 0x3bb   : > { %v1700_v50 = vrot.slane %v1423_v49, 1  ;;  %v3937_v0 = vmax.f32 %v3873_v38, 0.0 }
 0x3bc   : > { %v2030_v4 = vpack.c.bf16 %v1957_v21, %v1957_v21  ;;  %v3590_v56 = vsel %vm1712_vm6, %v3488_v46, %v3489_v10 }
 0x3bd   : > { %v1724_v24 = vsel %vm1712_vm6, %v1699_v1, %v1700_v50  ;;  %v4699_v60 = vld [vmem:[#allocation3 + $0xd0] sm:$0xff]  ;;  %v3616_v16 = vadd.f32 %v3590_v56, %v3424_v43  ;;  %4001 = vst.msk [vmem:[%s6479_s16 + $0x58] sm:$0xff] %vm686_vm2, %v3937_v0  ;;  %v2416_v0 = vpop.permute.xlu0 %2415 }
 0x3be   : > { %2095 = vst.msk [vmem:[#allocation3 + $0xd8] sm:$0xf] %vm199_vm0, %v2030_v4  ;;  %v1828_v11 = vadd.f32 %v1724_v24, %v1635_v34  ;;  %v2796_v41 = vpop.f32.mrf.mxu3  ;;  %2501 = vrot.lane.b32.xlu1 %v4699_v60, %s4913_s22  ;;  %v2571_v27 = vsel %vm686_vm2, %v4887_v12, %v2416_v0 }
 0x3bf   : > { %2133 = vst.msk [vmem:[#allocation3 + $0xd8] sm:$0xf] %vm199_vm0, %v7311_v9  ;;  %v3746_v25 = vadd.f32 %v6451_v37, %v3616_v16  ;;  %v3297_v36 = vrot.slane %v2796_v41, 7 }
 0x3c0   : > { %v1894_v47 = vadd.f32 %v6345_v59, %v1828_v11  ;;  %v2979_v48 = vpop.f32.mrf.mxu0 }
 0x3c1   : > { %v3874_v6 = vadd.f32 %v4738_v5, %v3746_v25  ;;  %v3398_v15 = vsel %vm1519_vm5, %v3296_v22, %v3297_v36  ;;  %v3159_v18 = vpop.f32.mrf.mxu1 }
 0x3c2   : > { %v1958_v63 = vmax.f32 %v1894_v47, 0.0  ;;  %v1425_v40 = vpop.f32.mrf.mxu2  ;;  %v3425_v14 = vadd.f32 %v3398_v15, %v2976_v8  ;;  %v3490_v7 = vrot.slane %v3159_v18, 1  ;;  %v7331_v8 = vld [vmem:[#allocation21_spill] sm:$0xff] }
 0x3c3   : > { %v1701_v28 = vrot.slane %v1425_v40, 1  ;;  %v3938_v29 = vmax.f32 %v3874_v6, 0.0  ;;  %4537 = vmatmul.msk.bf16.gmra.mxu3 %vm855_vm4, %v2648_v45  ;;  %4575 = vmatmul.msk.bf16.gmra.mxu0 %vm855_vm4, %v2648_v45 }
 0x3c4   : > { %v2031_v1 = vpack.c.bf16 %v1958_v63, %v1958_v63  ;;  %v3589_v19 = vsel %vm1712_vm6, %v3489_v10, %v3490_v7  ;;  %4613 = vmatmul.msk.bf16.gmra.mxu1 %vm855_vm4, %v2648_v45  ;;  %v7332_v10 = vld [vmem:[#allocation22_spill] sm:$0xff] }
 0x3c5   : > { %v1723_v46 = vsel %vm1712_vm6, %v1700_v50, %v1701_v28  ;;  %v3617_v31 = vadd.f32 %v3589_v19, %v3425_v14  ;;  %4002 = vst.msk [vmem:[%s6479_s16 + $0x60] sm:$0xff] %vm686_vm2, %v3938_v29  ;;  %v4846_v50 = vld [vmem:[#allocation2 + $0x48] sm:$0xff]   ;;  %v1637_v17 = vadd.f32 %v7332_v10, %v7331_v8  ;;  %v7333_v29 = vld [vmem:[#allocation23_spill] sm:$0xff] }
 0x3c6   : > { %2096 = vst.msk [vmem:[#allocation3 + $0xdc] sm:$0xf] %vm199_vm0, %v2031_v1  ;;  %v1829_v39 = vadd.f32 %v1723_v46, %v7330_v35  ;;  %v2799_v55 = vpop.f32.mrf.mxu3  ;;  %2431 = vrot.lane.b32.xlu1 %v4699_v60, %s4912_s21  ;;  %v4742_v56 = vunpack.c.l.bf16 %v4846_v50  ;;  %v4743_v35 = vunpack.c.h.bf16 %v4846_v50  ;;  %v7335_v50 = vld [vmem:[#allocation25_spill] sm:$0xff] }
 0x3c7   : > { %2134 = vst.msk [vmem:[#allocation3 + $0xdc] sm:$0xf] %vm199_vm0, %v7311_v9  ;;  %v3747_v26 = vadd.f32 %v6451_v37, %v3617_v31  ;;  %v3298_v30 = vrot.slane %v2799_v55, 7  ;;  %v6723_v31 = vld [vmem:[%s7267_s3] ss:$0 sm:$0xff] }
 0x3c8   : > { %v1895_v3 = vadd.f32 %v6345_v59, %v1829_v39  ;;  %v2981_v20 = vpop.f32.mrf.mxu0 }
 0x3c9   : > { %v3875_v13 = vadd.f32 %v4739_v23, %v3747_v26  ;;  %v3397_v22 = vsel %vm1519_vm5, %v3297_v36, %v3298_v30  ;;  %v3161_v38 = vpop.f32.mrf.mxu1 }
 0x3ca   : > { %v1959_v61 = vmax.f32 %v1895_v3, 0.0  ;;  %v1428_v21 = vpop.f32.mrf.mxu2  ;;  %v3426_v54 = vadd.f32 %v3397_v22, %v2979_v48  ;;  %v3491_v43 = vrot.slane %v3161_v38, 1 }
 0x3cb   : > { %v1702_v49 = vrot.slane %v1428_v21, 1  ;;  %v3939_v52 = vmax.f32 %v3875_v13, 0.0 }
 0x3cc   : > { %v2032_v33 = vpack.c.bf16 %v1959_v61, %v1959_v61  ;;  %v3588_v4 = vsel %vm1712_vm6, %v3490_v7, %v3491_v43 }
 0x3cd   : > { %v1722_v34 = vsel %vm1712_vm6, %v1701_v28, %v1702_v49  ;;  %v3618_v24 = vadd.f32 %v3588_v4, %v3426_v54  ;;  %4003 = vst.msk [vmem:[%s6479_s16 + $0x68] sm:$0xff] %vm686_vm2, %v3939_v52 }
 0x3ce   : > { %2097 = vst.msk [vmem:[#allocation3 + $0xe0] sm:$0xf] %vm199_vm0, %v2032_v33  ;;  %v1830_v53 = vadd.f32 %v1722_v34, %v1637_v17  ;;  %v4700_v60 = vld [vmem:[#allocation3 + $0xd8] sm:$0xff]  ;;  %v2801_v11 = vpop.f32.mrf.mxu3 }
 0x3cf   : > { %v3748_v5 = vadd.f32 %v6451_v37, %v3618_v24  ;;  %v3299_v41 = vrot.slane %v2801_v11, 7  ;;  %2503 = vrot.lane.b32.xlu0 %v4700_v60, %s4913_s22 }
 0x3d0   : > { %v1896_v16 = vadd.f32 %v6345_v59, %v1830_v53  ;;  %v2490_v47 = vpop.permute.xlu1 %2489  ;;  %v2984_v14 = vpop.f32.mrf.mxu0 }
 0x3d1   : > { %v3876_v36 = vadd.f32 %v4742_v56, %v3748_v5  ;;  %v3396_v63 = vsel %vm1519_vm5, %v3298_v30, %v3299_v41  ;;  %v3164_v15 = vpop.f32.mrf.mxu1  ;;  %v2650_v40 = vsel %vm783_vm3, %v2571_v27, %v2490_v47  ;;  %v2418_v56 = vpop.permute.xlu2 %2417  ;;  %v4889_v5 = vld [vmem:[#allocation3 + $0x88] sm:$0xff] }
 0x3d2   : > { %v1960_v25 = vmax.f32 %v1896_v16, 0.0  ;;  %v1430_v6 = vpop.f32.mrf.mxu2  ;;  %v3427_v59 = vadd.f32 %v3396_v63, %v2981_v20  ;;  %v3492_v45 = vrot.slane %v3164_v15, 1 }
 0x3d3   : > { %v1703_v18 = vrot.slane %v1430_v6, 1  ;;  %v3940_v48 = vmax.f32 %v3876_v36, 0.0  ;;  %4538 = vmatmul.msk.bf16.gmra.mxu3 %vm855_vm4, %v2650_v40  ;;  %4576 = vmatmul.msk.bf16.gmra.mxu0 %vm855_vm4, %v2650_v40 }
 0x3d4   : > { %v2033_v28 = vpack.c.bf16 %v1960_v25, %v1960_v25  ;;  %v3587_v1 = vsel %vm1712_vm6, %v3491_v43, %v3492_v45  ;;  %4614 = vmatmul.msk.bf16.gmra.mxu1 %vm855_vm4, %v2650_v40  ;;  %v7334_v43 = vld [vmem:[#allocation24_spill] sm:$0xff] }
 0x3d5   : > { %v1721_v7 = vsel %vm1712_vm6, %v1702_v49, %v1703_v18  ;;  %v3619_v19 = vadd.f32 %v3587_v1, %v3427_v59  ;;  %4004 = vst.msk [vmem:[%s6479_s16 + $0x70] sm:$0xff] %vm686_vm2, %v3940_v48  ;;  %v4847_v49 = vld [vmem:[#allocation2 + $0x50] sm:$0xff]   ;;  %v1639_v8 = vadd.f32 %v7335_v50, %v7334_v43 }
 0x3d6   : > { %2098 = vst.msk [vmem:[#allocation3 + $0xe4] sm:$0xf] %vm199_vm0, %v2033_v28  ;;  %v1831_v46 = vadd.f32 %v1721_v7, %v7333_v29  ;;  %v2804_v39 = vpop.f32.mrf.mxu3  ;;  %v4746_v53 = vunpack.c.l.bf16 %v4847_v49  ;;  %v7336_v7 = vld [vmem:[#allocation26_spill] sm:$0xff] }
 0x3d7   : > { %v3749_v55 = vadd.f32 %v6451_v37, %v3619_v19  ;;  %v3300_v3 = vrot.slane %v2804_v39, 7  ;;  %2433 = vrot.lane.b32.xlu0 %v4700_v60, %s4912_s21 }
 0x3d8   : > { %v1897_v23 = vadd.f32 %v6723_v31, %v1831_v46  ;;  %v2986_v20 = vpop.f32.mrf.mxu0  ;;  %v4747_v46 = vunpack.c.h.bf16 %v4847_v49  ;;  %v7337_v49 = vld [vmem:[#allocation27_spill] sm:$0xff] }
 0x3d9   : > { %v3877_v30 = vadd.f32 %v4743_v35, %v3749_v55  ;;  %v3395_v61 = vsel %vm1519_vm5, %v3299_v41, %v3300_v3  ;;  %v3166_v22 = vpop.f32.mrf.mxu1  ;;  %v2574_v41 = vsel %vm686_vm2, %v4889_v5, %v2418_v56  ;;  %v4890_v5 = vld [vmem:[#allocation3 + $0x90] sm:$0xff] }
 0x3da   : > { %v1961_v26 = vmax.f32 %v1897_v23, 0.0  ;;  %v1433_v13 = vpop.f32.mrf.mxu2  ;;  %v3428_v21 = vadd.f32 %v3395_v61, %v2984_v14  ;;  %v3493_v54 = vrot.slane %v3166_v22, 1 }
 0x3db   : > { %v1704_v38 = vrot.slane %v1433_v13, 1  ;;  %v3941_v17 = vmax.f32 %v3877_v30, 0.0 }
 0x3dc   : > { %v2034_v10 = vpack.c.bf16 %v1961_v26, %v1961_v26  ;;  %v3586_v52 = vsel %vm1712_vm6, %v3492_v45, %v3493_v54 }
 0x3dd   : > { %v1720_v33 = vsel %vm1712_vm6, %v1703_v18, %v1704_v38  ;;  %v6736_v34 = vld [vmem:[#allocation3 + $0xe0] sm:$0xff]  ;;  %v3620_v0 = vadd.f32 %v3586_v52, %v3428_v21  ;;  %4005 = vst.msk [vmem:[%s6479_s16 + $0x78] sm:$0xff] %vm686_vm2, %v3941_v17 }
 0x3de   : > { %2099 = vst.msk [vmem:[#allocation3 + $0xe8] sm:$0xf] %vm199_vm0, %v2034_v10  ;;  %v1832_v4 = vadd.f32 %v1720_v33, %v1639_v8  ;;  %v2806_v24 = vpop.f32.mrf.mxu3  ;;  %2505 = vrot.lane.b32.xlu2 %v6736_v34, %s4913_s22  ;;  %v2420_v33 = vpop.permute.xlu1 %2419 }
 0x3df   : > { %2135 = vst.msk [vmem:[#allocation3 + $0xe8] sm:$0xf] %vm199_vm0, %v7311_v9  ;;  %v3750_v11 = vadd.f32 %v6451_v37, %v3620_v0  ;;  %v3301_v16 = vrot.slane %v2806_v24, 7 }
 0x3e0   : > { %v1898_v60 = vadd.f32 %v6723_v31, %v1832_v4  ;;  %v2989_v40 = vpop.f32.mrf.mxu0 }
 0x3e1   : > { %v3878_v27 = vadd.f32 %v4746_v53, %v3750_v11  ;;  %v3394_v47 = vsel %vm1519_vm5, %v3300_v3, %v3301_v16  ;;  %v3169_v36 = vpop.f32.mrf.mxu1  ;;  %v2492_v59 = vpop.permute.xlu0 %2491 }
 0x3e2   : > { %v1962_v12 = vmax.f32 %v1898_v60, 0.0  ;;  %v1435_v25 = vpop.f32.mrf.mxu2  ;;  %v3429_v63 = vadd.f32 %v3394_v47, %v2986_v20  ;;  %v3494_v15 = vrot.slane %v3169_v36, 1  ;;  %v2652_v14 = vsel %vm783_vm3, %v2574_v41, %v2492_v59  ;;  %v7338_v20 = vld [vmem:[#allocation28_spill] sm:$0xff] }
 0x3e3   : > { %v1705_v6 = vrot.slane %v1435_v25, 1  ;;  %v3942_v45 = vmax.f32 %v3878_v27, 0.0  ;;  %4539 = vmatmul.msk.bf16.gmra.mxu3 %vm855_vm4, %v2652_v14  ;;  %4577 = vmatmul.msk.bf16.gmra.mxu0 %vm855_vm4, %v2652_v14  ;;  %v1641_v43 = vadd.f32 %v7338_v20, %v7337_v49  ;;  %v2577_v41 = vsel %vm686_vm2, %v4890_v5, %v2420_v33  ;;  %v7341_v49 = vld [vmem:[#allocation31_spill] sm:$0xff] }
 0x3e4   : > { %v2035_v18 = vpack.c.bf16 %v1962_v12, %v1962_v12  ;;  %v3585_v48 = vsel %vm1712_vm6, %v3493_v54, %v3494_v15  ;;  %4615 = vmatmul.msk.bf16.gmra.mxu1 %vm855_vm4, %v2652_v14  ;;  %v4848_v54 = vld [vmem:[#allocation2 + $0x58] sm:$0xff]  }
 0x3e5   : > { %v1719_v28 = vsel %vm1712_vm6, %v1704_v38, %v1705_v6  ;;  %v3621_v29 = vadd.f32 %v3585_v48, %v3429_v63  ;;  %4006 = vst.msk [vmem:[%s6479_s16 + $0x80] sm:$0xff] %vm686_vm2, %v3942_v45  ;;  %v4750_v0 = vunpack.c.l.bf16 %v4848_v54 }
 0x3e6   : > { %2100 = vst.msk [vmem:[#allocation3 + $0xec] sm:$0xf] %vm199_vm0, %v2035_v18  ;;  %v1833_v1 = vadd.f32 %v1719_v28, %v7336_v7  ;;  %v2809_v19 = vpop.f32.mrf.mxu3  ;;  %2435 = vrot.lane.b32.xlu2 %v6736_v34, %s4912_s21  ;;  %v7339_v28 = vld [vmem:[#allocation29_spill] sm:$0xff] }
 0x3e7   : > { %2136 = vst.msk [vmem:[#allocation3 + $0xec] sm:$0xf] %vm199_vm0, %v7311_v9  ;;  %v3751_v39 = vadd.f32 %v6451_v37, %v3621_v29  ;;  %v3302_v23 = vrot.slane %v2809_v19, 7  ;;  %v6804_v19 = vld [vmem:[%s7267_s3 + $0x1] ss:$0 sm:$0xff] }
 0x3e8   : > { %v1899_v35 = vadd.f32 %v6723_v31, %v1833_v1  ;;  %v2991_v21 = vpop.f32.mrf.mxu0  ;;  %v4751_v1 = vunpack.c.h.bf16 %v4848_v54  ;;  %v7340_v54 = vld [vmem:[#allocation30_spill] sm:$0xff] }
 0x3e9   : > { %v3879_v3 = vadd.f32 %v4747_v46, %v3751_v39  ;;  %v3393_v26 = vsel %vm1519_vm5, %v3301_v16, %v3302_v23  ;;  %v3171_v61 = vpop.f32.mrf.mxu1  ;;  %v2494_v16 = vpop.permute.xlu2 %2493  ;;  %v1643_v20 = vadd.f32 %v7341_v49, %v7340_v54 }
 0x3ea   : > { %v1963_v55 = vmax.f32 %v1899_v35, 0.0  ;;  %v1438_v30 = vpop.f32.mrf.mxu2  ;;  %v3430_v13 = vadd.f32 %v3393_v26, %v2989_v40  ;;  %v3495_v38 = vrot.slane %v3171_v61, 1  ;;  %v2654_v18 = vsel %vm783_vm3, %v2577_v41, %v2494_v16  ;;  %v2422_v33 = vpop.permute.xlu0 %2421  ;;  %v4892_v16 = vld [vmem:[#allocation3 + $0x98] sm:$0xff] }
 0x3eb   : > { %v1706_v22 = vrot.slane %v1438_v30, 1  ;;  %v3943_v8 = vmax.f32 %v3879_v3, 0.0  ;;  %v2580_v5 = vsel %vm686_vm2, %v4892_v16, %v2422_v33 }
 0x3ec   : > { %v2036_v50 = vpack.c.bf16 %v1963_v55, %v1963_v55  ;;  %v3584_v17 = vsel %vm1712_vm6, %v3494_v15, %v3495_v38 }
 0x3ed   : > { %v1718_v10 = vsel %vm1712_vm6, %v1705_v6, %v1706_v22  ;;  %v3622_v4 = vadd.f32 %v3584_v17, %v3430_v13  ;;  %4007 = vst.msk [vmem:[%s6479_s16 + $0x88] sm:$0xff] %vm686_vm2, %v3943_v8 }
 0x3ee   : > { %2101 = vst.msk [vmem:[#allocation3 + $0xf0] sm:$0xf] %vm199_vm0, %v2036_v50  ;;  %v1834_v52 = vadd.f32 %v1718_v10, %v1641_v43  ;;  %v6777_v53 = vld [vmem:[#allocation3 + $0xe8] sm:$0xff]  ;;  %v2811_v24 = vpop.f32.mrf.mxu3 }
 0x3ef   : > { %v3752_v60 = vadd.f32 %v6451_v37, %v3622_v4  ;;  %v3303_v11 = vrot.slane %v2811_v24, 7  ;;  %2507 = vrot.lane.b32.xlu1 %v6777_v53, %s4913_s22 }
 0x3f0   : > { %v1900_v56 = vadd.f32 %v6723_v31, %v1834_v52  ;;  %v2994_v15 = vpop.f32.mrf.mxu0 }
 0x3f1   : > { %v3880_v27 = vadd.f32 %v4750_v0, %v3752_v60  ;;  %v3392_v47 = vsel %vm1519_vm5, %v3302_v23, %v3303_v11  ;;  %v3174_v36 = vpop.f32.mrf.mxu1 }
 0x3f2   : > { %v1964_v12 = vmax.f32 %v1900_v56, 0.0  ;;  %v1440_v25 = vpop.f32.mrf.mxu2  ;;  %v3431_v63 = vadd.f32 %v3392_v47, %v2991_v21  ;;  %v3496_v37 = vrot.slane %v3174_v36, 1 }
 0x3f3   : > { %v1707_v6 = vrot.slane %v1440_v25, 1  ;;  %v3944_v59 = vmax.f32 %v3880_v27, 0.0  ;;  %4540 = vmatmul.msk.bf16.gmra.mxu3 %vm855_vm4, %v2654_v18  ;;  %4578 = vmatmul.msk.bf16.gmra.mxu0 %vm855_vm4, %v2654_v18 }
 0x3f4   : > { %v2037_v40 = vpack.c.bf16 %v1964_v12, %v1964_v12  ;;  %v3583_v14 = vsel %vm1712_vm6, %v3495_v38, %v3496_v37  ;;  %4616 = vmatmul.msk.bf16.gmra.mxu1 %vm855_vm4, %v2654_v18  ;;  %v4849_v38 = vld [vmem:[#allocation2 + $0x60] sm:$0xff]  }
 0x3f5   : > { %v1717_v45 = vsel %vm1712_vm6, %v1706_v22, %v1707_v6  ;;  %v3623_v7 = vadd.f32 %v3583_v14, %v3431_v63  ;;  %4008 = vst.msk [vmem:[%s6479_s16 + $0x90] sm:$0xff] %vm686_vm2, %v3944_v59  ;;  %v4754_v0 = vunpack.c.l.bf16 %v4849_v38  ;;  %v7342_v14 = vld [vmem:[#allocation32_spill] sm:$0xff] }
 0x3f6   : > { %2102 = vst.msk [vmem:[#allocation3 + $0xf4] sm:$0xf] %vm199_vm0, %v2037_v40  ;;  %v1835_v48 = vadd.f32 %v1717_v45, %v7339_v28  ;;  %v2814_v29 = vpop.f32.mrf.mxu3 }
 0x3f7   : > { %v3753_v35 = vadd.f32 %v6804_v19, %v3623_v7  ;;  %v3304_v39 = vrot.slane %v2814_v29, 7  ;;  %2437 = vrot.lane.b32.xlu1 %v6777_v53, %s4912_s21 }
 0x3f8   : > { %v1901_v46 = vadd.f32 %v6723_v31, %v1835_v48  ;;  %v2996_v22 = vpop.f32.mrf.mxu0 }
 0x3f9   : > { %v3881_v55 = vadd.f32 %v4751_v1, %v3753_v35  ;;  %v3391_v3 = vsel %vm1519_vm5, %v3303_v11, %v3304_v39  ;;  %v3176_v30 = vpop.f32.mrf.mxu1  ;;  %v4755_v1 = vunpack.c.h.bf16 %v4849_v38 }
 0x3fa   : > { %v1965_v23 = vmax.f32 %v1901_v46, 0.0  ;;  %v1443_v26 = vpop.f32.mrf.mxu2  ;;  %v3432_v61 = vadd.f32 %v3391_v3, %v2994_v15  ;;  %v3497_v21 = vrot.slane %v3176_v30, 1 }
 0x3fb   : > { %v1708_v13 = vrot.slane %v1443_v26, 1  ;;  %v3945_v50 = vmax.f32 %v3881_v55, 0.0 }
 0x3fc   : > { %v2038_v43 = vpack.c.bf16 %v1965_v23, %v1965_v23  ;;  %v3582_v10 = vsel %vm1712_vm6, %v3496_v37, %v3497_v21 }
 0x3fd   : > { %v1716_v8 = vsel %vm1712_vm6, %v1707_v6, %v1708_v13  ;;  %v6817_v17 = vld [vmem:[#allocation3 + $0xf0] sm:$0xff]  ;;  %v3624_v4 = vadd.f32 %v3582_v10, %v3432_v61  ;;  %4009 = vst.msk [vmem:[%s6479_s16 + $0x98] sm:$0xff] %vm686_vm2, %v3945_v50  ;;  %v2424_v10 = vpop.permute.xlu2 %2423 }
 0x3fe   : > { %2103 = vst.msk [vmem:[#allocation3 + $0xf8] sm:$0xf] %vm199_vm0, %v2038_v43  ;;  %v1836_v52 = vadd.f32 %v1716_v8, %v1643_v20  ;;  %v2816_v24 = vpop.f32.mrf.mxu3  ;;  %2509 = vrot.lane.b32.xlu0 %v6817_v17, %s4913_s22  ;;  %v4850_v43 = vld [vmem:[#allocation2 + $0x68] sm:$0xff]  }
 0x3ff   : > { %2137 = vst.msk [vmem:[#allocation3 + $0xf8] sm:$0xf] %vm199_vm0, %v7311_v9  ;;  %v3754_v60 = vadd.f32 %v6804_v19, %v3624_v4  ;;  %v3305_v11 = vrot.slane %v2816_v24, 7 }
 0x400   : > { %v1902_v56 = vadd.f32 %v6723_v31, %v1836_v52  ;;  %v2999_v6 = vpop.f32.mrf.mxu0 }
 0x401   : > { %v3882_v12 = vadd.f32 %v4754_v0, %v3754_v60  ;;  %v3390_v27 = vsel %vm1519_vm5, %v3304_v39, %v3305_v11  ;;  %v2496_v25 = vpop.permute.xlu1 %2495  ;;  %v3179_v15 = vpop.f32.mrf.mxu1  ;;  %v4758_v0 = vunpack.c.l.bf16 %v4850_v43 }
 0x402   : > { %v1966_v41 = vmax.f32 %v1902_v56, 0.0  ;;  %v1445_v47 = vpop.f32.mrf.mxu2  ;;  %v3433_v36 = vadd.f32 %v3390_v27, %v2996_v22  ;;  %v2656_v37 = vsel %vm783_vm3, %v2580_v5, %v2496_v25  ;;  %v3498_v18 = vrot.slane %v3179_v15, 1  ;;  %v7343_v22 = vld [vmem:[#allocation33_spill] sm:$0xff] }
 0x403   : > { %v1709_v63 = vrot.slane %v1445_v47, 1  ;;  %v3946_v59 = vmax.f32 %v3882_v12, 0.0  ;;  %4541 = vmatmul.msk.bf16.gmra.mxu3 %vm855_vm4, %v2656_v37  ;;  %4579 = vmatmul.msk.bf16.gmra.mxu0 %vm855_vm4, %v2656_v37 }
 0x404   : > { %v2039_v40 = vpack.c.bf16 %v1966_v41, %v1966_v41  ;;  %v3581_v48 = vsel %vm1712_vm6, %v3497_v21, %v3498_v18  ;;  %4617 = vmatmul.msk.bf16.gmra.mxu1 %vm855_vm4, %v2656_v37  ;;  %v7344_v21 = vld [vmem:[#allocation34_spill] sm:$0xff] }
 0x405   : > { %v1715_v45 = vsel %vm1712_vm6, %v1708_v13, %v1709_v63  ;;  %v3625_v7 = vadd.f32 %v3581_v48, %v3433_v36  ;;  %4010 = vst.msk [vmem:[%s6479_s16 + $0xa0] sm:$0xff] %vm686_vm2, %v3946_v59  ;;  %v1645_v38 = vadd.f32 %v7344_v21, %v7343_v22 }
 0x406   : > { %2104 = vst.msk [vmem:[#allocation3 + $0xfc] sm:$0xf] %vm199_vm0, %v2039_v40  ;;  %v1837_v28 = vadd.f32 %v1715_v45, %v7342_v14  ;;  %2439 = vrot.lane.b32.xlu0 %v6817_v17, %s4912_s21  ;;  %v2819_v46 = vpop.f32.mrf.mxu3  ;;  %v7345_v40 = vld [vmem:[#allocation36_spill] sm:$0xff] }
 0x407   : > { %2138 = vst.msk [vmem:[#allocation3 + $0xfc] sm:$0xf] %vm199_vm0, %v7311_v9  ;;  %v3755_v35 = vadd.f32 %v6804_v19, %v3625_v7  ;;  %v3306_v39 = vrot.slane %v2819_v46, 7  ;;  %v1647_v59 = vadd.f32 %v7345_v40, %v6405_v2  ;;  %v7346_v7 = vld [vmem:[#allocation37_spill] sm:$0xff]  ;;  %v7348_v46 = vld [vmem:[#allocation35_spill] sm:$0xff] }
 0x408   : > { %v1903_v29 = vadd.f32 %v6723_v31, %v1837_v28  ;;  %v3001_v61 = vpop.f32.mrf.mxu0 }
 0x409   : > { %v3883_v3 = vadd.f32 %v4755_v1, %v3755_v35  ;;  %v3389_v26 = vsel %vm1519_vm5, %v3305_v11, %v3306_v39  ;;  %v3181_v13 = vpop.f32.mrf.mxu1  ;;  %v4893_v11 = vld [vmem:[#allocation3 + $0xa0] sm:$0xff]  ;;  %v7347_v1 = vrot.slane %v7346_v7, 1 }
 0x40a   : > { %v1967_v23 = vmax.f32 %v1903_v29, 0.0  ;;  %v1448_v55 = vpop.f32.mrf.mxu2  ;;  %v3434_v49 = vadd.f32 %v3389_v26, %v2999_v6  ;;  %v3499_v20 = vrot.slane %v3181_v13, 1  ;;  %v2583_v16 = vsel %vm686_vm2, %v4893_v11, %v2424_v10  ;;  %v4894_v11 = vld [vmem:[#allocation3 + $0xa8] sm:$0xff] }
 0x40b   : > { %v1710_v30 = vrot.slane %v1448_v55, 1  ;;  %v3947_v50 = vmax.f32 %v3883_v3, 0.0  ;;  %v4759_v55 = vunpack.c.h.bf16 %v4850_v43 }
 0x40c   : > { %v2040_v54 = vpack.c.bf16 %v1967_v23, %v1967_v23  ;;  %v3580_v52 = vsel %vm1712_vm6, %v3498_v18, %v3499_v20 }
 0x40d   : > { %v1714_v8 = vsel %vm1712_vm6, %v1709_v63, %v1710_v30  ;;  %4011 = vst.msk [vmem:[%s6479_s16 + $0xa8] sm:$0xff] %vm686_vm2, %v3947_v50  ;;  %v3626_v4 = vadd.f32 %v3580_v52, %v3434_v49 }
 0x40e   : > { %2105 = vst.msk [vmem:[#allocation3 + $0x100] sm:$0xf] %vm199_vm0, %v2040_v54  ;;  %v1838_v33 = vadd.f32 %v1714_v8, %v1645_v38  ;;  %v6860_v24 = vld [vmem:[#allocation3 + $0xf8] sm:$0xff]  ;;  %v2821_v60 = vpop.f32.mrf.mxu3 }
 0x40f   : > { %v3756_v5 = vadd.f32 %v6804_v19, %v3626_v4  ;;  %v3307_v41 = vrot.slane %v2821_v60, 7  ;;  %2511 = vrot.lane.b32.xlu2 %v6860_v24, %s4913_s22 }
 0x410   : > { %v1904_v56 = vadd.f32 %v6723_v31, %v1838_v33  ;;  %v2498_v12 = vpop.permute.xlu0 %2497  ;;  %v3004_v15 = vpop.f32.mrf.mxu0 }
 0x411   : > { %v2658_v25 = vsel %vm783_vm3, %v2583_v16, %v2498_v12  ;;  %v3884_v36 = vadd.f32 %v4758_v0, %v3756_v5  ;;  %v3388_v63 = vsel %vm1519_vm5, %v3306_v39, %v3307_v41  ;;  %v3184_v37 = vpop.f32.mrf.mxu1  ;;  %v2426_v33 = vpop.permute.xlu1 %2425 }
 0x412   : > { %v1968_v27 = vmax.f32 %v1904_v56, 0.0  ;;  %v1450_v47 = vpop.f32.mrf.mxu2  ;;  %v3435_v45 = vadd.f32 %v3388_v63, %v3001_v61  ;;  %v3500_v14 = vrot.slane %v3184_v37, 1  ;;  %v2586_v16 = vsel %vm686_vm2, %v4894_v11, %v2426_v33  ;;  %v2500_v5 = vpop.permute.xlu2 %2499 }
 0x413   : > { %v1711_v6 = vrot.slane %v1450_v47, 1  ;;  %v3948_v28 = vmax.f32 %v3884_v36, 0.0  ;;  %4542 = vmatmul.msk.bf16.gmra.mxu3 %vm855_vm4, %v2658_v25  ;;  %4580 = vmatmul.msk.bf16.gmra.mxu0 %vm855_vm4, %v2658_v25  ;;  %v2660_v47 = vsel %vm783_vm3, %v2586_v16, %v2500_v5 }
 0x414   : > { %v2041_v18 = vpack.c.bf16 %v1968_v27, %v1968_v27  ;;  %v3579_v39 = vsel %vm1712_vm6, %v3499_v20, %v3500_v14  ;;  %4618 = vmatmul.msk.bf16.gmra.mxu1 %vm855_vm4, %v2658_v25 }
 0x415   : > { %v1713_v48 = vsel %vm1712_vm6, %v1710_v30, %v1711_v6  ;;  %v1776_v29 = vsel %vm1712_vm6, %v1711_v6, %v7347_v1  ;;  %4012 = vst.msk [vmem:[%s6479_s16 + $0xb0] sm:$0xff] %vm686_vm2, %v3948_v28  ;;  %v3627_v23 = vadd.f32 %v3579_v39, %v3435_v45  ;;  %v4707_v45 = vld [vmem:[#allocation3 + $0x110] sm:$0xff] }
 0x416   : > { %2106 = vst.msk [vmem:[#allocation3 + $0x104] sm:$0xf] %vm199_vm0, %v2041_v18  ;;  %v1839_v2 = vadd.f32 %v1713_v48, %v7348_v46  ;;  %v1840_v35 = vadd.f32 %v1776_v29, %v1647_v59  ;;  %v2824_v30 = vpop.f32.mrf.mxu3 }
 0x417   : > { %v3757_v61 = vadd.f32 %v6804_v19, %v3627_v23  ;;  %v3308_v13 = vrot.slane %v2824_v30, 7  ;;  %2441 = vrot.lane.b32.xlu2 %v6860_v24, %s4912_s21  ;;  %v4852_v23 = vld [vmem:[#allocation2 + $0x78] sm:$0xff]  }
 0x418   : > { %v1905_v3 = vadd.f32 %v6723_v31, %v1839_v2  ;;  %v1906_v26 = vadd.f32 %v6723_v31, %v1840_v35  ;;  %v3006_v49 = vpop.f32.mrf.mxu0  ;;  %v4851_v31 = vld [vmem:[#allocation2 + $0x70] sm:$0xff]  }
 0x419   : > { %v3885_v38 = vadd.f32 %v4759_v55, %v3757_v61  ;;  %v3387_v54 = vsel %vm1519_vm5, %v3307_v41, %v3308_v13  ;;  %v3186_v20 = vpop.f32.mrf.mxu1  ;;  %v4762_v60 = vunpack.c.l.bf16 %v4851_v31  ;;  %v4763_v18 = vunpack.c.h.bf16 %v4851_v31 }
 0x41a   : > { %v1969_v22 = vmax.f32 %v1905_v3, 0.0  ;;  %v1970_v21 = vmax.f32 %v1906_v26, 0.0  ;;  %v3436_v8 = vadd.f32 %v3387_v54, %v3004_v15  ;;  %v3501_v10 = vrot.slane %v3186_v20, 1  ;;  %v2428_v3 = vpop.permute.xlu0 %2427 }
 0x41b   : > { %v3949_v4 = vmax.f32 %v3885_v38, 0.0  ;;  %v4766_v61 = vunpack.c.l.bf16 %v4852_v23 }
 0x41c   : > { %v2042_v43 = vpack.c.bf16 %v1969_v22, %v1969_v22  ;;  %v2043_v50 = vpack.c.bf16 %v1970_v21, %v1970_v21  ;;  %v3578_v0 = vsel %vm1712_vm6, %v3500_v14, %v3501_v10  ;;  %v4895_v22 = vld [vmem:[#allocation3 + $0xb0] sm:$0xff] }
 0x41d   : > { %v4705_v52 = vld [vmem:[#allocation3 + $0x100] sm:$0xff]  ;;  %v3628_v56 = vadd.f32 %v3578_v0, %v3436_v8  ;;  %4013 = vst.msk [vmem:[%s6479_s16 + $0xb8] sm:$0xff] %vm686_vm2, %v3949_v4  ;;  %v2589_v21 = vsel %vm686_vm2, %v4895_v22, %v2428_v3 }
 0x41e   : > { %2107 = vst.msk [vmem:[#allocation3 + $0x108] sm:$0xf] %vm199_vm0, %v2042_v43  ;;  %2513 = vrot.lane.b32.xlu1 %v4705_v52, %s4913_s22  ;;  %v2826_v41 = vpop.f32.mrf.mxu3 }
 0x41f   : > { %2108 = vst.msk [vmem:[#allocation3 + $0x10c] sm:$0xf] %vm199_vm0, %v2043_v50  ;;  %v3758_v12 = vadd.f32 %v6804_v19, %v3628_v56  ;;  %v3309_v27 = vrot.slane %v2826_v41, 7  ;;  %2517 = vrot.lane.b32.xlu2 %v4707_v45, %s4913_s22  ;;  %v4767_v56 = vunpack.c.h.bf16 %v4852_v23 }
 0x420   : > { %2139 = vst.msk [vmem:[#allocation3 + $0x108] sm:$0xf] %vm199_vm0, %v7311_v9  ;;  %v3009_v63 = vpop.f32.mrf.mxu0 }
 0x421   : > { %2140 = vst.msk [vmem:[#allocation3 + $0x10c] sm:$0xf] %vm199_vm0, %v7311_v9  ;;  %v3886_v25 = vadd.f32 %v4762_v60, %v3758_v12  ;;  %v3386_v36 = vsel %vm1519_vm5, %v3308_v13, %v3309_v27  ;;  %v3189_v6 = vpop.f32.mrf.mxu1  ;;  %v4708_v60 = vld [vmem:[#allocation3 + $0x118] sm:$0xff] }
 0x422   : > { %v3437_v15 = vadd.f32 %v3386_v36, %v3006_v49  ;;  %v3502_v37 = vrot.slane %v3189_v6, 1 }
 0x423   : > { %v3950_v40 = vmax.f32 %v3886_v25, 0.0  ;;  %4543 = vmatmul.msk.bf16.gmra.mxu3 %vm855_vm4, %v2660_v47  ;;  %4581 = vmatmul.msk.bf16.gmra.mxu0 %vm855_vm4, %v2660_v47 }
 0x424   : > { %v3577_v9 = vsel %vm1712_vm6, %v3501_v10, %v3502_v37  ;;  %4619 = vmatmul.msk.bf16.gmra.mxu1 %vm855_vm4, %v2660_v47 }
 0x425   : > { %4014 = vst.msk [vmem:[%s6479_s16 + $0xc0] sm:$0xff] %vm686_vm2, %v3950_v40  ;;  %v3629_v59 = vadd.f32 %v3577_v9, %v3437_v15 }
 0x426   : > { %2443 = vrot.lane.b32.xlu1 %v4705_v52, %s4912_s21  ;;  %v2829_v14 = vpop.f32.mrf.mxu3 }
 0x427   : > { %v3759_v48 = vadd.f32 %v6804_v19, %v3629_v59  ;;  %v3310_v7 = vrot.slane %v2829_v14, 7  ;;  %v4896_v59 = vld [vmem:[#allocation3 + $0xb8] sm:$0xff] }
 0x428   : > { %v4706_v28 = vld [vmem:[#allocation3 + $0x108] sm:$0xff]  ;;  %v3011_v46 = vpop.f32.mrf.mxu0 }
 0x429   : > { %2515 = vrot.lane.b32.xlu0 %v4706_v28, %s4913_s22  ;;  %v3887_v1 = vadd.f32 %v4763_v18, %v3759_v48  ;;  %v3385_v29 = vsel %vm1519_vm5, %v3309_v27, %v3310_v7  ;;  %v3191_v2 = vpop.f32.mrf.mxu1 }
 0x42a   : > { %v3438_v35 = vadd.f32 %v3385_v29, %v3009_v63  ;;  %v3503_v39 = vrot.slane %v3191_v2, 1  ;;  %v4853_v63 = vld [vmem:[#allocation2 + $0x80] sm:$0xff]  }
 0x42b   : > { %v3951_v55 = vmax.f32 %v3887_v1, 0.0  ;;  %v4770_v9 = vunpack.c.l.bf16 %v4853_v63 }
 0x42c   : > { %v3576_v26 = vsel %vm1712_vm6, %v3502_v37, %v3503_v39  ;;  %v2430_v37 = vpop.permute.xlu2 %2429 }
 0x42d   : > { %4015 = vst.msk [vmem:[%s6479_s16 + $0xc8] sm:$0xff] %vm686_vm2, %v3951_v55  ;;  %v3630_v30 = vadd.f32 %v3576_v26, %v3438_v35  ;;  %v2592_v18 = vsel %vm686_vm2, %v4896_v59, %v2430_v37  ;;  %v4771_v26 = vunpack.c.h.bf16 %v4853_v63 }
 0x42e   : > { %v2831_v13 = vpop.f32.mrf.mxu3  ;;  %2519 = vrot.lane.b32.xlu1 %v4708_v60, %s4913_s22 }
 0x42f   : > { %v3760_v38 = vadd.f32 %v6804_v19, %v3630_v30  ;;  %v3311_v54 = vrot.slane %v2831_v13, 7 }
 0x430   : > { %v2502_v49 = vpop.permute.xlu1 %2501  ;;  %v3014_v8 = vpop.f32.mrf.mxu0 }
 0x431   : > { %v2662_v20 = vsel %vm783_vm3, %v2589_v21, %v2502_v49  ;;  %2445 = vrot.lane.b32.xlu0 %v4706_v28, %s4912_s21  ;;  %v3888_v43 = vadd.f32 %v4766_v61, %v3760_v38  ;;  %v3384_v50 = vsel %vm1519_vm5, %v3310_v7, %v3311_v54  ;;  %v3194_v10 = vpop.f32.mrf.mxu1 }
 0x432   : > { %v3439_v31 = vadd.f32 %v3384_v50, %v3011_v46  ;;  %v3504_v33 = vrot.slane %v3194_v10, 1 }
 0x433   : > { %v3952_v52 = vmax.f32 %v3888_v43, 0.0  ;;  %4544 = vmatmul.msk.bf16.gmra.mxu3 %vm855_vm4, %v2662_v20  ;;  %4582 = vmatmul.msk.bf16.gmra.mxu0 %vm855_vm4, %v2662_v20  ;;  %v4854_v43 = vld [vmem:[#allocation2 + $0x88] sm:$0xff]  }
 0x434   : > { %v3575_v4 = vsel %vm1712_vm6, %v3503_v39, %v3504_v33  ;;  %4620 = vmatmul.msk.bf16.gmra.mxu1 %vm855_vm4, %v2662_v20 }
 0x435   : > { %4016 = vst.msk [vmem:[%s6479_s16 + $0xd0] sm:$0xff] %vm686_vm2, %v3952_v52  ;;  %v3631_v0 = vadd.f32 %v3575_v4, %v3439_v31 }
 0x436   : > { %v2834_v11 = vpop.f32.mrf.mxu3 }
 0x437   : > { %v3761_v16 = vadd.f32 %v6804_v19, %v3631_v0  ;;  %v3312_v5 = vrot.slane %v2834_v11, 7  ;;  %v4897_v0 = vld [vmem:[#allocation3 + $0xc0] sm:$0xff] }
 0x438   : > { %v3016_v27 = vpop.f32.mrf.mxu0  ;;  %v2506_v4 = vpop.permute.xlu2 %2505 }
 0x439   : > { %v3889_v41 = vadd.f32 %v4767_v56, %v3761_v16  ;;  %v3383_v12 = vsel %vm1519_vm5, %v3311_v54, %v3312_v5  ;;  %v3196_v47 = vpop.f32.mrf.mxu1 }
 0x43a   : > { %v3440_v25 = vadd.f32 %v3383_v12, %v3014_v8  ;;  %v3505_v36 = vrot.slane %v3196_v47, 1  ;;  %v2432_v8 = vpop.permute.xlu1 %2431 }
 0x43b   : > { %v3953_v6 = vmax.f32 %v3889_v41, 0.0  ;;  %v2595_v56 = vsel %vm686_vm2, %v4897_v0, %v2432_v8 }
 0x43c   : > { %v3574_v15 = vsel %vm1712_vm6, %v3504_v33, %v3505_v36  ;;  %v4774_v33 = vunpack.c.l.bf16 %v4854_v43 }
 0x43d   : > { %4017 = vst.msk [vmem:[%s6479_s16 + $0xd8] sm:$0xff] %vm686_vm2, %v3953_v6  ;;  %v3632_v40 = vadd.f32 %v3574_v15, %v3440_v25  ;;  %v2666_v25 = vsel %vm783_vm3, %v2595_v56, %v2506_v4  ;;  %v4775_v15 = vunpack.c.h.bf16 %v4854_v43 }
 0x43e   : > { %v2836_v45 = vpop.f32.mrf.mxu3 }
 0x43f   : > { %v3762_v14 = vadd.f32 %v6804_v19, %v3632_v40  ;;  %v3313_v28 = vrot.slane %v2836_v45, 7 }
 0x440   : > { %v3019_v29 = vpop.f32.mrf.mxu0 }
 0x441   : > { %v2504_v48 = vpop.permute.xlu0 %2503  ;;  %v3890_v7 = vadd.f32 %v4770_v9, %v3762_v14  ;;  %v3382_v1 = vsel %vm1519_vm5, %v3312_v5, %v3313_v28  ;;  %v3199_v46 = vpop.f32.mrf.mxu1 }
 0x442   : > { %v2664_v2 = vsel %vm783_vm3, %v2592_v18, %v2504_v48  ;;  %v3441_v35 = vadd.f32 %v3382_v1, %v3016_v27  ;;  %v3506_v39 = vrot.slane %v3199_v46, 1 }
 0x443   : > { %v3954_v23 = vmax.f32 %v3890_v7, 0.0  ;;  %4545 = vmatmul.msk.bf16.gmra.mxu3 %vm855_vm4, %v2664_v2  ;;  %4583 = vmatmul.msk.bf16.gmra.mxu0 %vm855_vm4, %v2664_v2  ;;  %v4855_v7 = vld [vmem:[#allocation2 + $0x90] sm:$0xff]  }
 0x444   : > { %v3573_v55 = vsel %vm1712_vm6, %v3505_v36, %v3506_v39  ;;  %4621 = vmatmul.msk.bf16.gmra.mxu1 %vm855_vm4, %v2664_v2  ;;  %v4779_v8 = vunpack.c.h.bf16 %v4855_v7 }
 0x445   : > { %4018 = vst.msk [vmem:[%s6479_s16 + $0xe0] sm:$0xff] %vm686_vm2, %v3954_v23  ;;  %v3633_v3 = vadd.f32 %v3573_v55, %v3441_v35  ;;  %v4778_v35 = vunpack.c.l.bf16 %v4855_v7  ;;  %v4898_v23 = vld [vmem:[#allocation3 + $0xc8] sm:$0xff] }
 0x446   : > { %v2839_v30 = vpop.f32.mrf.mxu3 }
 0x447   : > { %v3763_v61 = vadd.f32 %v6804_v19, %v3633_v3  ;;  %v3314_v13 = vrot.slane %v2839_v30, 7 }
 0x448   : > { %v3021_v38 = vpop.f32.mrf.mxu0 }
 0x449   : > { %v3891_v22 = vadd.f32 %v4771_v26, %v3763_v61  ;;  %v3381_v21 = vsel %vm1519_vm5, %v3313_v28, %v3314_v13  ;;  %v3201_v54 = vpop.f32.mrf.mxu1 }
 0x44a   : > { %v3442_v49 = vadd.f32 %v3381_v21, %v3019_v29  ;;  %v3507_v20 = vrot.slane %v3201_v54, 1  ;;  %v2434_v29 = vpop.permute.xlu0 %2433 }
 0x44b   : > { %v3955_v50 = vmax.f32 %v3891_v22, 0.0  ;;  %v2598_v55 = vsel %vm686_vm2, %v4898_v23, %v2434_v29 }
 0x44c   : > { %v3572_v10 = vsel %vm1712_vm6, %v3506_v39, %v3507_v20 }
 0x44d   : > { %4019 = vst.msk [vmem:[%s6479_s16 + $0xe8] sm:$0xff] %vm686_vm2, %v3955_v50  ;;  %v3634_v31 = vadd.f32 %v3572_v10, %v3442_v49 }
 0x44e   : > { %v2841_v52 = vpop.f32.mrf.mxu3 }
 0x44f   : > { %v3764_v60 = vadd.f32 %v6804_v19, %v3634_v31  ;;  %v3315_v11 = vrot.slane %v2841_v52, 7 }
 0x450   : > { %v3024_v41 = vpop.f32.mrf.mxu0 }
 0x451   : > { %v3892_v16 = vadd.f32 %v4774_v33, %v3764_v60  ;;  %v3380_v5 = vsel %vm1519_vm5, %v3314_v13, %v3315_v11  ;;  %v3204_v12 = vpop.f32.mrf.mxu1 }
 0x452   : > { %v3443_v27 = vadd.f32 %v3380_v5, %v3021_v38  ;;  %v3508_v47 = vrot.slane %v3204_v12, 1 }
 0x453   : > { %v3956_v36 = vmax.f32 %v3892_v16, 0.0  ;;  %4546 = vmatmul.msk.bf16.gmra.mxu3 %vm855_vm4, %v2666_v25  ;;  %4584 = vmatmul.msk.bf16.gmra.mxu0 %vm855_vm4, %v2666_v25  ;;  %v4856_v16 = vld [vmem:[#allocation2 + $0x98] sm:$0xff]  }
 0x454   : > { %v3571_v63 = vsel %vm1712_vm6, %v3507_v20, %v3508_v47  ;;  %4622 = vmatmul.msk.bf16.gmra.mxu1 %vm855_vm4, %v2666_v25  ;;  %v4783_v29 = vunpack.c.h.bf16 %v4856_v16 }
 0x455   : > { %4020 = vst.msk [vmem:[%s6479_s16 + $0xf0] sm:$0xff] %vm686_vm2, %v3956_v36  ;;  %v3635_v6 = vadd.f32 %v3571_v63, %v3443_v27  ;;  %v4899_v36 = vld [vmem:[#allocation3 + $0xd0] sm:$0xff] }
 0x456   : > { %v2844_v37 = vpop.f32.mrf.mxu3 }
 0x457   : > { %v3765_v40 = vadd.f32 %v6804_v19, %v3635_v6  ;;  %v3316_v9 = vrot.slane %v2844_v37, 7 }
 0x458   : > { %v3026_v45 = vpop.f32.mrf.mxu0 }
 0x459   : > { %v3893_v59 = vadd.f32 %v4775_v15, %v3765_v40  ;;  %v3379_v18 = vsel %vm1519_vm5, %v3315_v11, %v3316_v9  ;;  %v3206_v14 = vpop.f32.mrf.mxu1 }
 0x45a   : > { %v3444_v28 = vadd.f32 %v3379_v18, %v3024_v41  ;;  %v3509_v48 = vrot.slane %v3206_v14, 1  ;;  %v2436_v41 = vpop.permute.xlu2 %2435 }
 0x45b   : > { %v3957_v1 = vmax.f32 %v3893_v59, 0.0  ;;  %v2601_v63 = vsel %vm686_vm2, %v4899_v36, %v2436_v41 }
 0x45c   : > { %v3570_v46 = vsel %vm1712_vm6, %v3508_v47, %v3509_v48  ;;  %v4782_v47 = vunpack.c.l.bf16 %v4856_v16 }
 0x45d   : > { %4021 = vst.msk [vmem:[%s6479_s16 + $0xf8] sm:$0xff] %vm686_vm2, %v3957_v1  ;;  %v3636_v2 = vadd.f32 %v3570_v46, %v3444_v28 }
 0x45e   : > { %v2846_v39 = vpop.f32.mrf.mxu3 }
 0x45f   : > { %v3766_v3 = vadd.f32 %v6804_v19, %v3636_v2  ;;  %v3317_v26 = vrot.slane %v2846_v39, 7 }
 0x460   : > { %v3029_v22 = vpop.f32.mrf.mxu0 }
 0x461   : > { %v2508_v30 = vpop.permute.xlu1 %2507  ;;  %v3894_v61 = vadd.f32 %v4778_v35, %v3766_v3  ;;  %v3378_v13 = vsel %vm1519_vm5, %v3316_v9, %v3317_v26  ;;  %v3209_v21 = vpop.f32.mrf.mxu1 }
 0x462   : > { %v2668_v38 = vsel %vm783_vm3, %v2598_v55, %v2508_v30  ;;  %v3445_v54 = vadd.f32 %v3378_v13, %v3026_v45  ;;  %v3510_v49 = vrot.slane %v3209_v21, 1 }
 0x463   : > { %v3958_v20 = vmax.f32 %v3894_v61, 0.0  ;;  %4547 = vmatmul.msk.bf16.gmra.mxu3 %vm855_vm4, %v2668_v38  ;;  %4585 = vmatmul.msk.bf16.gmra.mxu0 %vm855_vm4, %v2668_v38  ;;  %v4857_v61 = vld [vmem:[#allocation2 + $0xa0] sm:$0xff]  }
 0x464   : > { %v3569_v43 = vsel %vm1712_vm6, %v3509_v48, %v3510_v49  ;;  %4623 = vmatmul.msk.bf16.gmra.mxu1 %vm855_vm4, %v2668_v38  ;;  %v4787_v41 = vunpack.c.h.bf16 %v4857_v61 }
 0x465   : > { %4022 = vst.msk [vmem:[%s6479_s16 + $0x100] sm:$0xff] %vm686_vm2, %v3958_v20  ;;  %v3637_v50 = vadd.f32 %v3569_v43, %v3445_v54  ;;  %v4786_v54 = vunpack.c.l.bf16 %v4857_v61 }
 0x466   : > { %v2849_v10 = vpop.f32.mrf.mxu3 }
 0x467   : > { %v3767_v31 = vadd.f32 %v6804_v19, %v3637_v50  ;;  %v3318_v33 = vrot.slane %v2849_v10, 7 }
 0x468   : > { %v3031_v0 = vpop.f32.mrf.mxu0 }
 0x469   : > { %v3895_v52 = vadd.f32 %v4779_v8, %v3767_v31  ;;  %v3377_v4 = vsel %vm1519_vm5, %v3317_v26, %v3318_v33  ;;  %v3211_v56 = vpop.f32.mrf.mxu1  ;;  %v2438_v13 = vpop.permute.xlu1 %2437 }
 0x46a   : > { %v3446_v60 = vadd.f32 %v3377_v4, %v3029_v22  ;;  %v3511_v11 = vrot.slane %v3211_v56, 1  ;;  %v2512_v43 = vpop.permute.xlu2 %2511 }
 0x46b   : > { %v3959_v5 = vmax.f32 %v3895_v52, 0.0 }
 0x46c   : > { %v3568_v12 = vsel %vm1712_vm6, %v3510_v49, %v3511_v11  ;;  %v4900_v49 = vld [vmem:[#allocation3 + $0xd8] sm:$0xff] }
 0x46d   : > { %4023 = vst.msk [vmem:[%s6479_s16 + $0x108] sm:$0xff] %vm686_vm2, %v3959_v5  ;;  %v3638_v27 = vadd.f32 %v3568_v12, %v3446_v60  ;;  %v2604_v20 = vsel %vm686_vm2, %v4900_v49, %v2438_v13 }
 0x46e   : > { %v2851_v25 = vpop.f32.mrf.mxu3  ;;  %v2672_v31 = vsel %vm783_vm3, %v2604_v20, %v2512_v43 }
 0x46f   : > { %v3768_v6 = vadd.f32 %v6804_v19, %v3638_v27  ;;  %v3319_v15 = vrot.slane %v2851_v25, 7 }
 0x470   : > { %v2510_v37 = vpop.permute.xlu0 %2509  ;;  %v3034_v18 = vpop.f32.mrf.mxu0 }
 0x471   : > { %v2670_v40 = vsel %vm783_vm3, %v2601_v63, %v2510_v37  ;;  %v3896_v9 = vadd.f32 %v4782_v47, %v3768_v6  ;;  %v3376_v59 = vsel %vm1519_vm5, %v3318_v33, %v3319_v15  ;;  %v3214_v45 = vpop.f32.mrf.mxu1 }
 0x472   : > { %v3447_v14 = vadd.f32 %v3376_v59, %v3031_v0  ;;  %v3512_v28 = vrot.slane %v3214_v45, 1 }
 0x473   : > { %v3960_v48 = vmax.f32 %v3896_v9, 0.0  ;;  %4548 = vmatmul.msk.bf16.gmra.mxu3 %vm855_vm4, %v2670_v40  ;;  %4586 = vmatmul.msk.bf16.gmra.mxu0 %vm855_vm4, %v2670_v40 }
 0x474   : > { %v3567_v7 = vsel %vm1712_vm6, %v3511_v11, %v3512_v28  ;;  %4624 = vmatmul.msk.bf16.gmra.mxu1 %vm855_vm4, %v2670_v40  ;;  %v4858_v40 = vld [vmem:[#allocation2 + $0xa8] sm:$0xff]  }
 0x475   : > { %4024 = vst.msk [vmem:[%s6479_s16 + $0x110] sm:$0xff] %vm686_vm2, %v3960_v48  ;;  %v3639_v1 = vadd.f32 %v3567_v7, %v3447_v14  ;;  %v4790_v14 = vunpack.c.l.bf16 %v4858_v40  ;;  %v4791_v61 = vunpack.c.h.bf16 %v4858_v40 }
 0x476   : > { %v2854_v46 = vpop.f32.mrf.mxu3 }
 0x477   : > { %v3769_v2 = vadd.f32 %v6804_v19, %v3639_v1  ;;  %v3320_v35 = vrot.slane %v2854_v46, 7 }
 0x478   : > { %v3036_v55 = vpop.f32.mrf.mxu0  ;;  %v2440_v59 = vpop.permute.xlu0 %2439 }
 0x479   : > { %v3897_v39 = vadd.f32 %v4783_v29, %v3769_v2  ;;  %v3375_v23 = vsel %vm1519_vm5, %v3319_v15, %v3320_v35  ;;  %v3216_v3 = vpop.f32.mrf.mxu1  ;;  %v2607_v48 = vsel %vm686_vm2, %v6736_v34, %v2440_v59 }
 0x47a   : > { %v3448_v26 = vadd.f32 %v3375_v23, %v3034_v18  ;;  %v3513_v30 = vrot.slane %v3216_v3, 1 }
 0x47b   : > { %v3961_v22 = vmax.f32 %v3897_v39, 0.0 }
 0x47c   : > { %v3566_v21 = vsel %vm1712_vm6, %v3512_v28, %v3513_v30 }
 0x47d   : > { %4025 = vst.msk [vmem:[%s6479_s16 + $0x118] sm:$0xff] %vm686_vm2, %v3961_v22  ;;  %v3640_v38 = vadd.f32 %v3566_v21, %v3448_v26 }
 0x47e   : > { %v2856_v50 = vpop.f32.mrf.mxu3 }
 0x47f   : > { %v3770_v8 = vadd.f32 %v6804_v19, %v3640_v38  ;;  %v3321_v10 = vrot.slane %v2856_v50, 7 }
 0x480   : > { %v3039_v4 = vpop.f32.mrf.mxu0 }
 0x481   : > { %v3898_v33 = vadd.f32 %v4786_v54, %v3770_v8  ;;  %v3374_v52 = vsel %vm1519_vm5, %v3320_v35, %v3321_v10  ;;  %v3219_v0 = vpop.f32.mrf.mxu1  ;;  %v4859_v8 = vld [vmem:[#allocation2 + $0xb0] sm:$0xff]  }
 0x482   : > { %v3449_v56 = vadd.f32 %v3374_v52, %v3036_v55  ;;  %v3514_v60 = vrot.slane %v3219_v0, 1  ;;  %v4794_v0 = vunpack.c.l.bf16 %v4859_v8 }
 0x483   : > { %v3962_v11 = vmax.f32 %v3898_v33, 0.0  ;;  %4549 = vmatmul.msk.bf16.gmra.mxu3 %vm855_vm4, %v2672_v31  ;;  %4587 = vmatmul.msk.bf16.gmra.mxu0 %vm855_vm4, %v2672_v31 }
 0x484   : > { %v3565_v16 = vsel %vm1712_vm6, %v3513_v30, %v3514_v60  ;;  %4625 = vmatmul.msk.bf16.gmra.mxu1 %vm855_vm4, %v2672_v31  ;;  %v2442_v31 = vpop.permute.xlu2 %2441 }
 0x485   : > { %4026 = vst.msk [vmem:[%s6479_s16 + $0x120] sm:$0xff] %vm686_vm2, %v3962_v11  ;;  %v3641_v5 = vadd.f32 %v3565_v16, %v3449_v56  ;;  %v2610_v52 = vsel %vm686_vm2, %v6777_v53, %v2442_v31 }
 0x486   : > { %v2859_v12 = vpop.f32.mrf.mxu3 }
 0x487   : > { %v3771_v27 = vadd.f32 %v6804_v19, %v3641_v5  ;;  %v3322_v47 = vrot.slane %v2859_v12, 7 }
 0x488   : > { %v3041_v63 = vpop.f32.mrf.mxu0 }
 0x489   : > { %v3899_v25 = vadd.f32 %v4787_v41, %v3771_v27  ;;  %v3373_v36 = vsel %vm1519_vm5, %v3321_v10, %v3322_v47  ;;  %v3221_v6 = vpop.f32.mrf.mxu1 }
 0x48a   : > { %v3450_v15 = vadd.f32 %v3373_v36, %v3039_v4  ;;  %v3515_v37 = vrot.slane %v3221_v6, 1 }
 0x48b   : > { %v3963_v9 = vmax.f32 %v3899_v25, 0.0 }
 0x48c   : > { %v3564_v18 = vsel %vm1712_vm6, %v3514_v60, %v3515_v37 }
 0x48d   : > { %4027 = vst.msk [vmem:[%s6479_s16 + $0x128] sm:$0xff] %vm686_vm2, %v3963_v9  ;;  %v3642_v45 = vadd.f32 %v3564_v18, %v3450_v15  ;;  %v4795_v15 = vunpack.c.h.bf16 %v4859_v8 }
 0x48e   : > { %v2861_v28 = vpop.f32.mrf.mxu3 }
 0x48f   : > { %v3772_v7 = vadd.f32 %v6804_v19, %v3642_v45  ;;  %v3323_v1 = vrot.slane %v2861_v28, 7 }
 0x490   : > { %v2514_v29 = vpop.permute.xlu1 %2513  ;;  %v3044_v39 = vpop.f32.mrf.mxu0 }
 0x491   : > { %v2674_v46 = vsel %vm783_vm3, %v2607_v48, %v2514_v29  ;;  %v3900_v2 = vadd.f32 %v4790_v14, %v3772_v7  ;;  %v3372_v35 = vsel %vm1519_vm5, %v3322_v47, %v3323_v1  ;;  %v3224_v23 = vpop.f32.mrf.mxu1  ;;  %v4860_v7 = vld [vmem:[#allocation2 + $0xb8] sm:$0xff]  }
 0x492   : > { %v3451_v55 = vadd.f32 %v3372_v35, %v3041_v63  ;;  %v3516_v3 = vrot.slane %v3224_v23, 1  ;;  %v4798_v35 = vunpack.c.l.bf16 %v4860_v7 }
 0x493   : > { %v3964_v26 = vmax.f32 %v3900_v2, 0.0  ;;  %4550 = vmatmul.msk.bf16.gmra.mxu3 %vm855_vm4, %v2674_v46  ;;  %4588 = vmatmul.msk.bf16.gmra.mxu0 %vm855_vm4, %v2674_v46 }
 0x494   : > { %v3563_v34 = vsel %vm1712_vm6, %v3515_v37, %v3516_v3  ;;  %4626 = vmatmul.msk.bf16.gmra.mxu1 %vm855_vm4, %v2674_v46 }
 0x495   : > { %4028 = vst.msk [vmem:[%s6479_s16 + $0x130] sm:$0xff] %vm686_vm2, %v3964_v26  ;;  %v3643_v30 = vadd.f32 %v3563_v34, %v3451_v55  ;;  %v2518_v55 = vpop.permute.xlu2 %2517 }
 0x496   : > { %v2864_v13 = vpop.f32.mrf.mxu3 }
 0x497   : > { %v3773_v22 = vadd.f32 %v6804_v19, %v3643_v30  ;;  %v3324_v21 = vrot.slane %v2864_v13, 7 }
 0x498   : > { %v3046_v49 = vpop.f32.mrf.mxu0  ;;  %v2444_v29 = vpop.permute.xlu1 %2443 }
 0x499   : > { %v3901_v38 = vadd.f32 %v4791_v61, %v3773_v22  ;;  %v3371_v54 = vsel %vm1519_vm5, %v3323_v1, %v3324_v21  ;;  %v3226_v20 = vpop.f32.mrf.mxu1  ;;  %v2613_v23 = vsel %vm686_vm2, %v6817_v17, %v2444_v29 }
 0x49a   : > { %v3452_v43 = vadd.f32 %v3371_v54, %v3044_v39  ;;  %v3517_v50 = vrot.slane %v3226_v20, 1  ;;  %v2678_v22 = vsel %vm783_vm3, %v2613_v23, %v2518_v55  ;;  %v4799_v20 = vunpack.c.h.bf16 %v4860_v7 }
 0x49b   : > { %v3965_v10 = vmax.f32 %v3901_v38, 0.0  ;;  %v2516_v56 = vpop.permute.xlu0 %2515 }
 0x49c   : > { %v3562_v33 = vsel %vm1712_vm6, %v3516_v3, %v3517_v50  ;;  %v2676_v5 = vsel %vm783_vm3, %v2610_v52, %v2516_v56  ;;  %v4861_v56 = vld [vmem:[#allocation2 + $0xc0] sm:$0xff]  }
 0x49d   : > { %4029 = vst.msk [vmem:[%s6479_s16 + $0x138] sm:$0xff] %vm686_vm2, %v3965_v10  ;;  %v3644_v4 = vadd.f32 %v3562_v33, %v3452_v43 }
 0x49e   : > { %v2866_v60 = vpop.f32.mrf.mxu3 }
 0x49f   : > { %v3774_v11 = vadd.f32 %v6804_v19, %v3644_v4  ;;  %v3325_v16 = vrot.slane %v2866_v60, 7 }
 0x4a0   : > { %v3049_v27 = vpop.f32.mrf.mxu0 }
 0x4a1   : > { %v3902_v41 = vadd.f32 %v4794_v0, %v3774_v11  ;;  %v3370_v12 = vsel %vm1519_vm5, %v3324_v21, %v3325_v16  ;;  %v3229_v47 = vpop.f32.mrf.mxu1 }
 0x4a2   : > { %v3453_v25 = vadd.f32 %v3370_v12, %v3046_v49  ;;  %v3518_v36 = vrot.slane %v3229_v47, 1  ;;  %v2520_v12 = vpop.permute.xlu1 %2519  ;;  %v7108_v47 = vld [vmem:[%s7267_s3 + $0x1] ss:$0 sm:$0xff] }
 0x4a3   : > { %v3966_v63 = vmax.f32 %v3902_v41, 0.0  ;;  %4551 = vmatmul.msk.bf16.gmra.mxu3 %vm855_vm4, %v2676_v5  ;;  %4589 = vmatmul.msk.bf16.gmra.mxu0 %vm855_vm4, %v2676_v5  ;;  %v2446_v60 = vpop.permute.xlu0 %2445  ;;  %v4802_v41 = vunpack.c.l.bf16 %v4861_v56 }
 0x4a4   : > { %v3561_v53 = vsel %vm1712_vm6, %v3517_v50, %v3518_v36  ;;  %4627 = vmatmul.msk.bf16.gmra.mxu1 %vm855_vm4, %v2676_v5 }
 0x4a5   : > { %4030 = vst.msk [vmem:[%s6479_s16 + $0x140] sm:$0xff] %vm686_vm2, %v3966_v63  ;;  %v3645_v6 = vadd.f32 %v3561_v53, %v3453_v25 }
 0x4a6   : > { %v2869_v37 = vpop.f32.mrf.mxu3 }
 0x4a7   : > { %v3775_v40 = vadd.f32 %v6804_v19, %v3645_v6  ;;  %v3326_v9 = vrot.slane %v2869_v37, 7 }
 0x4a8   : > { %v3051_v45 = vpop.f32.mrf.mxu0 }
 0x4a9   : > { %v3903_v59 = vadd.f32 %v4795_v15, %v3775_v40  ;;  %v3369_v18 = vsel %vm1519_vm5, %v3325_v16, %v3326_v9  ;;  %v3231_v14 = vpop.f32.mrf.mxu1 }
 0x4aa   : > { %v3454_v28 = vadd.f32 %v3369_v18, %v3049_v27  ;;  %v3519_v48 = vrot.slane %v3231_v14, 1 }
 0x4ab   : > { %v3967_v1 = vmax.f32 %v3903_v59, 0.0 }
 0x4ac   : > { %v3560_v46 = vsel %vm1712_vm6, %v3518_v36, %v3519_v48 }
 0x4ad   : > { %4031 = vst.msk [vmem:[%s6479_s16 + $0x148] sm:$0xff] %vm686_vm2, %v3967_v1  ;;  %v3646_v2 = vadd.f32 %v3560_v46, %v3454_v28 }
 0x4ae   : > { %v2871_v39 = vpop.f32.mrf.mxu3 }
 0x4af   : > { %v3776_v3 = vadd.f32 %v6804_v19, %v3646_v2  ;;  %v3327_v26 = vrot.slane %v2871_v39, 7  ;;  %v4862_v39 = vld [vmem:[#allocation2 + $0xc8] sm:$0xff]  }
 0x4b0   : > { %v3054_v61 = vpop.f32.mrf.mxu0 }
 0x4b1   : > { %v3904_v34 = vadd.f32 %v4798_v35, %v3776_v3  ;;  %v3368_v30 = vsel %vm1519_vm5, %v3326_v9, %v3327_v26  ;;  %v3234_v13 = vpop.f32.mrf.mxu1 }
 0x4b2   : > { %v3455_v21 = vadd.f32 %v3368_v30, %v3051_v45  ;;  %v3520_v38 = vrot.slane %v3234_v13, 1  ;;  %v4803_v45 = vunpack.c.h.bf16 %v4861_v56 }
 0x4b3   : > { %v3968_v54 = vmax.f32 %v3904_v34, 0.0  ;;  %4552 = vmatmul.msk.bf16.gmra.mxu3 %vm855_vm4, %v2678_v22  ;;  %4590 = vmatmul.msk.bf16.gmra.mxu0 %vm855_vm4, %v2678_v22 }
 0x4b4   : > { %v3559_v17 = vsel %vm1712_vm6, %v3519_v48, %v3520_v38  ;;  %4628 = vmatmul.msk.bf16.gmra.mxu1 %vm855_vm4, %v2678_v22 }
 0x4b5   : > { %4032 = vst.msk [vmem:[%s6479_s16 + $0x150] sm:$0xff] %vm686_vm2, %v3968_v54  ;;  %v3647_v49 = vadd.f32 %v3559_v17, %v3455_v21 }
 0x4b6   : > { %v2874_v43 = vpop.f32.mrf.mxu3 }
 0x4b7   : > { %v3777_v50 = vadd.f32 %v6804_v19, %v3647_v49  ;;  %v3328_v8 = vrot.slane %v2874_v43, 7  ;;  %v2616_v19 = vsel %vm686_vm2, %v6860_v24, %v2446_v60 }
 0x4b8   : > { %v3056_v33 = vpop.f32.mrf.mxu0  ;;  %v2680_v63 = vsel %vm783_vm3, %v2616_v19, %v2520_v12 }
 0x4b9   : > { %v3905_v10 = vadd.f32 %v4799_v20, %v3777_v50  ;;  %v3367_v31 = vsel %vm1519_vm5, %v3327_v26, %v3328_v8  ;;  %v3236_v52 = vpop.f32.mrf.mxu1  ;;  %v4806_v26 = vunpack.c.l.bf16 %v4862_v39  ;;  %v4807_v50 = vunpack.c.h.bf16 %v4862_v39 }
 0x4ba   : > { %v3456_v4 = vadd.f32 %v3367_v31, %v3054_v61  ;;  %v3521_v0 = vrot.slane %v3236_v52, 1 }
 0x4bb   : > { %v3969_v11 = vmax.f32 %v3905_v10, 0.0 }
 0x4bc   : > { %v3558_v16 = vsel %vm1712_vm6, %v3520_v38, %v3521_v0 }
 0x4bd   : > { %4033 = vst.msk [vmem:[%s6479_s16 + $0x158] sm:$0xff] %vm686_vm2, %v3969_v11  ;;  %v3648_v5 = vadd.f32 %v3558_v16, %v3456_v4  ;;  %v4863_v11 = vld [vmem:[#allocation2 + $0xd0] sm:$0xff]  }
 0x4be   : > { %v2876_v27 = vpop.f32.mrf.mxu3  ;;  %v4810_v19 = vunpack.c.l.bf16 %v4863_v11 }
 0x4bf   : > { %v3778_v25 = vadd.f32 %v7108_v47, %v3648_v5  ;;  %v3329_v36 = vrot.slane %v2876_v27, 7 }
 0x4c0   : > { %v3059_v15 = vpop.f32.mrf.mxu0 }
 0x4c1   : > { %v3906_v53 = vadd.f32 %v4802_v41, %v3778_v25  ;;  %v3366_v6 = vsel %vm1519_vm5, %v3328_v8, %v3329_v36  ;;  %v3239_v37 = vpop.f32.mrf.mxu1 }
 0x4c2   : > { %v3457_v24 = vadd.f32 %v3366_v6, %v3056_v33  ;;  %v3522_v40 = vrot.slane %v3239_v37, 1 }
 0x4c3   : > { %v3970_v9 = vmax.f32 %v3906_v53, 0.0  ;;  %4553 = vmatmul.msk.bf16.gmra.mxu3 %vm855_vm4, %v2680_v63  ;;  %4591 = vmatmul.msk.bf16.gmra.mxu0 %vm855_vm4, %v2680_v63 }
 0x4c4   : > { %v3557_v59 = vsel %vm1712_vm6, %v3521_v0, %v3522_v40  ;;  %4629 = vmatmul.msk.bf16.gmra.mxu1 %vm855_vm4, %v2680_v63 }
 0x4c5   : > { %4034 = vst.msk [vmem:[%s6479_s16 + $0x160] sm:$0xff] %vm686_vm2, %v3970_v9  ;;  %v3649_v18 = vadd.f32 %v3557_v59, %v3457_v24  ;;  %v4811_v59 = vunpack.c.h.bf16 %v4863_v11 }
 0x4c6   : > { %v2879_v14 = vpop.f32.mrf.mxu3 }
 0x4c7   : > { %v3779_v28 = vadd.f32 %v7108_v47, %v3649_v18  ;;  %v3330_v48 = vrot.slane %v2879_v14, 7 }
 0x4c8   : > { %v3061_v29 = vpop.f32.mrf.mxu0 }
 0x4c9   : > { %v3907_v7 = vadd.f32 %v4803_v45, %v3779_v28  ;;  %v3365_v1 = vsel %vm1519_vm5, %v3329_v36, %v3330_v48  ;;  %v3241_v46 = vpop.f32.mrf.mxu1 }
 0x4ca   : > { %v3458_v2 = vadd.f32 %v3365_v1, %v3059_v15  ;;  %v3523_v35 = vrot.slane %v3241_v46, 1 }
 0x4cb   : > { %v3971_v23 = vmax.f32 %v3907_v7, 0.0 }
 0x4cc   : > { %v3556_v55 = vsel %vm1712_vm6, %v3522_v40, %v3523_v35 }
 0x4cd   : > { %4035 = vst.msk [vmem:[%s6479_s16 + $0x168] sm:$0xff] %vm686_vm2, %v3971_v23  ;;  %v3650_v3 = vadd.f32 %v3556_v55, %v3458_v2  ;;  %v4864_v2 = vld [vmem:[#allocation2 + $0xd8] sm:$0xff]  }
 0x4ce   : > { %v2881_v34 = vpop.f32.mrf.mxu3  ;;  %v4814_v55 = vunpack.c.l.bf16 %v4864_v2 }
 0x4cf   : > { %v3780_v30 = vadd.f32 %v7108_v47, %v3650_v3  ;;  %v3331_v61 = vrot.slane %v2881_v34, 7 }
 0x4d0   : > { %v3064_v21 = vpop.f32.mrf.mxu0 }
 0x4d1   : > { %v3908_v13 = vadd.f32 %v4806_v26, %v3780_v30  ;;  %v3364_v22 = vsel %vm1519_vm5, %v3330_v48, %v3331_v61  ;;  %v3244_v38 = vpop.f32.mrf.mxu1 }
 0x4d2   : > { %v3459_v54 = vadd.f32 %v3364_v22, %v3061_v29  ;;  %v3524_v17 = vrot.slane %v3244_v38, 1 }
 0x4d3   : > { %v3972_v49 = vmax.f32 %v3908_v13, 0.0 }
 0x4d4   : > { %v3555_v20 = vsel %vm1712_vm6, %v3523_v35, %v3524_v17 }
 0x4d5   : > { %4036 = vst.msk [vmem:[%s6479_s16 + $0x170] sm:$0xff] %vm686_vm2, %v3972_v49  ;;  %v3651_v43 = vadd.f32 %v3555_v20, %v3459_v54  ;;  %v4815_v20 = vunpack.c.h.bf16 %v4864_v2 }
 0x4d6   : > { %v2884_v8 = vpop.f32.mrf.mxu3 }
 0x4d7   : > { %v3781_v10 = vadd.f32 %v7108_v47, %v3651_v43  ;;  %v3332_v31 = vrot.slane %v2884_v8, 7 }
 0x4d8   : > { %v3066_v4 = vpop.f32.mrf.mxu0 }
 0x4d9   : > { %v3909_v33 = vadd.f32 %v4807_v50, %v3781_v10  ;;  %v3363_v52 = vsel %vm1519_vm5, %v3331_v61, %v3332_v31  ;;  %v3246_v0 = vpop.f32.mrf.mxu1 }
 0x4da   : > { %v3460_v56 = vadd.f32 %v3363_v52, %v3064_v21  ;;  %v3525_v60 = vrot.slane %v3246_v0, 1 }
 0x4db   : > { %v3973_v16 = vmax.f32 %v3909_v33, 0.0 }
 0x4dc   : > { %v3554_v5 = vsel %vm1712_vm6, %v3524_v17, %v3525_v60 }
 0x4dd   : > { %4037 = vst.msk [vmem:[%s6479_s16 + $0x178] sm:$0xff] %vm686_vm2, %v3973_v16  ;;  %v3652_v41 = vadd.f32 %v3554_v5, %v3460_v56  ;;  %v4865_v56 = vld [vmem:[#allocation2 + $0xe0] sm:$0xff]  }
 0x4de   : > { %v2886_v12 = vpop.f32.mrf.mxu3  ;;  %v4818_v5 = vunpack.c.l.bf16 %v4865_v56 }
 0x4df   : > { %v3782_v27 = vadd.f32 %v7108_v47, %v3652_v41  ;;  %v3333_v25 = vrot.slane %v2886_v12, 7 }
 0x4e0   : > { %v3069_v53 = vpop.f32.mrf.mxu0 }
 0x4e1   : > { %v3910_v36 = vadd.f32 %v4810_v19, %v3782_v27  ;;  %v3362_v63 = vsel %vm1519_vm5, %v3332_v31, %v3333_v25  ;;  %v3249_v6 = vpop.f32.mrf.mxu1 }
 0x4e2   : > { %v3461_v15 = vadd.f32 %v3362_v63, %v3066_v4  ;;  %v3526_v37 = vrot.slane %v3249_v6, 1 }
 0x4e3   : > { %v3974_v24 = vmax.f32 %v3910_v36, 0.0 }
 0x4e4   : > { %v3553_v40 = vsel %vm1712_vm6, %v3525_v60, %v3526_v37 }
 0x4e5   : > { %4038 = vst.msk [vmem:[%s6479_s16 + $0x180] sm:$0xff] %vm686_vm2, %v3974_v24  ;;  %v3653_v9 = vadd.f32 %v3553_v40, %v3461_v15  ;;  %v4819_v40 = vunpack.c.h.bf16 %v4865_v56 }
 0x4e6   : > { %v2889_v18 = vpop.f32.mrf.mxu3 }
 0x4e7   : > { %v3783_v45 = vadd.f32 %v7108_v47, %v3653_v9  ;;  %v3334_v14 = vrot.slane %v2889_v18, 7 }
 0x4e8   : > { %v3071_v7 = vpop.f32.mrf.mxu0 }
 0x4e9   : > { %v3911_v28 = vadd.f32 %v4811_v59, %v3783_v45  ;;  %v3361_v48 = vsel %vm1519_vm5, %v3333_v25, %v3334_v14  ;;  %v3251_v1 = vpop.f32.mrf.mxu1 }
 0x4ea   : > { %v3462_v29 = vadd.f32 %v3361_v48, %v3069_v53  ;;  %v3527_v46 = vrot.slane %v3251_v1, 1 }
 0x4eb   : > { %v3975_v35 = vmax.f32 %v3911_v28, 0.0 }
 0x4ec   : > { %v3552_v39 = vsel %vm1712_vm6, %v3526_v37, %v3527_v46 }
 0x4ed   : > { %4039 = vst.msk [vmem:[%s6479_s16 + $0x188] sm:$0xff] %vm686_vm2, %v3975_v35  ;;  %v3654_v23 = vadd.f32 %v3552_v39, %v3462_v29  ;;  %v4866_v29 = vld [vmem:[#allocation2 + $0xe8] sm:$0xff]  }
 0x4ee   : > { %v2891_v3 = vpop.f32.mrf.mxu3  ;;  %v4822_v39 = vunpack.c.l.bf16 %v4866_v29 }
 0x4ef   : > { %v3784_v26 = vadd.f32 %v7108_v47, %v3654_v23  ;;  %v3335_v34 = vrot.slane %v2891_v3, 7 }
 0x4f0   : > { %v3074_v13 = vpop.f32.mrf.mxu0 }
 0x4f1   : > { %v3912_v30 = vadd.f32 %v4814_v55, %v3784_v26  ;;  %v3360_v61 = vsel %vm1519_vm5, %v3334_v14, %v3335_v34  ;;  %v3254_v22 = vpop.f32.mrf.mxu1 }
 0x4f2   : > { %v3463_v21 = vadd.f32 %v3360_v61, %v3071_v7  ;;  %v3528_v38 = vrot.slane %v3254_v22, 1 }
 0x4f3   : > { %v3976_v54 = vmax.f32 %v3912_v30, 0.0 }
 0x4f4   : > { %v3551_v17 = vsel %vm1712_vm6, %v3527_v46, %v3528_v38 }
 0x4f5   : > { %4040 = vst.msk [vmem:[%s6479_s16 + $0x190] sm:$0xff] %vm686_vm2, %v3976_v54  ;;  %v3655_v49 = vadd.f32 %v3551_v17, %v3463_v21  ;;  %v4823_v17 = vunpack.c.h.bf16 %v4866_v29 }
 0x4f6   : > { %v2894_v43 = vpop.f32.mrf.mxu3 }
 0x4f7   : > { %v3785_v50 = vadd.f32 %v7108_v47, %v3655_v49  ;;  %v3336_v8 = vrot.slane %v2894_v43, 7 }
 0x4f8   : > { %v3076_v33 = vpop.f32.mrf.mxu0 }
 0x4f9   : > { %v3913_v10 = vadd.f32 %v4815_v20, %v3785_v50  ;;  %v3359_v31 = vsel %vm1519_vm5, %v3335_v34, %v3336_v8  ;;  %v3256_v52 = vpop.f32.mrf.mxu1 }
 0x4fa   : > { %v3464_v4 = vadd.f32 %v3359_v31, %v3074_v13  ;;  %v3529_v0 = vrot.slane %v3256_v52, 1 }
 0x4fb   : > { %v3977_v60 = vmax.f32 %v3913_v10, 0.0 }
 0x4fc   : > { %v3550_v11 = vsel %vm1712_vm6, %v3528_v38, %v3529_v0 }
 0x4fd   : > { %4041 = vst.msk [vmem:[%s6479_s16 + $0x198] sm:$0xff] %vm686_vm2, %v3977_v60  ;;  %v3656_v16 = vadd.f32 %v3550_v11, %v3464_v4  ;;  %v4867_v4 = vld [vmem:[#allocation2 + $0xf0] sm:$0xff]  }
 0x4fe   : > { %v2896_v41 = vpop.f32.mrf.mxu3  ;;  %v4826_v11 = vunpack.c.l.bf16 %v4867_v4 }
 0x4ff   : > { %v3786_v19 = vadd.f32 %v7108_v47, %v3656_v16  ;;  %v3337_v12 = vrot.slane %v2896_v41, 7 }
 0x500   : > { %v3079_v36 = vpop.f32.mrf.mxu0 }
 0x501   : > { %v3914_v27 = vadd.f32 %v4818_v5, %v3786_v19  ;;  %v3358_v25 = vsel %vm1519_vm5, %v3336_v8, %v3337_v12  ;;  %v3259_v63 = vpop.f32.mrf.mxu1 }
 0x502   : > { %v3465_v53 = vadd.f32 %v3358_v25, %v3076_v33  ;;  %v3530_v6 = vrot.slane %v3259_v63, 1 }
 0x503   : > { %v3978_v15 = vmax.f32 %v3914_v27, 0.0 }
 0x504   : > { %v3549_v37 = vsel %vm1712_vm6, %v3529_v0, %v3530_v6 }
 0x505   : > { %4042 = vst.msk [vmem:[%s6479_s16 + $0x1a0] sm:$0xff] %vm686_vm2, %v3978_v15  ;;  %v3657_v24 = vadd.f32 %v3549_v37, %v3465_v53  ;;  %v4827_v37 = vunpack.c.h.bf16 %v4867_v4 }
 0x506   : > { %v2899_v9 = vpop.f32.mrf.mxu3 }
 0x507   : > { %v3787_v59 = vadd.f32 %v7108_v47, %v3657_v24  ;;  %v3338_v18 = vrot.slane %v2899_v9, 7 }
 0x508   : > { %v3081_v28 = vpop.f32.mrf.mxu0 }
 0x509   : > { %v3915_v45 = vadd.f32 %v4819_v40, %v3787_v59  ;;  %v3357_v14 = vsel %vm1519_vm5, %v3337_v12, %v3338_v18  ;;  %v3261_v48 = vpop.f32.mrf.mxu1 }
 0x50a   : > { %v3466_v7 = vadd.f32 %v3357_v14, %v3079_v36  ;;  %v3531_v1 = vrot.slane %v3261_v48, 1 }
 0x50b   : > { %v3979_v46 = vmax.f32 %v3915_v45, 0.0 }
 0x50c   : > { %v3548_v2 = vsel %vm1712_vm6, %v3530_v6, %v3531_v1 }
 0x50d   : > { %4043 = vst.msk [vmem:[%s6479_s16 + $0x1a8] sm:$0xff] %vm686_vm2, %v3979_v46  ;;  %v3658_v35 = vadd.f32 %v3548_v2, %v3466_v7  ;;  %v4868_v7 = vld [vmem:[#allocation2 + $0xf8] sm:$0xff]  }
 0x50e   : > { %v2901_v23 = vpop.f32.mrf.mxu3  ;;  %v4830_v2 = vunpack.c.l.bf16 %v4868_v7 }
 0x50f   : > { %v3788_v55 = vadd.f32 %v7108_v47, %v3658_v35  ;;  %v3339_v3 = vrot.slane %v2901_v23, 7 }
 0x510   : > { %v3084_v30 = vpop.f32.mrf.mxu0 }
 0x511   : > { %v3916_v26 = vadd.f32 %v4822_v39, %v3788_v55  ;;  %v3356_v34 = vsel %vm1519_vm5, %v3338_v18, %v3339_v3  ;;  %v3264_v61 = vpop.f32.mrf.mxu1 }
 0x512   : > { %v3467_v13 = vadd.f32 %v3356_v34, %v3081_v28  ;;  %v3532_v22 = vrot.slane %v3264_v61, 1 }
 0x513   : > { %v3980_v21 = vmax.f32 %v3916_v26, 0.0 }
 0x514   : > { %v3547_v38 = vsel %vm1712_vm6, %v3531_v1, %v3532_v22 }
 0x515   : > { %4044 = vst.msk [vmem:[%s6479_s16 + $0x1b0] sm:$0xff] %vm686_vm2, %v3980_v21  ;;  %v3659_v54 = vadd.f32 %v3547_v38, %v3467_v13  ;;  %v4831_v38 = vunpack.c.h.bf16 %v4868_v7 }
 0x516   : > { %v2904_v49 = vpop.f32.mrf.mxu3 }
 0x517   : > { %v3789_v20 = vadd.f32 %v7108_v47, %v3659_v54  ;;  %v3340_v43 = vrot.slane %v2904_v49, 7 }
 0x518   : > { %v3086_v10 = vpop.f32.mrf.mxu0 }
 0x519   : > { %v3917_v50 = vadd.f32 %v4823_v17, %v3789_v20  ;;  %v3355_v8 = vsel %vm1519_vm5, %v3339_v3, %v3340_v43  ;;  %v3266_v31 = vpop.f32.mrf.mxu1 }
 0x51a   : > { %v3468_v33 = vadd.f32 %v3355_v8, %v3084_v30  ;;  %v3533_v52 = vrot.slane %v3266_v31, 1  ;;  %v4869_v31 = vld [vmem:[#allocation2 + $0x100] sm:$0xff]  }
 0x51b   : > { %v3981_v0 = vmax.f32 %v3917_v50, 0.0 }
 0x51c   : > { %v3546_v56 = vsel %vm1712_vm6, %v3532_v22, %v3533_v52 }
 0x51d   : > { %4045 = vst.msk [vmem:[%s6479_s16 + $0x1b8] sm:$0xff] %vm686_vm2, %v3981_v0  ;;  %v3660_v60 = vadd.f32 %v3546_v56, %v3468_v33  ;;  %v4834_v56 = vunpack.c.l.bf16 %v4869_v31 }
 0x51e   : > { %v2906_v16 = vpop.f32.mrf.mxu3 }
 0x51f   : > { %v3790_v5 = vadd.f32 %v7108_v47, %v3660_v60  ;;  %v3341_v41 = vrot.slane %v2906_v16, 7 }
 0x520   : > { %v3089_v27 = vpop.f32.mrf.mxu0 }
 0x521   : > { %v3918_v19 = vadd.f32 %v4826_v11, %v3790_v5  ;;  %v3354_v12 = vsel %vm1519_vm5, %v3340_v43, %v3341_v41  ;;  %v3269_v25 = vpop.f32.mrf.mxu1 }
 0x522   : > { %v3469_v36 = vadd.f32 %v3354_v12, %v3086_v10  ;;  %v3534_v63 = vrot.slane %v3269_v25, 1 }
 0x523   : > { %v3982_v53 = vmax.f32 %v3918_v19, 0.0 }
 0x524   : > { %v3545_v6 = vsel %vm1712_vm6, %v3533_v52, %v3534_v63 }
 0x525   : > { %4046 = vst.msk [vmem:[%s6479_s16 + $0x1c0] sm:$0xff] %vm686_vm2, %v3982_v53  ;;  %v3661_v15 = vadd.f32 %v3545_v6, %v3469_v36  ;;  %v4835_v53 = vunpack.c.h.bf16 %v4869_v31 }
 0x526   : > { %v2909_v24 = vpop.f32.mrf.mxu3 }
 0x527   : > { %v3791_v40 = vadd.f32 %v7108_v47, %v3661_v15  ;;  %v3342_v9 = vrot.slane %v2909_v24, 7 }
 0x528   : > { %v3091_v45 = vpop.f32.mrf.mxu0 }
 0x529   : > { %v3919_v59 = vadd.f32 %v4827_v37, %v3791_v40  ;;  %v3353_v18 = vsel %vm1519_vm5, %v3341_v41, %v3342_v9  ;;  %v3271_v14 = vpop.f32.mrf.mxu1 }
 0x52a   : > { %v3470_v28 = vadd.f32 %v3353_v18, %v3089_v27  ;;  %v3535_v48 = vrot.slane %v3271_v14, 1  ;;  %v4870_v14 = vld [vmem:[#allocation2 + $0x108] sm:$0xff]  }
 0x52b   : > { %v3983_v1 = vmax.f32 %v3919_v59, 0.0  ;;  %v4839_v44 = vunpack.c.h.bf16 %v4870_v14 }
 0x52c   : > { %v3544_v29 = vsel %vm1712_vm6, %v3534_v63, %v3535_v48 }
 0x52d   : > { %4047 = vst.msk [vmem:[%s6479_s16 + $0x1c8] sm:$0xff] %vm686_vm2, %v3983_v1  ;;  %v3662_v46 = vadd.f32 %v3544_v29, %v3470_v28  ;;  %v4838_v1 = vunpack.c.l.bf16 %v4870_v14 }
 0x52e   : > { %v2911_v35 = vpop.f32.mrf.mxu3 }
 0x52f   : > { %v3792_v39 = vadd.f32 %v7108_v47, %v3662_v46  ;;  %v3343_v23 = vrot.slane %v2911_v35, 7 }
 0x530   : > { %v3094_v13 = vpop.f32.mrf.mxu0 }
 0x531   : > { %v3920_v55 = vadd.f32 %v4830_v2, %v3792_v39  ;;  %v3352_v3 = vsel %vm1519_vm5, %v3342_v9, %v3343_v23  ;;  %v3274_v26 = vpop.f32.mrf.mxu1 }
 0x532   : > { %v3471_v34 = vadd.f32 %v3352_v3, %v3091_v45  ;;  %v3536_v30 = vrot.slane %v3274_v26, 1 }
 0x533   : > { %v3984_v61 = vmax.f32 %v3920_v55, 0.0 }
 0x534   : > { %v3543_v22 = vsel %vm1712_vm6, %v3535_v48, %v3536_v30 }
 0x535   : > { %4048 = vst.msk [vmem:[%s6479_s16 + $0x1d0] sm:$0xff] %vm686_vm2, %v3984_v61  ;;  %v3663_v21 = vadd.f32 %v3543_v22, %v3471_v34  ;;  %v4902_v22 = vld [vmem:[#allocation2 + $0x10] sm:$0xff]  }
 0x536   : > { %v2914_v54 = vpop.f32.mrf.mxu3 }
 0x537   : > { %v3793_v17 = vadd.f32 %v7108_v47, %v3663_v21  ;;  %v3344_v49 = vrot.slane %v2914_v54, 7  ;;  %v4714_v21 = vunpack.c.l.bf16 %v4902_v22 }
 0x538   : > { %v3096_v4 = vpop.f32.mrf.mxu0 }
 0x539   : > { %v3921_v20 = vadd.f32 %v4831_v38, %v3793_v17  ;;  %v3351_v43 = vsel %vm1519_vm5, %v3343_v23, %v3344_v49  ;;  %v3276_v50 = vpop.f32.mrf.mxu1 }
 0x53a   : > { %v3472_v8 = vadd.f32 %v3351_v43, %v3094_v13  ;;  %v3537_v10 = vrot.slane %v3276_v50, 1 }
 0x53b   : > { %v3985_v33 = vmax.f32 %v3921_v20, 0.0 }
 0x53c   : > { %v3542_v52 = vsel %vm1712_vm6, %v3536_v30, %v3537_v10 }
 0x53d   : > { %4049 = vst.msk [vmem:[%s6479_s16 + $0x1d8] sm:$0xff] %vm686_vm2, %v3985_v33  ;;  %v3664_v0 = vadd.f32 %v3542_v52, %v3472_v8 }
 0x53e   : > { %v2916_v60 = vpop.f32.mrf.mxu3 }
 0x53f   : > { %v3794_v11 = vadd.f32 %v7108_v47, %v3664_v0  ;;  %v3345_v16 = vrot.slane %v2916_v60, 7 }
 0x540   : > { %v3099_v15 = vpop.f32.mrf.mxu0 }
 0x541   : > { %v3922_v5 = vadd.f32 %v4834_v56, %v3794_v11  ;;  %v3350_v41 = vsel %vm1519_vm5, %v3344_v49, %v3345_v16  ;;  %v3279_v19 = vpop.f32.mrf.mxu1 }
 0x542   : > { %v3473_v12 = vadd.f32 %v3350_v41, %v3096_v4  ;;  %v3538_v27 = vrot.slane %v3279_v19, 1 }
 0x543   : > { %v3986_v25 = vmax.f32 %v3922_v5, 0.0 }
 0x544   : > { %v3541_v36 = vsel %vm1712_vm6, %v3537_v10, %v3538_v27 }
 0x545   : > { %4050 = vst.msk [vmem:[%s6479_s16 + $0x1e0] sm:$0xff] %vm686_vm2, %v3986_v25  ;;  %v3665_v63 = vadd.f32 %v3541_v36, %v3473_v12 }
 0x546   : > { %v2919_v6 = vpop.f32.mrf.mxu3 }
 0x547   : > { %v3795_v37 = vadd.f32 %v7108_v47, %v3665_v63  ;;  %v3346_v24 = vrot.slane %v2919_v6, 7 }
 0x548   : > { %v3101_v35 = vpop.f32.mrf.mxu0 }
 0x549   : > { %v3923_v40 = vadd.f32 %v4835_v53, %v3795_v37  ;;  %v3349_v9 = vsel %vm1519_vm5, %v3345_v16, %v3346_v24  ;;  %v3281_v59 = vpop.f32.mrf.mxu1 }
 0x54a   : > { %v3474_v18 = vadd.f32 %v3349_v9, %v3099_v15  ;;  %v3539_v45 = vrot.slane %v3281_v59, 1 }
 0x54b   : > { %v3987_v28 = vmax.f32 %v3923_v40, 0.0 }
 0x54c   : > { %v3540_v48 = vsel %vm1712_vm6, %v3538_v27, %v3539_v45  ;;  %v3603_v34 = vsel %vm1712_vm6, %v3539_v45, %v3476_v51 }
 0x54d   : > { %4051 = vst.msk [vmem:[%s6479_s16 + $0x1e8] sm:$0xff] %vm686_vm2, %v3987_v28  ;;  %v3666_v7 = vadd.f32 %v3540_v48, %v3474_v18 }
 0x54e   : > { %v2921_v29 = vpop.f32.mrf.mxu3 }
 0x54f   : > { %v3796_v46 = vadd.f32 %v7108_v47, %v3666_v7  ;;  %v3347_v2 = vrot.slane %v2921_v29, 7 }
 0x551   : > { %v3924_v39 = vadd.f32 %v4838_v1, %v3796_v46  ;;  %v3348_v23 = vsel %vm1519_vm5, %v3346_v24, %v3347_v2  ;;  %v3411_v55 = vsel %vm1519_vm5, %v3347_v2, %v3284_v42 }
 0x552   : > { %v3412_v3 = vadd.f32 %v3411_v55, %v6412_v62  ;;  %v3475_v26 = vadd.f32 %v3348_v23, %v3101_v35 }
 0x553   : > { %v3988_v30 = vmax.f32 %v3924_v39, 0.0 }
 0x554   : > { %v3604_v61 = vadd.f32 %v6391_v57, %v3412_v3  ;;  %v3667_v13 = vadd.f32 %v3603_v34, %v3475_v26 }
 0x555   : > { %4052 = vst.msk [vmem:[%s6479_s16 + $0x1f0] sm:$0xff] %vm686_vm2, %v3988_v30 }
 0x556   : > { %v3734_v42 = vadd.f32 %v7108_v47, %v3604_v61  ;;  %v3797_v62 = vadd.f32 %v7108_v47, %v3667_v13 }
 0x558   : > { %v3862_v38 = vadd.f32 %v4714_v21, %v3734_v42  ;;  %v3925_v54 = vadd.f32 %v4839_v44, %v3797_v62 }
 0x55a   : > { %v3926_v58 = vmax.f32 %v3862_v38, 0.0  ;;  %v3989_v17 = vmax.f32 %v3925_v54, 0.0 }
 0x55c   : > { %3990 = vst.msk [vmem:[%s6479_s16] sm:$0xff] %vm686_vm2, %v3926_v58 }
 0x55d   : > { %4053 = vst.msk [vmem:[%s6479_s16 + $0x1f8] sm:$0xff] %vm686_vm2, %v3989_v17 }
 0x55e PF: > { %s14_s15 = sadd.s32 1, %s4909_s15  }
 0x55f   : > { %p11_p4 = scmp.ge.s32.totalorder %s14_s15, 4  }
 0x561   :  { %13 = sbr.rel (!%p11_p4) target bundleno = 1 (0x1), region = 74 }

</bundles_post_ra>
